<compile_context>
chip_gen: v7x
topology: tpu7x:2x2x1
jax: 0.10.0
libtpu: 0.0.40
codegen_flags: <defaults>
</compile_context>

<pallas_src>
import functools

import numpy as np
import jax
import jax.numpy as jnp
from jax.experimental import pallas as pl
from jax.experimental.pallas import tpu as pltpu


def _output_block_kernel(x_ref, halo_ref, w_ref, o_ref, xs_ref, *,
                         ksize, pad, cin, cout, tile_h, width):
    """One (batch, H-strip) grid step.

    x_ref   : (1, Cin, TH, W)          body rows of this H-strip (pipelined VMEM block)
    halo_ref: (1, Cin, 1, 2*pad, W)    reflection halo rows (pad top rows, pad bottom rows)
    w_ref   : (Cout*Cin*K*K,)          conv weights as f32 scalars in SMEM
    o_ref   : (1, Cout, TH, W)
    xs_ref  : (K, Cin, TH+2*pad, W)    VMEM scratch: K lane-aligned W-shifted
                                       (reflected-border), H-padded copies of the strip
    """
    K = ksize
    W = width
    f32 = jnp.float32

    # ---- 1) assemble the H-reflection-padded strip into the d = 0 (dx == pad) slot ----
    xs_ref[pad, :, pad:pad + tile_h, :] = x_ref[0].astype(f32)
    xs_ref[pad, :, 0:pad, :] = halo_ref[0, :, 0, 0:pad, :].astype(f32)
    xs_ref[pad, :, pad + tile_h:pad + tile_h + pad, :] = \
        halo_ref[0, :, 0, pad:2 * pad, :].astype(f32)

    # ---- 2) build the K lane-aligned, W-shifted copies once (XLU roll + border fix) ----
    xp0 = xs_ref[pad]                                            # (Cin, TH+2p, W)
    lane = jax.lax.broadcasted_iota(jnp.int32, xp0.shape, xp0.ndim - 1)
    for dxi in range(K):
        d = dxi - pad                                            # column shift in [-pad, pad]
        if d == 0:
            continue
        shifted = pltpu.roll(xp0, shift=(-d) % W, axis=xp0.ndim - 1)
        # Fix the |d| wrapped border lanes with the reflected source column.
        if d < 0:
            fixes = [(x, -x - d) for x in range(-d)]                             # left edge
        else:
            fixes = [(W - 1 - m, (W - 1) + m - d) for m in range(d)]             # right edge
        for x, c in fixes:
            shifted = jnp.where(lane == x, xp0[:, :, c:c + 1], shifted)
        xs_ref[dxi] = shifted

    # ---- 3) fused, VALU-bound MAC loop over 8-row output bands -------------------------
    ws = [w_ref[i] for i in range(cout * cin * K * K)]           # hoisted SMEM scalars

    RB = 8 if tile_h % 8 == 0 else tile_h
    n_bands = tile_h // RB

    def band(r0):
        # All Cout accumulators stay register-resident across the Cin*K*K reduction.
        accs = [jnp.zeros((RB, W), f32) for _ in range(cout)]
        for ci in range(cin):
            for dy in range(K):
                # Lane-aligned slabs, each loaded once and reused for all Cout.
                slabs = [xs_ref[dxi, ci, pl.ds(r0 + dy, RB), :] for dxi in range(K)]
                for co in range(cout):
                    base = ((co * cin + ci) * K + dy) * K
                    contrib = slabs[0] * ws[base]
                    for dxi in range(1, K):
                        contrib = contrib + slabs[dxi] * ws[base + dxi]
                    accs[co] = accs[co] + contrib                # K taps fused per statement
        for co in range(cout):
            o_ref[0, co, pl.ds(r0, RB), :] = jnp.tanh(accs[co]).astype(o_ref.dtype)

    if n_bands == 1:
        band(0)
    else:
        def body(rb, carry):
            band(pl.multiple_of(rb * RB, RB))
            return carry
        jax.lax.fori_loop(0, n_bands, body, 0, unroll=(n_bands <= 4))


def _round_up(v, m):
    return ((v + m - 1) // m) * m


def _vmem_estimate(th, W, cin, cout, K, pad, bpe):
    """Per-grid-step VMEM need, using (8,128)-rounded (physical) tile shapes."""
    Wp = _round_up(W, 128)
    thp = _round_up(th, 8)
    thpp = _round_up(th + 2 * pad, 8)
    xs = K * cin * thpp * Wp * 4                       # shifted-copy scratch (f32)
    xin = 2 * cin * thp * Wp * bpe                     # double-buffered input block
    halo = 2 * cin * _round_up(2 * pad, 8) * Wp * bpe  # double-buffered halo block
    out = 2 * cout * thp * Wp * bpe                    # double-buffered output block
    tmp = 2 * cin * thpp * Wp * 4                      # roll/where temporaries
    return xs + xin + halo + out + tmp


def _pick_strip_height(H, W, cin, cout, K, pad, bpe, budget, prefer_multi):
    cands = sorted({th for th in range(8, H + 1, 8) if H % th == 0}, reverse=True)
    if not cands:
        cands = [H]                        # ragged H: whole image in one strip
    fitting = [th for th in cands
               if _vmem_estimate(th, W, cin, cout, K, pad, bpe) <= budget]
    if not fitting:
        fitting = [cands[-1]]              # best effort: smallest legal strip
    if prefer_multi:                       # give v7x's two TensorCores >= 2 grid steps
        multi = [th for th in fitting if th < H]
        if multi:
            return multi[0]
    return fitting[0]


def output_block_forward(x_nchw, weight_oikk, kernel_size=3, strip_h=None):
    """Forward of _OutputBlock: ReflectionPad2d(k//2) -> Conv2d(k, bias=False) -> Tanh.

    x_nchw:      (B, Cin, H, W)   (PyTorch layout; W is the lane dim)
    weight_oikk: (Cout, Cin, K, K)
    returns:     (B, Cout, H, W)
    """
    pad = kernel_size // 2
    B, Cin, H, W = x_nchw.shape
    Cout = weight_oikk.shape[0]
    assert kernel_size % 2 == 1 and pad >= 1, "odd kernel_size >= 3 expected"
    assert H > pad and W > pad, "ReflectionPad2d needs spatial dims > pad"
    # TODO(synk): kernel_size == 1 (pad == 0) would skip the halo/reflection path entirely.

    # Generation-aware VMEM sizing (v5e/v6e: 128 MiB, v7x: 64 MiB per TensorCore).
    try:
        vmem_cap = int(pltpu.get_tpu_info().vmem_capacity_bytes)
    except Exception:
        vmem_cap = 64 * 1024 * 1024
    bpe = x_nchw.dtype.itemsize
    budget = int(vmem_cap * 0.40)

    if strip_h is not None:
        TH = strip_h
        assert H % TH == 0 and (TH == H or TH % 8 == 0)
    else:
        TH = _pick_strip_height(H, W, Cin, Cout, kernel_size, pad, bpe, budget,
                                prefer_multi=(B == 1))
    S = H // TH

    # Reflection halo rows (the pad rows above/below each strip), built with ONE gather.
    top = np.zeros((S, pad), np.int32)
    bot = np.zeros((S, pad), np.int32)
    for s in range(S):
        top[s] = np.arange(pad, 0, -1) if s == 0 else np.arange(s * TH - pad, s * TH)
        bot[s] = (H - 2 - np.arange(pad)) if s == S - 1 \
            else np.arange((s + 1) * TH, (s + 1) * TH + pad)
    rows = np.concatenate([top, bot], axis=1).reshape(-1)        # (S * 2*pad,)
    halos = x_nchw[:, :, rows, :].reshape(B, Cin, S, 2 * pad, W)

    w_flat = weight_oikk.astype(jnp.float32).reshape(-1)         # (Cout*Cin*K*K,) SMEM

    est = _vmem_estimate(TH, W, Cin, Cout, kernel_size, pad, bpe)
    vmem_limit = min(int(vmem_cap * 0.7), max(int(est * 1.5) + (2 << 20), 16 << 20))
    vmem_limit = max(vmem_limit, est + (2 << 20))

    kernel = functools.partial(
        _output_block_kernel, ksize=kernel_size, pad=pad,
        cin=Cin, cout=Cout, tile_h=TH, width=W)

    # TODO(synk): when W % 128 != 0, a reflect-pre-padded 128-aligned W layout (crop after)
    # would make output stores fully lane-dense; skipped to keep the wrapper lean.
    # TODO(synk): optionally DMA activations/outputs as bf16 (accumulation stays f32).
    out = pl.pallas_call(
        kernel,
        out_shape=jax.ShapeDtypeStruct((B, Cout, H, W), x_nchw.dtype),
        grid_spec=pltpu.PrefetchScalarGridSpec(
            num_scalar_prefetch=0,
            grid=(B, S),
            in_specs=[
                pl.BlockSpec((1, Cin, TH, W), lambda b, s: (b, 0, s, 0)),
                pl.BlockSpec((1, Cin, 1, 2 * pad, W), lambda b, s: (b, 0, s, 0, 0)),
                pl.BlockSpec(memory_space=pltpu.MemorySpace.SMEM),
            ],
            out_specs=pl.BlockSpec((1, Cout, TH, W), lambda b, s: (b, 0, s, 0)),
            scratch_shapes=[
                pltpu.VMEM((kernel_size, Cin, TH + 2 * pad, W), jnp.float32)],
        ),
        compiler_params=pltpu.CompilerParams(
            dimension_semantics=("parallel", "parallel"),
            vmem_limit_bytes=vmem_limit),
    )(x_nchw, halos, w_flat)
    return out


def _reference_forward(x_nchw, weight_oikk, kernel_size=3):
    """Pure-JAX reference matching PyTorch semantics."""
    pad = kernel_size // 2
    xp = jnp.pad(x_nchw, ((0, 0), (0, 0), (pad, pad), (pad, pad)), mode="reflect")
    y = jax.lax.conv_general_dilated(
        xp, weight_oikk, window_strides=(1, 1), padding="VALID",
        dimension_numbers=("NCHW", "OIHW", "NCHW"))
    return jnp.tanh(y)


if __name__ == "__main__":
    key = jax.random.PRNGKey(0)
    B, Cin, Cout, H, W, K = 2, 4, 3, 16, 16, 3

    kx, kw = jax.random.split(key)
    x = jax.random.normal(kx, (B, Cin, H, W), dtype=jnp.float32)
    # Deterministic Conv2d-style init (uniform +/- 1/sqrt(fan_in)), use_bias=False.
    fan_in = Cin * K * K
    bound = 1.0 / (fan_in ** 0.5)
    weight = jax.random.uniform(kw, (Cout, Cin, K, K), dtype=jnp.float32,
                                minval=-bound, maxval=bound)

    ref = _reference_forward(x, weight, kernel_size=K)

    # Default path (auto strip height; exercises the banded fori_loop: TH=16 -> 2 bands).
    out = jax.block_until_ready(output_block_forward(x, weight, kernel_size=K))
    assert out.shape == (B, Cout, H, W)
    assert jnp.allclose(out, ref, atol=1e-5, rtol=1e-5), "mismatch (auto strip)"

    # Multi-strip path (exercises H-strip tiling + reflection halos between strips).
    out2 = jax.block_until_ready(
        output_block_forward(x, weight, kernel_size=K, strip_h=8))
    assert jnp.allclose(out2, ref, atol=1e-5, rtol=1e-5), "mismatch (H strips)"

    # Single-image path (prefer_multi forces >= 2 grid steps so both v7x TCs get work).
    out3 = jax.block_until_ready(output_block_forward(x[:1], weight, kernel_size=K))
    assert jnp.allclose(out3, ref[:1], atol=1e-5, rtol=1e-5), "mismatch (B=1)"

    print("KERNEL_OK")
</pallas_src>

<mosaic_0001>
module attributes {stable_mosaic.version = 11 : i64} {
  func.func @_output_block_kernel(%arg0: i32, %arg1: i32, %arg2: memref<1x4x16x16xf32, #tpu.memory_space<vmem>>, %arg3: memref<1x4x1x2x16xf32, #tpu.memory_space<vmem>>, %arg4: memref<108xf32, #tpu.memory_space<smem>>, %arg5: memref<1x3x16x16xf32, #tpu.memory_space<vmem>>, %arg6: memref<3x4x18x16xf32, #tpu.memory_space<vmem>>) attributes {dimension_semantics = [#tpu.dimension_semantics<parallel>, #tpu.dimension_semantics<parallel>], iteration_bounds = array<i64: 2, 1>, scalar_prefetch = 0 : i64, scratch_operands = 1 : i64, tpu.core_type = #tpu.core_type<tc>, window_params = [{transform_indices = @transform_0, window_bounds = array<i64: 1, 4, 16, 16>}, {transform_indices = @transform_1, window_bounds = array<i64: 1, 4, 1, 2, 16>}, {transform_indices = @transform_2, window_bounds = array<i64: 108>}, {transform_indices = @transform_3, window_bounds = array<i64: 1, 3, 16, 16>}]} {
    %c0 = arith.constant 0 : index
    %c0_0 = arith.constant 0 : index
    %c0_1 = arith.constant 0 : index
    %c0_2 = arith.constant 0 : index
    %0 = vector.load %arg2[%c0, %c0_0, %c0_1, %c0_2] : memref<1x4x16x16xf32, #tpu.memory_space<vmem>>, vector<1x4x16x16xf32>
    %1 = vector.shape_cast %0 : vector<1x4x16x16xf32> to vector<4x16x16xf32>
    %c1 = arith.constant 1 : index
    %c0_3 = arith.constant 0 : index
    %c1_4 = arith.constant 1 : index
    %c0_5 = arith.constant 0 : index
    %2 = vector.load %arg6[%c1, %c0_3, %c1_4, %c0_5] : memref<3x4x18x16xf32, #tpu.memory_space<vmem>>, vector<1x4x16x16xf32>
    %3 = vector.shape_cast %2 : vector<1x4x16x16xf32> to vector<4x16x16xf32>
    %4 = vector.shape_cast %1 : vector<4x16x16xf32> to vector<1x4x16x16xf32>
    tpu.vector_store %arg6[%c1, %c0_3, %c1_4, %c0_5], %4 {strides = array<i32>} : memref<3x4x18x16xf32, #tpu.memory_space<vmem>>, vector<1x4x16x16xf32>,
    %c0_6 = arith.constant 0 : index
    %c0_7 = arith.constant 0 : index
    %c0_8 = arith.constant 0 : index
    %c0_9 = arith.constant 0 : index
    %c0_10 = arith.constant 0 : index
    %5 = vector.load %arg3[%c0_6, %c0_7, %c0_8, %c0_9, %c0_10] : memref<1x4x1x2x16xf32, #tpu.memory_space<vmem>>, vector<1x4x1x1x16xf32>
    %6 = vector.shape_cast %5 : vector<1x4x1x1x16xf32> to vector<4x1x16xf32>
    %c1_11 = arith.constant 1 : index
    %c0_12 = arith.constant 0 : index
    %c0_13 = arith.constant 0 : index
    %c0_14 = arith.constant 0 : index
    %7 = vector.load %arg6[%c1_11, %c0_12, %c0_13, %c0_14] : memref<3x4x18x16xf32, #tpu.memory_space<vmem>>, vector<1x4x1x16xf32>
    %8 = vector.shape_cast %7 : vector<1x4x1x16xf32> to vector<4x1x16xf32>
    %9 = vector.shape_cast %6 : vector<4x1x16xf32> to vector<1x4x1x16xf32>
    tpu.vector_store %arg6[%c1_11, %c0_12, %c0_13, %c0_14], %9 {strides = array<i32>} : memref<3x4x18x16xf32, #tpu.memory_space<vmem>>, vector<1x4x1x16xf32>,
    %c0_15 = arith.constant 0 : index
    %c0_16 = arith.constant 0 : index
    %c0_17 = arith.constant 0 : index
    %c1_18 = arith.constant 1 : index
    %c0_19 = arith.constant 0 : index
    %10 = vector.load %arg3[%c0_15, %c0_16, %c0_17, %c1_18, %c0_19] : memref<1x4x1x2x16xf32, #tpu.memory_space<vmem>>, vector<1x4x1x1x16xf32>
    %11 = vector.shape_cast %10 : vector<1x4x1x1x16xf32> to vector<4x1x16xf32>
    %c1_20 = arith.constant 1 : index
    %c0_21 = arith.constant 0 : index
    %c17 = arith.constant 17 : index
    %c0_22 = arith.constant 0 : index
    %12 = vector.load %arg6[%c1_20, %c0_21, %c17, %c0_22] : memref<3x4x18x16xf32, #tpu.memory_space<vmem>>, vector<1x4x1x16xf32>
    %13 = vector.shape_cast %12 : vector<1x4x1x16xf32> to vector<4x1x16xf32>
    %14 = vector.shape_cast %11 : vector<4x1x16xf32> to vector<1x4x1x16xf32>
    tpu.vector_store %arg6[%c1_20, %c0_21, %c17, %c0_22], %14 {strides = array<i32>} : memref<3x4x18x16xf32, #tpu.memory_space<vmem>>, vector<1x4x1x16xf32>,
    %c1_23 = arith.constant 1 : index
    %c0_24 = arith.constant 0 : index
    %c0_25 = arith.constant 0 : index
    %c0_26 = arith.constant 0 : index
    %15 = vector.load %arg6[%c1_23, %c0_24, %c0_25, %c0_26] : memref<3x4x18x16xf32, #tpu.memory_space<vmem>>, vector<1x4x18x16xf32>
    %16 = vector.shape_cast %15 : vector<1x4x18x16xf32> to vector<4x18x16xf32>
    %17 = tpu.iota {dimensions = array<i32: 2>} : vector<4x18x16xi32>
    %c1_i32 = arith.constant 1 : i32
    %18 = tpu.dynamic_rotate %16 by %c1_i32 dim 2 : vector<4x18x16xf32>, i32 -> vector<4x18x16xf32>
    %c0_i32 = arith.constant 0 : i32
    %19 = vector.broadcast %c0_i32 : i32 to vector<4x18x16xi32>
    %20 = arith.cmpi eq, %17, %19 : vector<4x18x16xi32>
    %21 = vector.extract_strided_slice %16 {offsets = [0, 0, 1], sizes = [4, 18, 1], strides = [1, 1, 1]} : vector<4x18x16xf32> to vector<4x18x1xf32>
    %22 = vector.shape_cast %21 : vector<4x18x1xf32> to vector<4x18x1xf32>
    %23 = vector.broadcast %22 : vector<4x18x1xf32> to vector<4x18x16xf32>
    %24 = arith.select %20, %23, %18 : vector<4x18x16xi1>, vector<4x18x16xf32>
    %c0_27 = arith.constant 0 : index
    %c0_28 = arith.constant 0 : index
    %c0_29 = arith.constant 0 : index
    %c0_30 = arith.constant 0 : index
    %25 = vector.load %arg6[%c0_27, %c0_28, %c0_29, %c0_30] : memref<3x4x18x16xf32, #tpu.memory_space<vmem>>, vector<1x4x18x16xf32>
    %26 = vector.shape_cast %25 : vector<1x4x18x16xf32> to vector<4x18x16xf32>
    %27 = vector.shape_cast %24 : vector<4x18x16xf32> to vector<1x4x18x16xf32>
    tpu.vector_store %arg6[%c0_27, %c0_28, %c0_29, %c0_30], %27 {strides = array<i32>} : memref<3x4x18x16xf32, #tpu.memory_space<vmem>>, vector<1x4x18x16xf32>,
    %c15_i32 = arith.constant 15 : i32
    %28 = tpu.dynamic_rotate %16 by %c15_i32 dim 2 : vector<4x18x16xf32>, i32 -> vector<4x18x16xf32>
    %c15_i32_31 = arith.constant 15 : i32
    %29 = vector.broadcast %c15_i32_31 : i32 to vector<4x18x16xi32>
    %30 = arith.cmpi eq, %17, %29 : vector<4x18x16xi32>
    %31 = vector.extract_strided_slice %16 {offsets = [0, 0, 14], sizes = [4, 18, 1], strides = [1, 1, 1]} : vector<4x18x16xf32> to vector<4x18x1xf32>
    %32 = vector.shape_cast %31 : vector<4x18x1xf32> to vector<4x18x1xf32>
    %33 = vector.broadcast %32 : vector<4x18x1xf32> to vector<4x18x16xf32>
    %34 = arith.select %30, %33, %28 : vector<4x18x16xi1>, vector<4x18x16xf32>
    %c2 = arith.constant 2 : index
    %c0_32 = arith.constant 0 : index
    %c0_33 = arith.constant 0 : index
    %c0_34 = arith.constant 0 : index
    %35 = vector.load %arg6[%c2, %c0_32, %c0_33, %c0_34] : memref<3x4x18x16xf32, #tpu.memory_space<vmem>>, vector<1x4x18x16xf32>
    %36 = vector.shape_cast %35 : vector<1x4x18x16xf32> to vector<4x18x16xf32>
    %37 = vector.shape_cast %34 : vector<4x18x16xf32> to vector<1x4x18x16xf32>
    tpu.vector_store %arg6[%c2, %c0_32, %c0_33, %c0_34], %37 {strides = array<i32>} : memref<3x4x18x16xf32, #tpu.memory_space<vmem>>, vector<1x4x18x16xf32>,
    %c0_35 = arith.constant 0 : index
    %38 = memref.load %arg4[%c0_35] : memref<108xf32, #tpu.memory_space<smem>>
    %c1_36 = arith.constant 1 : index
    %39 = memref.load %arg4[%c1_36] : memref<108xf32, #tpu.memory_space<smem>>
    %c2_37 = arith.constant 2 : index
    %40 = memref.load %arg4[%c2_37] : memref<108xf32, #tpu.memory_space<smem>>
    %c3 = arith.constant 3 : index
    %41 = memref.load %arg4[%c3] : memref<108xf32, #tpu.memory_space<smem>>
    %c4 = arith.constant 4 : index
    %42 = memref.load %arg4[%c4] : memref<108xf32, #tpu.memory_space<smem>>
    %c5 = arith.constant 5 : index
    %43 = memref.load %arg4[%c5] : memref<108xf32, #tpu.memory_space<smem>>
    %c6 = arith.constant 6 : index
    %44 = memref.load %arg4[%c6] : memref<108xf32, #tpu.memory_space<smem>>
    %c7 = arith.constant 7 : index
    %45 = memref.load %arg4[%c7] : memref<108xf32, #tpu.memory_space<smem>>
    %c8 = arith.constant 8 : index
    %46 = memref.load %arg4[%c8] : memref<108xf32, #tpu.memory_space<smem>>
    %c9 = arith.constant 9 : index
    %47 = memref.load %arg4[%c9] : memref<108xf32, #tpu.memory_space<smem>>
    %c10 = arith.constant 10 : index
    %48 = memref.load %arg4[%c10] : memref<108xf32, #tpu.memory_space<smem>>
    %c11 = arith.constant 11 : index
    %49 = memref.load %arg4[%c11] : memref<108xf32, #tpu.memory_space<smem>>
    %c12 = arith.constant 12 : index
    %50 = memref.load %arg4[%c12] : memref<108xf32, #tpu.memory_space<smem>>
    %c13 = arith.constant 13 : index
    %51 = memref.load %arg4[%c13] : memref<108xf32, #tpu.memory_space<smem>>
    %c14 = arith.constant 14 : index
    %52 = memref.load %arg4[%c14] : memref<108xf32, #tpu.memory_space<smem>>
    %c15 = arith.constant 15 : index
    %53 = memref.load %arg4[%c15] : memref<108xf32, #tpu.memory_space<smem>>
    %c16 = arith.constant 16 : index
    %54 = memref.load %arg4[%c16] : memref<108xf32, #tpu.memory_space<smem>>
    %c17_38 = arith.constant 17 : index
    %55 = memref.load %arg4[%c17_38] : memref<108xf32, #tpu.memory_space<smem>>
    %c18 = arith.constant 18 : index
    %56 = memref.load %arg4[%c18] : memref<108xf32, #tpu.memory_space<smem>>
    %c19 = arith.constant 19 : index
    %57 = memref.load %arg4[%c19] : memref<108xf32, #tpu.memory_space<smem>>
    %c20 = arith.constant 20 : index
    %58 = memref.load %arg4[%c20] : memref<108xf32, #tpu.memory_space<smem>>
    %c21 = arith.constant 21 : index
    %59 = memref.load %arg4[%c21] : memref<108xf32, #tpu.memory_space<smem>>
    %c22 = arith.constant 22 : index
    %60 = memref.load %arg4[%c22] : memref<108xf32, #tpu.memory_space<smem>>
    %c23 = arith.constant 23 : index
    %61 = memref.load %arg4[%c23] : memref<108xf32, #tpu.memory_space<smem>>
    %c24 = arith.constant 24 : index
    %62 = memref.load %arg4[%c24] : memref<108xf32, #tpu.memory_space<smem>>
    %c25 = arith.constant 25 : index
    %63 = memref.load %arg4[%c25] : memref<108xf32, #tpu.memory_space<smem>>
    %c26 = arith.constant 26 : index
    %64 = memref.load %arg4[%c26] : memref<108xf32, #tpu.memory_space<smem>>
    %c27 = arith.constant 27 : index
    %65 = memref.load %arg4[%c27] : memref<108xf32, #tpu.memory_space<smem>>
    %c28 = arith.constant 28 : index
    %66 = memref.load %arg4[%c28] : memref<108xf32, #tpu.memory_space<smem>>
    %c29 = arith.constant 29 : index
    %67 = memref.load %arg4[%c29] : memref<108xf32, #tpu.memory_space<smem>>
    %c30 = arith.constant 30 : index
    %68 = memref.load %arg4[%c30] : memref<108xf32, #tpu.memory_space<smem>>
    %c31 = arith.constant 31 : index
    %69 = memref.load %arg4[%c31] : memref<108xf32, #tpu.memory_space<smem>>
    %c32 = arith.constant 32 : index
    %70 = memref.load %arg4[%c32] : memref<108xf32, #tpu.memory_space<smem>>
    %c33 = arith.constant 33 : index
    %71 = memref.load %arg4[%c33] : memref<108xf32, #tpu.memory_space<smem>>
    %c34 = arith.constant 34 : index
    %72 = memref.load %arg4[%c34] : memref<108xf32, #tpu.memory_space<smem>>
    %c35 = arith.constant 35 : index
    %73 = memref.load %arg4[%c35] : memref<108xf32, #tpu.memory_space<smem>>
    %c36 = arith.constant 36 : index
    %74 = memref.load %arg4[%c36] : memref<108xf32, #tpu.memory_space<smem>>
    %c37 = arith.constant 37 : index
    %75 = memref.load %arg4[%c37] : memref<108xf32, #tpu.memory_space<smem>>
    %c38 = arith.constant 38 : index
    %76 = memref.load %arg4[%c38] : memref<108xf32, #tpu.memory_space<smem>>
    %c39 = arith.constant 39 : index
    %77 = memref.load %arg4[%c39] : memref<108xf32, #tpu.memory_space<smem>>
    %c40 = arith.constant 40 : index
    %78 = memref.load %arg4[%c40] : memref<108xf32, #tpu.memory_space<smem>>
    %c41 = arith.constant 41 : index
    %79 = memref.load %arg4[%c41] : memref<108xf32, #tpu.memory_space<smem>>
    %c42 = arith.constant 42 : index
    %80 = memref.load %arg4[%c42] : memref<108xf32, #tpu.memory_space<smem>>
    %c43 = arith.constant 43 : index
    %81 = memref.load %arg4[%c43] : memref<108xf32, #tpu.memory_space<smem>>
    %c44 = arith.constant 44 : index
    %82 = memref.load %arg4[%c44] : memref<108xf32, #tpu.memory_space<smem>>
    %c45 = arith.constant 45 : index
    %83 = memref.load %arg4[%c45] : memref<108xf32, #tpu.memory_space<smem>>
    %c46 = arith.constant 46 : index
    %84 = memref.load %arg4[%c46] : memref<108xf32, #tpu.memory_space<smem>>
    %c47 = arith.constant 47 : index
    %85 = memref.load %arg4[%c47] : memref<108xf32, #tpu.memory_space<smem>>
    %c48 = arith.constant 48 : index
    %86 = memref.load %arg4[%c48] : memref<108xf32, #tpu.memory_space<smem>>
    %c49 = arith.constant 49 : index
    %87 = memref.load %arg4[%c49] : memref<108xf32, #tpu.memory_space<smem>>
    %c50 = arith.constant 50 : index
    %88 = memref.load %arg4[%c50] : memref<108xf32, #tpu.memory_space<smem>>
    %c51 = arith.constant 51 : index
    %89 = memref.load %arg4[%c51] : memref<108xf32, #tpu.memory_space<smem>>
    %c52 = arith.constant 52 : index
    %90 = memref.load %arg4[%c52] : memref<108xf32, #tpu.memory_space<smem>>
    %c53 = arith.constant 53 : index
    %91 = memref.load %arg4[%c53] : memref<108xf32, #tpu.memory_space<smem>>
    %c54 = arith.constant 54 : index
    %92 = memref.load %arg4[%c54] : memref<108xf32, #tpu.memory_space<smem>>
    %c55 = arith.constant 55 : index
    %93 = memref.load %arg4[%c55] : memref<108xf32, #tpu.memory_space<smem>>
    %c56 = arith.constant 56 : index
    %94 = memref.load %arg4[%c56] : memref<108xf32, #tpu.memory_space<smem>>
    %c57 = arith.constant 57 : index
    %95 = memref.load %arg4[%c57] : memref<108xf32, #tpu.memory_space<smem>>
    %c58 = arith.constant 58 : index
    %96 = memref.load %arg4[%c58] : memref<108xf32, #tpu.memory_space<smem>>
    %c59 = arith.constant 59 : index
    %97 = memref.load %arg4[%c59] : memref<108xf32, #tpu.memory_space<smem>>
    %c60 = arith.constant 60 : index
    %98 = memref.load %arg4[%c60] : memref<108xf32, #tpu.memory_space<smem>>
    %c61 = arith.constant 61 : index
    %99 = memref.load %arg4[%c61] : memref<108xf32, #tpu.memory_space<smem>>
    %c62 = arith.constant 62 : index
    %100 = memref.load %arg4[%c62] : memref<108xf32, #tpu.memory_space<smem>>
    %c63 = arith.constant 63 : index
    %101 = memref.load %arg4[%c63] : memref<108xf32, #tpu.memory_space<smem>>
    %c64 = arith.constant 64 : index
    %102 = memref.load %arg4[%c64] : memref<108xf32, #tpu.memory_space<smem>>
    %c65 = arith.constant 65 : index
    %103 = memref.load %arg4[%c65] : memref<108xf32, #tpu.memory_space<smem>>
    %c66 = arith.constant 66 : index
    %104 = memref.load %arg4[%c66] : memref<108xf32, #tpu.memory_space<smem>>
    %c67 = arith.constant 67 : index
    %105 = memref.load %arg4[%c67] : memref<108xf32, #tpu.memory_space<smem>>
    %c68 = arith.constant 68 : index
    %106 = memref.load %arg4[%c68] : memref<108xf32, #tpu.memory_space<smem>>
    %c69 = arith.constant 69 : index
    %107 = memref.load %arg4[%c69] : memref<108xf32, #tpu.memory_space<smem>>
    %c70 = arith.constant 70 : index
    %108 = memref.load %arg4[%c70] : memref<108xf32, #tpu.memory_space<smem>>
    %c71 = arith.constant 71 : index
    %109 = memref.load %arg4[%c71] : memref<108xf32, #tpu.memory_space<smem>>
    %c72 = arith.constant 72 : index
    %110 = memref.load %arg4[%c72] : memref<108xf32, #tpu.memory_space<smem>>
    %c73 = arith.constant 73 : index
    %111 = memref.load %arg4[%c73] : memref<108xf32, #tpu.memory_space<smem>>
    %c74 = arith.constant 74 : index
    %112 = memref.load %arg4[%c74] : memref<108xf32, #tpu.memory_space<smem>>
    %c75 = arith.constant 75 : index
    %113 = memref.load %arg4[%c75] : memref<108xf32, #tpu.memory_space<smem>>
    %c76 = arith.constant 76 : index
    %114 = memref.load %arg4[%c76] : memref<108xf32, #tpu.memory_space<smem>>
    %c77 = arith.constant 77 : index
    %115 = memref.load %arg4[%c77] : memref<108xf32, #tpu.memory_space<smem>>
    %c78 = arith.constant 78 : index
    %116 = memref.load %arg4[%c78] : memref<108xf32, #tpu.memory_space<smem>>
    %c79 = arith.constant 79 : index
    %117 = memref.load %arg4[%c79] : memref<108xf32, #tpu.memory_space<smem>>
    %c80 = arith.constant 80 : index
    %118 = memref.load %arg4[%c80] : memref<108xf32, #tpu.memory_space<smem>>
    %c81 = arith.constant 81 : index
    %119 = memref.load %arg4[%c81] : memref<108xf32, #tpu.memory_space<smem>>
    %c82 = arith.constant 82 : index
    %120 = memref.load %arg4[%c82] : memref<108xf32, #tpu.memory_space<smem>>
    %c83 = arith.constant 83 : index
    %121 = memref.load %arg4[%c83] : memref<108xf32, #tpu.memory_space<smem>>
    %c84 = arith.constant 84 : index
    %122 = memref.load %arg4[%c84] : memref<108xf32, #tpu.memory_space<smem>>
    %c85 = arith.constant 85 : index
    %123 = memref.load %arg4[%c85] : memref<108xf32, #tpu.memory_space<smem>>
    %c86 = arith.constant 86 : index
    %124 = memref.load %arg4[%c86] : memref<108xf32, #tpu.memory_space<smem>>
    %c87 = arith.constant 87 : index
    %125 = memref.load %arg4[%c87] : memref<108xf32, #tpu.memory_space<smem>>
    %c88 = arith.constant 88 : index
    %126 = memref.load %arg4[%c88] : memref<108xf32, #tpu.memory_space<smem>>
    %c89 = arith.constant 89 : index
    %127 = memref.load %arg4[%c89] : memref<108xf32, #tpu.memory_space<smem>>
    %c90 = arith.constant 90 : index
    %128 = memref.load %arg4[%c90] : memref<108xf32, #tpu.memory_space<smem>>
    %c91 = arith.constant 91 : index
    %129 = memref.load %arg4[%c91] : memref<108xf32, #tpu.memory_space<smem>>
    %c92 = arith.constant 92 : index
    %130 = memref.load %arg4[%c92] : memref<108xf32, #tpu.memory_space<smem>>
    %c93 = arith.constant 93 : index
    %131 = memref.load %arg4[%c93] : memref<108xf32, #tpu.memory_space<smem>>
    %c94 = arith.constant 94 : index
    %132 = memref.load %arg4[%c94] : memref<108xf32, #tpu.memory_space<smem>>
    %c95 = arith.constant 95 : index
    %133 = memref.load %arg4[%c95] : memref<108xf32, #tpu.memory_space<smem>>
    %c96 = arith.constant 96 : index
    %134 = memref.load %arg4[%c96] : memref<108xf32, #tpu.memory_space<smem>>
    %c97 = arith.constant 97 : index
    %135 = memref.load %arg4[%c97] : memref<108xf32, #tpu.memory_space<smem>>
    %c98 = arith.constant 98 : index
    %136 = memref.load %arg4[%c98] : memref<108xf32, #tpu.memory_space<smem>>
    %c99 = arith.constant 99 : index
    %137 = memref.load %arg4[%c99] : memref<108xf32, #tpu.memory_space<smem>>
    %c100 = arith.constant 100 : index
    %138 = memref.load %arg4[%c100] : memref<108xf32, #tpu.memory_space<smem>>
    %c101 = arith.constant 101 : index
    %139 = memref.load %arg4[%c101] : memref<108xf32, #tpu.memory_space<smem>>
    %c102 = arith.constant 102 : index
    %140 = memref.load %arg4[%c102] : memref<108xf32, #tpu.memory_space<smem>>
    %c103 = arith.constant 103 : index
    %141 = memref.load %arg4[%c103] : memref<108xf32, #tpu.memory_space<smem>>
    %c104 = arith.constant 104 : index
    %142 = memref.load %arg4[%c104] : memref<108xf32, #tpu.memory_space<smem>>
    %c105 = arith.constant 105 : index
    %143 = memref.load %arg4[%c105] : memref<108xf32, #tpu.memory_space<smem>>
    %c106 = arith.constant 106 : index
    %144 = memref.load %arg4[%c106] : memref<108xf32, #tpu.memory_space<smem>>
    %c107 = arith.constant 107 : index
    %145 = memref.load %arg4[%c107] : memref<108xf32, #tpu.memory_space<smem>>
    %c0_i32_39 = arith.constant 0 : i32
    %c8_i32 = arith.constant 8 : i32
    %146 = arith.muli %c0_i32_39, %c8_i32 : i32
    %147 = tpu.assume_multiple %146, 8 : i32
    %cst = arith.constant 0.000000e+00 : f32
    %148 = vector.broadcast %cst : f32 to vector<8x16xf32>
    %cst_40 = arith.constant 0.000000e+00 : f32
    %149 = vector.broadcast %cst_40 : f32 to vector<8x16xf32>
    %cst_41 = arith.constant 0.000000e+00 : f32
    %150 = vector.broadcast %cst_41 : f32 to vector<8x16xf32>
    %c0_i32_42 = arith.constant 0 : i32
    %151 = arith.addi %147, %c0_i32_42 : i32
    %c0_43 = arith.constant 0 : index
    %c0_44 = arith.constant 0 : index
    %152 = arith.index_cast %151 : i32 to index
    %c0_45 = arith.constant 0 : index
    %153 = vector.load %arg6[%c0_43, %c0_44, %152, %c0_45] : memref<3x4x18x16xf32, #tpu.memory_space<vmem>>, vector<1x1x8x16xf32>
    %154 = vector.shape_cast %153 : vector<1x1x8x16xf32> to vector<8x16xf32>
    %c0_i32_46 = arith.constant 0 : i32
    %155 = arith.addi %147, %c0_i32_46 : i32
    %c1_47 = arith.constant 1 : index
    %c0_48 = arith.constant 0 : index
    %156 = arith.index_cast %155 : i32 to index
    %c0_49 = arith.constant 0 : index
    %157 = vector.load %arg6[%c1_47, %c0_48, %156, %c0_49] : memref<3x4x18x16xf32, #tpu.memory_space<vmem>>, vector<1x1x8x16xf32>
    %158 = vector.shape_cast %157 : vector<1x1x8x16xf32> to vector<8x16xf32>
    %c0_i32_50 = arith.constant 0 : i32
    %159 = arith.addi %147, %c0_i32_50 : i32
    %c2_51 = arith.constant 2 : index
    %c0_52 = arith.constant 0 : index
    %160 = arith.index_cast %159 : i32 to index
    %c0_53 = arith.constant 0 : index
    %161 = vector.load %arg6[%c2_51, %c0_52, %160, %c0_53] : memref<3x4x18x16xf32, #tpu.memory_space<vmem>>, vector<1x1x8x16xf32>
    %162 = vector.shape_cast %161 : vector<1x1x8x16xf32> to vector<8x16xf32>
    %163 = vector.broadcast %38 : f32 to vector<8x16xf32>
    %164 = arith.mulf %154, %163 : vector<8x16xf32>
    %165 = vector.broadcast %39 : f32 to vector<8x16xf32>
    %166 = arith.mulf %158, %165 : vector<8x16xf32>
    %167 = arith.addf %164, %166 : vector<8x16xf32>
    %168 = vector.broadcast %40 : f32 to vector<8x16xf32>
    %169 = arith.mulf %162, %168 : vector<8x16xf32>
    %170 = arith.addf %167, %169 : vector<8x16xf32>
    %171 = arith.addf %148, %170 : vector<8x16xf32>
    %172 = vector.broadcast %74 : f32 to vector<8x16xf32>
    %173 = arith.mulf %154, %172 : vector<8x16xf32>
    %174 = vector.broadcast %75 : f32 to vector<8x16xf32>
    %175 = arith.mulf %158, %174 : vector<8x16xf32>
    %176 = arith.addf %173, %175 : vector<8x16xf32>
    %177 = vector.broadcast %76 : f32 to vector<8x16xf32>
    %178 = arith.mulf %162, %177 : vector<8x16xf32>
    %179 = arith.addf %176, %178 : vector<8x16xf32>
    %180 = arith.addf %149, %179 : vector<8x16xf32>
    %181 = vector.broadcast %110 : f32 to vector<8x16xf32>
    %182 = arith.mulf %154, %181 : vector<8x16xf32>
    %183 = vector.broadcast %111 : f32 to vector<8x16xf32>
    %184 = arith.mulf %158, %183 : vector<8x16xf32>
    %185 = arith.addf %182, %184 : vector<8x16xf32>
    %186 = vector.broadcast %112 : f32 to vector<8x16xf32>
    %187 = arith.mulf %162, %186 : vector<8x16xf32>
    %188 = arith.addf %185, %187 : vector<8x16xf32>
    %189 = arith.addf %150, %188 : vector<8x16xf32>
    %c1_i32_54 = arith.constant 1 : i32
    %190 = arith.addi %147, %c1_i32_54 : i32
    %c0_55 = arith.constant 0 : index
    %c0_56 = arith.constant 0 : index
    %191 = arith.index_cast %190 : i32 to index
    %c0_57 = arith.constant 0 : index
    %192 = vector.load %arg6[%c0_55, %c0_56, %191, %c0_57] : memref<3x4x18x16xf32, #tpu.memory_space<vmem>>, vector<1x1x8x16xf32>
    %193 = vector.shape_cast %192 : vector<1x1x8x16xf32> to vector<8x16xf32>
    %c1_i32_58 = arith.constant 1 : i32
    %194 = arith.addi %147, %c1_i32_58 : i32
    %c1_59 = arith.constant 1 : index
    %c0_60 = arith.constant 0 : index
    %195 = arith.index_cast %194 : i32 to index
    %c0_61 = arith.constant 0 : index
    %196 = vector.load %arg6[%c1_59, %c0_60, %195, %c0_61] : memref<3x4x18x16xf32, #tpu.memory_space<vmem>>, vector<1x1x8x16xf32>
    %197 = vector.shape_cast %196 : vector<1x1x8x16xf32> to vector<8x16xf32>
    %c1_i32_62 = arith.constant 1 : i32
    %198 = arith.addi %147, %c1_i32_62 : i32
    %c2_63 = arith.constant 2 : index
    %c0_64 = arith.constant 0 : index
    %199 = arith.index_cast %198 : i32 to index
    %c0_65 = arith.constant 0 : index
    %200 = vector.load %arg6[%c2_63, %c0_64, %199, %c0_65] : memref<3x4x18x16xf32, #tpu.memory_space<vmem>>, vector<1x1x8x16xf32>
    %201 = vector.shape_cast %200 : vector<1x1x8x16xf32> to vector<8x16xf32>
    %202 = vector.broadcast %41 : f32 to vector<8x16xf32>
    %203 = arith.mulf %193, %202 : vector<8x16xf32>
    %204 = vector.broadcast %42 : f32 to vector<8x16xf32>
    %205 = arith.mulf %197, %204 : vector<8x16xf32>
    %206 = arith.addf %203, %205 : vector<8x16xf32>
    %207 = vector.broadcast %43 : f32 to vector<8x16xf32>
    %208 = arith.mulf %201, %207 : vector<8x16xf32>
    %209 = arith.addf %206, %208 : vector<8x16xf32>
    %210 = arith.addf %171, %209 : vector<8x16xf32>
    %211 = vector.broadcast %77 : f32 to vector<8x16xf32>
    %212 = arith.mulf %193, %211 : vector<8x16xf32>
    %213 = vector.broadcast %78 : f32 to vector<8x16xf32>
    %214 = arith.mulf %197, %213 : vector<8x16xf32>
    %215 = arith.addf %212, %214 : vector<8x16xf32>
    %216 = vector.broadcast %79 : f32 to vector<8x16xf32>
    %217 = arith.mulf %201, %216 : vector<8x16xf32>
    %218 = arith.addf %215, %217 : vector<8x16xf32>
    %219 = arith.addf %180, %218 : vector<8x16xf32>
    %220 = vector.broadcast %113 : f32 to vector<8x16xf32>
    %221 = arith.mulf %193, %220 : vector<8x16xf32>
    %222 = vector.broadcast %114 : f32 to vector<8x16xf32>
    %223 = arith.mulf %197, %222 : vector<8x16xf32>
    %224 = arith.addf %221, %223 : vector<8x16xf32>
    %225 = vector.broadcast %115 : f32 to vector<8x16xf32>
    %226 = arith.mulf %201, %225 : vector<8x16xf32>
    %227 = arith.addf %224, %226 : vector<8x16xf32>
    %228 = arith.addf %189, %227 : vector<8x16xf32>
    %c2_i32 = arith.constant 2 : i32
    %229 = arith.addi %147, %c2_i32 : i32
    %c0_66 = arith.constant 0 : index
    %c0_67 = arith.constant 0 : index
    %230 = arith.index_cast %229 : i32 to index
    %c0_68 = arith.constant 0 : index
    %231 = vector.load %arg6[%c0_66, %c0_67, %230, %c0_68] : memref<3x4x18x16xf32, #tpu.memory_space<vmem>>, vector<1x1x8x16xf32>
    %232 = vector.shape_cast %231 : vector<1x1x8x16xf32> to vector<8x16xf32>
    %c2_i32_69 = arith.constant 2 : i32
    %233 = arith.addi %147, %c2_i32_69 : i32
    %c1_70 = arith.constant 1 : index
    %c0_71 = arith.constant 0 : index
    %234 = arith.index_cast %233 : i32 to index
    %c0_72 = arith.constant 0 : index
    %235 = vector.load %arg6[%c1_70, %c0_71, %234, %c0_72] : memref<3x4x18x16xf32, #tpu.memory_space<vmem>>, vector<1x1x8x16xf32>
    %236 = vector.shape_cast %235 : vector<1x1x8x16xf32> to vector<8x16xf32>
    %c2_i32_73 = arith.constant 2 : i32
    %237 = arith.addi %147, %c2_i32_73 : i32
    %c2_74 = arith.constant 2 : index
    %c0_75 = arith.constant 0 : index
    %238 = arith.index_cast %237 : i32 to index
    %c0_76 = arith.constant 0 : index
    %239 = vector.load %arg6[%c2_74, %c0_75, %238, %c0_76] : memref<3x4x18x16xf32, #tpu.memory_space<vmem>>, vector<1x1x8x16xf32>
    %240 = vector.shape_cast %239 : vector<1x1x8x16xf32> to vector<8x16xf32>
    %241 = vector.broadcast %44 : f32 to vector<8x16xf32>
    %242 = arith.mulf %232, %241 : vector<8x16xf32>
    %243 = vector.broadcast %45 : f32 to vector<8x16xf32>
    %244 = arith.mulf %236, %243 : vector<8x16xf32>
    %245 = arith.addf %242, %244 : vector<8x16xf32>
    %246 = vector.broadcast %46 : f32 to vector<8x16xf32>
    %247 = arith.mulf %240, %246 : vector<8x16xf32>
    %248 = arith.addf %245, %247 : vector<8x16xf32>
    %249 = arith.addf %210, %248 : vector<8x16xf32>
    %250 = vector.broadcast %80 : f32 to vector<8x16xf32>
    %251 = arith.mulf %232, %250 : vector<8x16xf32>
    %252 = vector.broadcast %81 : f32 to vector<8x16xf32>
    %253 = arith.mulf %236, %252 : vector<8x16xf32>
    %254 = arith.addf %251, %253 : vector<8x16xf32>
    %255 = vector.broadcast %82 : f32 to vector<8x16xf32>
    %256 = arith.mulf %240, %255 : vector<8x16xf32>
    %257 = arith.addf %254, %256 : vector<8x16xf32>
    %258 = arith.addf %219, %257 : vector<8x16xf32>
    %259 = vector.broadcast %116 : f32 to vector<8x16xf32>
    %260 = arith.mulf %232, %259 : vector<8x16xf32>
    %261 = vector.broadcast %117 : f32 to vector<8x16xf32>
    %262 = arith.mulf %236, %261 : vector<8x16xf32>
    %263 = arith.addf %260, %262 : vector<8x16xf32>
    %264 = vector.broadcast %118 : f32 to vector<8x16xf32>
    %265 = arith.mulf %240, %264 : vector<8x16xf32>
    %266 = arith.addf %263, %265 : vector<8x16xf32>
    %267 = arith.addf %228, %266 : vector<8x16xf32>
    %c0_i32_77 = arith.constant 0 : i32
    %268 = arith.addi %147, %c0_i32_77 : i32
    %c0_78 = arith.constant 0 : index
    %c1_79 = arith.constant 1 : index
    %269 = arith.index_cast %268 : i32 to index
    %c0_80 = arith.constant 0 : index
    %270 = vector.load %arg6[%c0_78, %c1_79, %269, %c0_80] : memref<3x4x18x16xf32, #tpu.memory_space<vmem>>, vector<1x1x8x16xf32>
    %271 = vector.shape_cast %270 : vector<1x1x8x16xf32> to vector<8x16xf32>
    %c0_i32_81 = arith.constant 0 : i32
    %272 = arith.addi %147, %c0_i32_81 : i32
    %c1_82 = arith.constant 1 : index
    %c1_83 = arith.constant 1 : index
    %273 = arith.index_cast %272 : i32 to index
    %c0_84 = arith.constant 0 : index
    %274 = vector.load %arg6[%c1_82, %c1_83, %273, %c0_84] : memref<3x4x18x16xf32, #tpu.memory_space<vmem>>, vector<1x1x8x16xf32>
    %275 = vector.shape_cast %274 : vector<1x1x8x16xf32> to vector<8x16xf32>
    %c0_i32_85 = arith.constant 0 : i32
    %276 = arith.addi %147, %c0_i32_85 : i32
    %c2_86 = arith.constant 2 : index
    %c1_87 = arith.constant 1 : index
    %277 = arith.index_cast %276 : i32 to index
    %c0_88 = arith.constant 0 : index
    %278 = vector.load %arg6[%c2_86, %c1_87, %277, %c0_88] : memref<3x4x18x16xf32, #tpu.memory_space<vmem>>, vector<1x1x8x16xf32>
    %279 = vector.shape_cast %278 : vector<1x1x8x16xf32> to vector<8x16xf32>
    %280 = vector.broadcast %47 : f32 to vector<8x16xf32>
    %281 = arith.mulf %271, %280 : vector<8x16xf32>
    %282 = vector.broadcast %48 : f32 to vector<8x16xf32>
    %283 = arith.mulf %275, %282 : vector<8x16xf32>
    %284 = arith.addf %281, %283 : vector<8x16xf32>
    %285 = vector.broadcast %49 : f32 to vector<8x16xf32>
    %286 = arith.mulf %279, %285 : vector<8x16xf32>
    %287 = arith.addf %284, %286 : vector<8x16xf32>
    %288 = arith.addf %249, %287 : vector<8x16xf32>
    %289 = vector.broadcast %83 : f32 to vector<8x16xf32>
    %290 = arith.mulf %271, %289 : vector<8x16xf32>
    %291 = vector.broadcast %84 : f32 to vector<8x16xf32>
    %292 = arith.mulf %275, %291 : vector<8x16xf32>
    %293 = arith.addf %290, %292 : vector<8x16xf32>
    %294 = vector.broadcast %85 : f32 to vector<8x16xf32>
    %295 = arith.mulf %279, %294 : vector<8x16xf32>
    %296 = arith.addf %293, %295 : vector<8x16xf32>
    %297 = arith.addf %258, %296 : vector<8x16xf32>
    %298 = vector.broadcast %119 : f32 to vector<8x16xf32>
    %299 = arith.mulf %271, %298 : vector<8x16xf32>
    %300 = vector.broadcast %120 : f32 to vector<8x16xf32>
    %301 = arith.mulf %275, %300 : vector<8x16xf32>
    %302 = arith.addf %299, %301 : vector<8x16xf32>
    %303 = vector.broadcast %121 : f32 to vector<8x16xf32>
    %304 = arith.mulf %279, %303 : vector<8x16xf32>
    %305 = arith.addf %302, %304 : vector<8x16xf32>
    %306 = arith.addf %267, %305 : vector<8x16xf32>
    %c1_i32_89 = arith.constant 1 : i32
    %307 = arith.addi %147, %c1_i32_89 : i32
    %c0_90 = arith.constant 0 : index
    %c1_91 = arith.constant 1 : index
    %308 = arith.index_cast %307 : i32 to index
    %c0_92 = arith.constant 0 : index
    %309 = vector.load %arg6[%c0_90, %c1_91, %308, %c0_92] : memref<3x4x18x16xf32, #tpu.memory_space<vmem>>, vector<1x1x8x16xf32>
    %310 = vector.shape_cast %309 : vector<1x1x8x16xf32> to vector<8x16xf32>
    %c1_i32_93 = arith.constant 1 : i32
    %311 = arith.addi %147, %c1_i32_93 : i32
    %c1_94 = arith.constant 1 : index
    %c1_95 = arith.constant 1 : index
    %312 = arith.index_cast %311 : i32 to index
    %c0_96 = arith.constant 0 : index
    %313 = vector.load %arg6[%c1_94, %c1_95, %312, %c0_96] : memref<3x4x18x16xf32, #tpu.memory_space<vmem>>, vector<1x1x8x16xf32>
    %314 = vector.shape_cast %313 : vector<1x1x8x16xf32> to vector<8x16xf32>
    %c1_i32_97 = arith.constant 1 : i32
    %315 = arith.addi %147, %c1_i32_97 : i32
    %c2_98 = arith.constant 2 : index
    %c1_99 = arith.constant 1 : index
    %316 = arith.index_cast %315 : i32 to index
    %c0_100 = arith.constant 0 : index
    %317 = vector.load %arg6[%c2_98, %c1_99, %316, %c0_100] : memref<3x4x18x16xf32, #tpu.memory_space<vmem>>, vector<1x1x8x16xf32>
    %318 = vector.shape_cast %317 : vector<1x1x8x16xf32> to vector<8x16xf32>
    %319 = vector.broadcast %50 : f32 to vector<8x16xf32>
    %320 = arith.mulf %310, %319 : vector<8x16xf32>
    %321 = vector.broadcast %51 : f32 to vector<8x16xf32>
    %322 = arith.mulf %314, %321 : vector<8x16xf32>
    %323 = arith.addf %320, %322 : vector<8x16xf32>
    %324 = vector.broadcast %52 : f32 to vector<8x16xf32>
    %325 = arith.mulf %318, %324 : vector<8x16xf32>
    %326 = arith.addf %323, %325 : vector<8x16xf32>
    %327 = arith.addf %288, %326 : vector<8x16xf32>
    %328 = vector.broadcast %86 : f32 to vector<8x16xf32>
    %329 = arith.mulf %310, %328 : vector<8x16xf32>
    %330 = vector.broadcast %87 : f32 to vector<8x16xf32>
    %331 = arith.mulf %314, %330 : vector<8x16xf32>
    %332 = arith.addf %329, %331 : vector<8x16xf32>
    %333 = vector.broadcast %88 : f32 to vector<8x16xf32>
    %334 = arith.mulf %318, %333 : vector<8x16xf32>
    %335 = arith.addf %332, %334 : vector<8x16xf32>
    %336 = arith.addf %297, %335 : vector<8x16xf32>
    %337 = vector.broadcast %122 : f32 to vector<8x16xf32>
    %338 = arith.mulf %310, %337 : vector<8x16xf32>
    %339 = vector.broadcast %123 : f32 to vector<8x16xf32>
    %340 = arith.mulf %314, %339 : vector<8x16xf32>
    %341 = arith.addf %338, %340 : vector<8x16xf32>
    %342 = vector.broadcast %124 : f32 to vector<8x16xf32>
    %343 = arith.mulf %318, %342 : vector<8x16xf32>
    %344 = arith.addf %341, %343 : vector<8x16xf32>
    %345 = arith.addf %306, %344 : vector<8x16xf32>
    %c2_i32_101 = arith.constant 2 : i32
    %346 = arith.addi %147, %c2_i32_101 : i32
    %c0_102 = arith.constant 0 : index
    %c1_103 = arith.constant 1 : index
    %347 = arith.index_cast %346 : i32 to index
    %c0_104 = arith.constant 0 : index
    %348 = vector.load %arg6[%c0_102, %c1_103, %347, %c0_104] : memref<3x4x18x16xf32, #tpu.memory_space<vmem>>, vector<1x1x8x16xf32>
    %349 = vector.shape_cast %348 : vector<1x1x8x16xf32> to vector<8x16xf32>
    %c2_i32_105 = arith.constant 2 : i32
    %350 = arith.addi %147, %c2_i32_105 : i32
    %c1_106 = arith.constant 1 : index
    %c1_107 = arith.constant 1 : index
    %351 = arith.index_cast %350 : i32 to index
    %c0_108 = arith.constant 0 : index
    %352 = vector.load %arg6[%c1_106, %c1_107, %351, %c0_108] : memref<3x4x18x16xf32, #tpu.memory_space<vmem>>, vector<1x1x8x16xf32>
    %353 = vector.shape_cast %352 : vector<1x1x8x16xf32> to vector<8x16xf32>
    %c2_i32_109 = arith.constant 2 : i32
    %354 = arith.addi %147, %c2_i32_109 : i32
    %c2_110 = arith.constant 2 : index
    %c1_111 = arith.constant 1 : index
    %355 = arith.index_cast %354 : i32 to index
    %c0_112 = arith.constant 0 : index
    %356 = vector.load %arg6[%c2_110, %c1_111, %355, %c0_112] : memref<3x4x18x16xf32, #tpu.memory_space<vmem>>, vector<1x1x8x16xf32>
    %357 = vector.shape_cast %356 : vector<1x1x8x16xf32> to vector<8x16xf32>
    %358 = vector.broadcast %53 : f32 to vector<8x16xf32>
    %359 = arith.mulf %349, %358 : vector<8x16xf32>
    %360 = vector.broadcast %54 : f32 to vector<8x16xf32>
    %361 = arith.mulf %353, %360 : vector<8x16xf32>
    %362 = arith.addf %359, %361 : vector<8x16xf32>
    %363 = vector.broadcast %55 : f32 to vector<8x16xf32>
    %364 = arith.mulf %357, %363 : vector<8x16xf32>
    %365 = arith.addf %362, %364 : vector<8x16xf32>
    %366 = arith.addf %327, %365 : vector<8x16xf32>
    %367 = vector.broadcast %89 : f32 to vector<8x16xf32>
    %368 = arith.mulf %349, %367 : vector<8x16xf32>
    %369 = vector.broadcast %90 : f32 to vector<8x16xf32>
    %370 = arith.mulf %353, %369 : vector<8x16xf32>
    %371 = arith.addf %368, %370 : vector<8x16xf32>
    %372 = vector.broadcast %91 : f32 to vector<8x16xf32>
    %373 = arith.mulf %357, %372 : vector<8x16xf32>
    %374 = arith.addf %371, %373 : vector<8x16xf32>
    %375 = arith.addf %336, %374 : vector<8x16xf32>
    %376 = vector.broadcast %125 : f32 to vector<8x16xf32>
    %377 = arith.mulf %349, %376 : vector<8x16xf32>
    %378 = vector.broadcast %126 : f32 to vector<8x16xf32>
    %379 = arith.mulf %353, %378 : vector<8x16xf32>
    %380 = arith.addf %377, %379 : vector<8x16xf32>
    %381 = vector.broadcast %127 : f32 to vector<8x16xf32>
    %382 = arith.mulf %357, %381 : vector<8x16xf32>
    %383 = arith.addf %380, %382 : vector<8x16xf32>
    %384 = arith.addf %345, %383 : vector<8x16xf32>
    %c0_i32_113 = arith.constant 0 : i32
    %385 = arith.addi %147, %c0_i32_113 : i32
    %c0_114 = arith.constant 0 : index
    %c2_115 = arith.constant 2 : index
    %386 = arith.index_cast %385 : i32 to index
    %c0_116 = arith.constant 0 : index
    %387 = vector.load %arg6[%c0_114, %c2_115, %386, %c0_116] : memref<3x4x18x16xf32, #tpu.memory_space<vmem>>, vector<1x1x8x16xf32>
    %388 = vector.shape_cast %387 : vector<1x1x8x16xf32> to vector<8x16xf32>
    %c0_i32_117 = arith.constant 0 : i32
    %389 = arith.addi %147, %c0_i32_117 : i32
    %c1_118 = arith.constant 1 : index
    %c2_119 = arith.constant 2 : index
    %390 = arith.index_cast %389 : i32 to index
    %c0_120 = arith.constant 0 : index
    %391 = vector.load %arg6[%c1_118, %c2_119, %390, %c0_120] : memref<3x4x18x16xf32, #tpu.memory_space<vmem>>, vector<1x1x8x16xf32>
    %392 = vector.shape_cast %391 : vector<1x1x8x16xf32> to vector<8x16xf32>
    %c0_i32_121 = arith.constant 0 : i32
    %393 = arith.addi %147, %c0_i32_121 : i32
    %c2_122 = arith.constant 2 : index
    %c2_123 = arith.constant 2 : index
    %394 = arith.index_cast %393 : i32 to index
    %c0_124 = arith.constant 0 : index
    %395 = vector.load %arg6[%c2_122, %c2_123, %394, %c0_124] : memref<3x4x18x16xf32, #tpu.memory_space<vmem>>, vector<1x1x8x16xf32>
    %396 = vector.shape_cast %395 : vector<1x1x8x16xf32> to vector<8x16xf32>
    %397 = vector.broadcast %56 : f32 to vector<8x16xf32>
    %398 = arith.mulf %388, %397 : vector<8x16xf32>
    %399 = vector.broadcast %57 : f32 to vector<8x16xf32>
    %400 = arith.mulf %392, %399 : vector<8x16xf32>
    %401 = arith.addf %398, %400 : vector<8x16xf32>
    %402 = vector.broadcast %58 : f32 to vector<8x16xf32>
    %403 = arith.mulf %396, %402 : vector<8x16xf32>
    %404 = arith.addf %401, %403 : vector<8x16xf32>
    %405 = arith.addf %366, %404 : vector<8x16xf32>
    %406 = vector.broadcast %92 : f32 to vector<8x16xf32>
    %407 = arith.mulf %388, %406 : vector<8x16xf32>
    %408 = vector.broadcast %93 : f32 to vector<8x16xf32>
    %409 = arith.mulf %392, %408 : vector<8x16xf32>
    %410 = arith.addf %407, %409 : vector<8x16xf32>
    %411 = vector.broadcast %94 : f32 to vector<8x16xf32>
    %412 = arith.mulf %396, %411 : vector<8x16xf32>
    %413 = arith.addf %410, %412 : vector<8x16xf32>
    %414 = arith.addf %375, %413 : vector<8x16xf32>
    %415 = vector.broadcast %128 : f32 to vector<8x16xf32>
    %416 = arith.mulf %388, %415 : vector<8x16xf32>
    %417 = vector.broadcast %129 : f32 to vector<8x16xf32>
    %418 = arith.mulf %392, %417 : vector<8x16xf32>
    %419 = arith.addf %416, %418 : vector<8x16xf32>
    %420 = vector.broadcast %130 : f32 to vector<8x16xf32>
    %421 = arith.mulf %396, %420 : vector<8x16xf32>
    %422 = arith.addf %419, %421 : vector<8x16xf32>
    %423 = arith.addf %384, %422 : vector<8x16xf32>
    %c1_i32_125 = arith.constant 1 : i32
    %424 = arith.addi %147, %c1_i32_125 : i32
    %c0_126 = arith.constant 0 : index
    %c2_127 = arith.constant 2 : index
    %425 = arith.index_cast %424 : i32 to index
    %c0_128 = arith.constant 0 : index
    %426 = vector.load %arg6[%c0_126, %c2_127, %425, %c0_128] : memref<3x4x18x16xf32, #tpu.memory_space<vmem>>, vector<1x1x8x16xf32>
    %427 = vector.shape_cast %426 : vector<1x1x8x16xf32> to vector<8x16xf32>
    %c1_i32_129 = arith.constant 1 : i32
    %428 = arith.addi %147, %c1_i32_129 : i32
    %c1_130 = arith.constant 1 : index
    %c2_131 = arith.constant 2 : index
    %429 = arith.index_cast %428 : i32 to index
    %c0_132 = arith.constant 0 : index
    %430 = vector.load %arg6[%c1_130, %c2_131, %429, %c0_132] : memref<3x4x18x16xf32, #tpu.memory_space<vmem>>, vector<1x1x8x16xf32>
    %431 = vector.shape_cast %430 : vector<1x1x8x16xf32> to vector<8x16xf32>
    %c1_i32_133 = arith.constant 1 : i32
    %432 = arith.addi %147, %c1_i32_133 : i32
    %c2_134 = arith.constant 2 : index
    %c2_135 = arith.constant 2 : index
    %433 = arith.index_cast %432 : i32 to index
    %c0_136 = arith.constant 0 : index
    %434 = vector.load %arg6[%c2_134, %c2_135, %433, %c0_136] : memref<3x4x18x16xf32, #tpu.memory_space<vmem>>, vector<1x1x8x16xf32>
    %435 = vector.shape_cast %434 : vector<1x1x8x16xf32> to vector<8x16xf32>
    %436 = vector.broadcast %59 : f32 to vector<8x16xf32>
    %437 = arith.mulf %427, %436 : vector<8x16xf32>
    %438 = vector.broadcast %60 : f32 to vector<8x16xf32>
    %439 = arith.mulf %431, %438 : vector<8x16xf32>
    %440 = arith.addf %437, %439 : vector<8x16xf32>
    %441 = vector.broadcast %61 : f32 to vector<8x16xf32>
    %442 = arith.mulf %435, %441 : vector<8x16xf32>
    %443 = arith.addf %440, %442 : vector<8x16xf32>
    %444 = arith.addf %405, %443 : vector<8x16xf32>
    %445 = vector.broadcast %95 : f32 to vector<8x16xf32>
    %446 = arith.mulf %427, %445 : vector<8x16xf32>
    %447 = vector.broadcast %96 : f32 to vector<8x16xf32>
    %448 = arith.mulf %431, %447 : vector<8x16xf32>
    %449 = arith.addf %446, %448 : vector<8x16xf32>
    %450 = vector.broadcast %97 : f32 to vector<8x16xf32>
    %451 = arith.mulf %435, %450 : vector<8x16xf32>
    %452 = arith.addf %449, %451 : vector<8x16xf32>
    %453 = arith.addf %414, %452 : vector<8x16xf32>
    %454 = vector.broadcast %131 : f32 to vector<8x16xf32>
    %455 = arith.mulf %427, %454 : vector<8x16xf32>
    %456 = vector.broadcast %132 : f32 to vector<8x16xf32>
    %457 = arith.mulf %431, %456 : vector<8x16xf32>
    %458 = arith.addf %455, %457 : vector<8x16xf32>
    %459 = vector.broadcast %133 : f32 to vector<8x16xf32>
    %460 = arith.mulf %435, %459 : vector<8x16xf32>
    %461 = arith.addf %458, %460 : vector<8x16xf32>
    %462 = arith.addf %423, %461 : vector<8x16xf32>
    %c2_i32_137 = arith.constant 2 : i32
    %463 = arith.addi %147, %c2_i32_137 : i32
    %c0_138 = arith.constant 0 : index
    %c2_139 = arith.constant 2 : index
    %464 = arith.index_cast %463 : i32 to index
    %c0_140 = arith.constant 0 : index
    %465 = vector.load %arg6[%c0_138, %c2_139, %464, %c0_140] : memref<3x4x18x16xf32, #tpu.memory_space<vmem>>, vector<1x1x8x16xf32>
    %466 = vector.shape_cast %465 : vector<1x1x8x16xf32> to vector<8x16xf32>
    %c2_i32_141 = arith.constant 2 : i32
    %467 = arith.addi %147, %c2_i32_141 : i32
    %c1_142 = arith.constant 1 : index
    %c2_143 = arith.constant 2 : index
    %468 = arith.index_cast %467 : i32 to index
    %c0_144 = arith.constant 0 : index
    %469 = vector.load %arg6[%c1_142, %c2_143, %468, %c0_144] : memref<3x4x18x16xf32, #tpu.memory_space<vmem>>, vector<1x1x8x16xf32>
    %470 = vector.shape_cast %469 : vector<1x1x8x16xf32> to vector<8x16xf32>
    %c2_i32_145 = arith.constant 2 : i32
    %471 = arith.addi %147, %c2_i32_145 : i32
    %c2_146 = arith.constant 2 : index
    %c2_147 = arith.constant 2 : index
    %472 = arith.index_cast %471 : i32 to index
    %c0_148 = arith.constant 0 : index
    %473 = vector.load %arg6[%c2_146, %c2_147, %472, %c0_148] : memref<3x4x18x16xf32, #tpu.memory_space<vmem>>, vector<1x1x8x16xf32>
    %474 = vector.shape_cast %473 : vector<1x1x8x16xf32> to vector<8x16xf32>
    %475 = vector.broadcast %62 : f32 to vector<8x16xf32>
    %476 = arith.mulf %466, %475 : vector<8x16xf32>
    %477 = vector.broadcast %63 : f32 to vector<8x16xf32>
    %478 = arith.mulf %470, %477 : vector<8x16xf32>
    %479 = arith.addf %476, %478 : vector<8x16xf32>
    %480 = vector.broadcast %64 : f32 to vector<8x16xf32>
    %481 = arith.mulf %474, %480 : vector<8x16xf32>
    %482 = arith.addf %479, %481 : vector<8x16xf32>
    %483 = arith.addf %444, %482 : vector<8x16xf32>
    %484 = vector.broadcast %98 : f32 to vector<8x16xf32>
    %485 = arith.mulf %466, %484 : vector<8x16xf32>
    %486 = vector.broadcast %99 : f32 to vector<8x16xf32>
    %487 = arith.mulf %470, %486 : vector<8x16xf32>
    %488 = arith.addf %485, %487 : vector<8x16xf32>
    %489 = vector.broadcast %100 : f32 to vector<8x16xf32>
    %490 = arith.mulf %474, %489 : vector<8x16xf32>
    %491 = arith.addf %488, %490 : vector<8x16xf32>
    %492 = arith.addf %453, %491 : vector<8x16xf32>
    %493 = vector.broadcast %134 : f32 to vector<8x16xf32>
    %494 = arith.mulf %466, %493 : vector<8x16xf32>
    %495 = vector.broadcast %135 : f32 to vector<8x16xf32>
    %496 = arith.mulf %470, %495 : vector<8x16xf32>
    %497 = arith.addf %494, %496 : vector<8x16xf32>
    %498 = vector.broadcast %136 : f32 to vector<8x16xf32>
    %499 = arith.mulf %474, %498 : vector<8x16xf32>
    %500 = arith.addf %497, %499 : vector<8x16xf32>
    %501 = arith.addf %462, %500 : vector<8x16xf32>
    %c0_i32_149 = arith.constant 0 : i32
    %502 = arith.addi %147, %c0_i32_149 : i32
    %c0_150 = arith.constant 0 : index
    %c3_151 = arith.constant 3 : index
    %503 = arith.index_cast %502 : i32 to index
    %c0_152 = arith.constant 0 : index
    %504 = vector.load %arg6[%c0_150, %c3_151, %503, %c0_152] : memref<3x4x18x16xf32, #tpu.memory_space<vmem>>, vector<1x1x8x16xf32>
    %505 = vector.shape_cast %504 : vector<1x1x8x16xf32> to vector<8x16xf32>
    %c0_i32_153 = arith.constant 0 : i32
    %506 = arith.addi %147, %c0_i32_153 : i32
    %c1_154 = arith.constant 1 : index
    %c3_155 = arith.constant 3 : index
    %507 = arith.index_cast %506 : i32 to index
    %c0_156 = arith.constant 0 : index
    %508 = vector.load %arg6[%c1_154, %c3_155, %507, %c0_156] : memref<3x4x18x16xf32, #tpu.memory_space<vmem>>, vector<1x1x8x16xf32>
    %509 = vector.shape_cast %508 : vector<1x1x8x16xf32> to vector<8x16xf32>
    %c0_i32_157 = arith.constant 0 : i32
    %510 = arith.addi %147, %c0_i32_157 : i32
    %c2_158 = arith.constant 2 : index
    %c3_159 = arith.constant 3 : index
    %511 = arith.index_cast %510 : i32 to index
    %c0_160 = arith.constant 0 : index
    %512 = vector.load %arg6[%c2_158, %c3_159, %511, %c0_160] : memref<3x4x18x16xf32, #tpu.memory_space<vmem>>, vector<1x1x8x16xf32>
    %513 = vector.shape_cast %512 : vector<1x1x8x16xf32> to vector<8x16xf32>
    %514 = vector.broadcast %65 : f32 to vector<8x16xf32>
    %515 = arith.mulf %505, %514 : vector<8x16xf32>
    %516 = vector.broadcast %66 : f32 to vector<8x16xf32>
    %517 = arith.mulf %509, %516 : vector<8x16xf32>
    %518 = arith.addf %515, %517 : vector<8x16xf32>
    %519 = vector.broadcast %67 : f32 to vector<8x16xf32>
    %520 = arith.mulf %513, %519 : vector<8x16xf32>
    %521 = arith.addf %518, %520 : vector<8x16xf32>
    %522 = arith.addf %483, %521 : vector<8x16xf32>
    %523 = vector.broadcast %101 : f32 to vector<8x16xf32>
    %524 = arith.mulf %505, %523 : vector<8x16xf32>
    %525 = vector.broadcast %102 : f32 to vector<8x16xf32>
    %526 = arith.mulf %509, %525 : vector<8x16xf32>
    %527 = arith.addf %524, %526 : vector<8x16xf32>
    %528 = vector.broadcast %103 : f32 to vector<8x16xf32>
    %529 = arith.mulf %513, %528 : vector<8x16xf32>
    %530 = arith.addf %527, %529 : vector<8x16xf32>
    %531 = arith.addf %492, %530 : vector<8x16xf32>
    %532 = vector.broadcast %137 : f32 to vector<8x16xf32>
    %533 = arith.mulf %505, %532 : vector<8x16xf32>
    %534 = vector.broadcast %138 : f32 to vector<8x16xf32>
    %535 = arith.mulf %509, %534 : vector<8x16xf32>
    %536 = arith.addf %533, %535 : vector<8x16xf32>
    %537 = vector.broadcast %139 : f32 to vector<8x16xf32>
    %538 = arith.mulf %513, %537 : vector<8x16xf32>
    %539 = arith.addf %536, %538 : vector<8x16xf32>
    %540 = arith.addf %501, %539 : vector<8x16xf32>
    %c1_i32_161 = arith.constant 1 : i32
    %541 = arith.addi %147, %c1_i32_161 : i32
    %c0_162 = arith.constant 0 : index
    %c3_163 = arith.constant 3 : index
    %542 = arith.index_cast %541 : i32 to index
    %c0_164 = arith.constant 0 : index
    %543 = vector.load %arg6[%c0_162, %c3_163, %542, %c0_164] : memref<3x4x18x16xf32, #tpu.memory_space<vmem>>, vector<1x1x8x16xf32>
    %544 = vector.shape_cast %543 : vector<1x1x8x16xf32> to vector<8x16xf32>
    %c1_i32_165 = arith.constant 1 : i32
    %545 = arith.addi %147, %c1_i32_165 : i32
    %c1_166 = arith.constant 1 : index
    %c3_167 = arith.constant 3 : index
    %546 = arith.index_cast %545 : i32 to index
    %c0_168 = arith.constant 0 : index
    %547 = vector.load %arg6[%c1_166, %c3_167, %546, %c0_168] : memref<3x4x18x16xf32, #tpu.memory_space<vmem>>, vector<1x1x8x16xf32>
    %548 = vector.shape_cast %547 : vector<1x1x8x16xf32> to vector<8x16xf32>
    %c1_i32_169 = arith.constant 1 : i32
    %549 = arith.addi %147, %c1_i32_169 : i32
    %c2_170 = arith.constant 2 : index
    %c3_171 = arith.constant 3 : index
    %550 = arith.index_cast %549 : i32 to index
    %c0_172 = arith.constant 0 : index
    %551 = vector.load %arg6[%c2_170, %c3_171, %550, %c0_172] : memref<3x4x18x16xf32, #tpu.memory_space<vmem>>, vector<1x1x8x16xf32>
    %552 = vector.shape_cast %551 : vector<1x1x8x16xf32> to vector<8x16xf32>
    %553 = vector.broadcast %68 : f32 to vector<8x16xf32>
    %554 = arith.mulf %544, %553 : vector<8x16xf32>
    %555 = vector.broadcast %69 : f32 to vector<8x16xf32>
    %556 = arith.mulf %548, %555 : vector<8x16xf32>
    %557 = arith.addf %554, %556 : vector<8x16xf32>
    %558 = vector.broadcast %70 : f32 to vector<8x16xf32>
    %559 = arith.mulf %552, %558 : vector<8x16xf32>
    %560 = arith.addf %557, %559 : vector<8x16xf32>
    %561 = arith.addf %522, %560 : vector<8x16xf32>
    %562 = vector.broadcast %104 : f32 to vector<8x16xf32>
    %563 = arith.mulf %544, %562 : vector<8x16xf32>
    %564 = vector.broadcast %105 : f32 to vector<8x16xf32>
    %565 = arith.mulf %548, %564 : vector<8x16xf32>
    %566 = arith.addf %563, %565 : vector<8x16xf32>
    %567 = vector.broadcast %106 : f32 to vector<8x16xf32>
    %568 = arith.mulf %552, %567 : vector<8x16xf32>
    %569 = arith.addf %566, %568 : vector<8x16xf32>
    %570 = arith.addf %531, %569 : vector<8x16xf32>
    %571 = vector.broadcast %140 : f32 to vector<8x16xf32>
    %572 = arith.mulf %544, %571 : vector<8x16xf32>
    %573 = vector.broadcast %141 : f32 to vector<8x16xf32>
    %574 = arith.mulf %548, %573 : vector<8x16xf32>
    %575 = arith.addf %572, %574 : vector<8x16xf32>
    %576 = vector.broadcast %142 : f32 to vector<8x16xf32>
    %577 = arith.mulf %552, %576 : vector<8x16xf32>
    %578 = arith.addf %575, %577 : vector<8x16xf32>
    %579 = arith.addf %540, %578 : vector<8x16xf32>
    %c2_i32_173 = arith.constant 2 : i32
    %580 = arith.addi %147, %c2_i32_173 : i32
    %c0_174 = arith.constant 0 : index
    %c3_175 = arith.constant 3 : index
    %581 = arith.index_cast %580 : i32 to index
    %c0_176 = arith.constant 0 : index
    %582 = vector.load %arg6[%c0_174, %c3_175, %581, %c0_176] : memref<3x4x18x16xf32, #tpu.memory_space<vmem>>, vector<1x1x8x16xf32>
    %583 = vector.shape_cast %582 : vector<1x1x8x16xf32> to vector<8x16xf32>
    %c2_i32_177 = arith.constant 2 : i32
    %584 = arith.addi %147, %c2_i32_177 : i32
    %c1_178 = arith.constant 1 : index
    %c3_179 = arith.constant 3 : index
    %585 = arith.index_cast %584 : i32 to index
    %c0_180 = arith.constant 0 : index
    %586 = vector.load %arg6[%c1_178, %c3_179, %585, %c0_180] : memref<3x4x18x16xf32, #tpu.memory_space<vmem>>, vector<1x1x8x16xf32>
    %587 = vector.shape_cast %586 : vector<1x1x8x16xf32> to vector<8x16xf32>
    %c2_i32_181 = arith.constant 2 : i32
    %588 = arith.addi %147, %c2_i32_181 : i32
    %c2_182 = arith.constant 2 : index
    %c3_183 = arith.constant 3 : index
    %589 = arith.index_cast %588 : i32 to index
    %c0_184 = arith.constant 0 : index
    %590 = vector.load %arg6[%c2_182, %c3_183, %589, %c0_184] : memref<3x4x18x16xf32, #tpu.memory_space<vmem>>, vector<1x1x8x16xf32>
    %591 = vector.shape_cast %590 : vector<1x1x8x16xf32> to vector<8x16xf32>
    %592 = vector.broadcast %71 : f32 to vector<8x16xf32>
    %593 = arith.mulf %583, %592 : vector<8x16xf32>
    %594 = vector.broadcast %72 : f32 to vector<8x16xf32>
    %595 = arith.mulf %587, %594 : vector<8x16xf32>
    %596 = arith.addf %593, %595 : vector<8x16xf32>
    %597 = vector.broadcast %73 : f32 to vector<8x16xf32>
    %598 = arith.mulf %591, %597 : vector<8x16xf32>
    %599 = arith.addf %596, %598 : vector<8x16xf32>
    %600 = arith.addf %561, %599 : vector<8x16xf32>
    %601 = vector.broadcast %107 : f32 to vector<8x16xf32>
    %602 = arith.mulf %583, %601 : vector<8x16xf32>
    %603 = vector.broadcast %108 : f32 to vector<8x16xf32>
    %604 = arith.mulf %587, %603 : vector<8x16xf32>
    %605 = arith.addf %602, %604 : vector<8x16xf32>
    %606 = vector.broadcast %109 : f32 to vector<8x16xf32>
    %607 = arith.mulf %591, %606 : vector<8x16xf32>
    %608 = arith.addf %605, %607 : vector<8x16xf32>
    %609 = arith.addf %570, %608 : vector<8x16xf32>
    %610 = vector.broadcast %143 : f32 to vector<8x16xf32>
    %611 = arith.mulf %583, %610 : vector<8x16xf32>
    %612 = vector.broadcast %144 : f32 to vector<8x16xf32>
    %613 = arith.mulf %587, %612 : vector<8x16xf32>
    %614 = arith.addf %611, %613 : vector<8x16xf32>
    %615 = vector.broadcast %145 : f32 to vector<8x16xf32>
    %616 = arith.mulf %591, %615 : vector<8x16xf32>
    %617 = arith.addf %614, %616 : vector<8x16xf32>
    %618 = arith.addf %579, %617 : vector<8x16xf32>
    %619 = math.tanh %600 : vector<8x16xf32>
    %c0_185 = arith.constant 0 : index
    %c0_186 = arith.constant 0 : index
    %620 = arith.index_cast %147 : i32 to index
    %c0_187 = arith.constant 0 : index
    %621 = vector.load %arg5[%c0_185, %c0_186, %620, %c0_187] : memref<1x3x16x16xf32, #tpu.memory_space<vmem>>, vector<1x1x8x16xf32>
    %622 = vector.shape_cast %621 : vector<1x1x8x16xf32> to vector<8x16xf32>
    %623 = vector.shape_cast %619 : vector<8x16xf32> to vector<1x1x8x16xf32>
    tpu.vector_store %arg5[%c0_185, %c0_186, %620, %c0_187], %623 {strides = array<i32>} : memref<1x3x16x16xf32, #tpu.memory_space<vmem>>, vector<1x1x8x16xf32>,
    %624 = math.tanh %609 : vector<8x16xf32>
    %c0_188 = arith.constant 0 : index
    %c1_189 = arith.constant 1 : index
    %625 = arith.index_cast %147 : i32 to index
    %c0_190 = arith.constant 0 : index
    %626 = vector.load %arg5[%c0_188, %c1_189, %625, %c0_190] : memref<1x3x16x16xf32, #tpu.memory_space<vmem>>, vector<1x1x8x16xf32>
    %627 = vector.shape_cast %626 : vector<1x1x8x16xf32> to vector<8x16xf32>
    %628 = vector.shape_cast %624 : vector<8x16xf32> to vector<1x1x8x16xf32>
    tpu.vector_store %arg5[%c0_188, %c1_189, %625, %c0_190], %628 {strides = array<i32>} : memref<1x3x16x16xf32, #tpu.memory_space<vmem>>, vector<1x1x8x16xf32>,
    %629 = math.tanh %618 : vector<8x16xf32>
    %c0_191 = arith.constant 0 : index
    %c2_192 = arith.constant 2 : index
    %630 = arith.index_cast %147 : i32 to index
    %c0_193 = arith.constant 0 : index
    %631 = vector.load %arg5[%c0_191, %c2_192, %630, %c0_193] : memref<1x3x16x16xf32, #tpu.memory_space<vmem>>, vector<1x1x8x16xf32>
    %632 = vector.shape_cast %631 : vector<1x1x8x16xf32> to vector<8x16xf32>
    %633 = vector.shape_cast %629 : vector<8x16xf32> to vector<1x1x8x16xf32>
    tpu.vector_store %arg5[%c0_191, %c2_192, %630, %c0_193], %633 {strides = array<i32>} : memref<1x3x16x16xf32, #tpu.memory_space<vmem>>, vector<1x1x8x16xf32>,
    %c1_i32_194 = arith.constant 1 : i32
    %c8_i32_195 = arith.constant 8 : i32
    %634 = arith.muli %c1_i32_194, %c8_i32_195 : i32
    %635 = tpu.assume_multiple %634, 8 : i32
    %cst_196 = arith.constant 0.000000e+00 : f32
    %636 = vector.broadcast %cst_196 : f32 to vector<8x16xf32>
    %cst_197 = arith.constant 0.000000e+00 : f32
    %637 = vector.broadcast %cst_197 : f32 to vector<8x16xf32>
    %cst_198 = arith.constant 0.000000e+00 : f32
    %638 = vector.broadcast %cst_198 : f32 to vector<8x16xf32>
    %c0_i32_199 = arith.constant 0 : i32
    %639 = arith.addi %635, %c0_i32_199 : i32
    %c0_200 = arith.constant 0 : index
    %c0_201 = arith.constant 0 : index
    %640 = arith.index_cast %639 : i32 to index
    %c0_202 = arith.constant 0 : index
    %641 = vector.load %arg6[%c0_200, %c0_201, %640, %c0_202] : memref<3x4x18x16xf32, #tpu.memory_space<vmem>>, vector<1x1x8x16xf32>
    %642 = vector.shape_cast %641 : vector<1x1x8x16xf32> to vector<8x16xf32>
    %c0_i32_203 = arith.constant 0 : i32
    %643 = arith.addi %635, %c0_i32_203 : i32
    %c1_204 = arith.constant 1 : index
    %c0_205 = arith.constant 0 : index
    %644 = arith.index_cast %643 : i32 to index
    %c0_206 = arith.constant 0 : index
    %645 = vector.load %arg6[%c1_204, %c0_205, %644, %c0_206] : memref<3x4x18x16xf32, #tpu.memory_space<vmem>>, vector<1x1x8x16xf32>
    %646 = vector.shape_cast %645 : vector<1x1x8x16xf32> to vector<8x16xf32>
    %c0_i32_207 = arith.constant 0 : i32
    %647 = arith.addi %635, %c0_i32_207 : i32
    %c2_208 = arith.constant 2 : index
    %c0_209 = arith.constant 0 : index
    %648 = arith.index_cast %647 : i32 to index
    %c0_210 = arith.constant 0 : index
    %649 = vector.load %arg6[%c2_208, %c0_209, %648, %c0_210] : memref<3x4x18x16xf32, #tpu.memory_space<vmem>>, vector<1x1x8x16xf32>
    %650 = vector.shape_cast %649 : vector<1x1x8x16xf32> to vector<8x16xf32>
    %651 = vector.broadcast %38 : f32 to vector<8x16xf32>
    %652 = arith.mulf %642, %651 : vector<8x16xf32>
    %653 = vector.broadcast %39 : f32 to vector<8x16xf32>
    %654 = arith.mulf %646, %653 : vector<8x16xf32>
    %655 = arith.addf %652, %654 : vector<8x16xf32>
    %656 = vector.broadcast %40 : f32 to vector<8x16xf32>
    %657 = arith.mulf %650, %656 : vector<8x16xf32>
    %658 = arith.addf %655, %657 : vector<8x16xf32>
    %659 = arith.addf %636, %658 : vector<8x16xf32>
    %660 = vector.broadcast %74 : f32 to vector<8x16xf32>
    %661 = arith.mulf %642, %660 : vector<8x16xf32>
    %662 = vector.broadcast %75 : f32 to vector<8x16xf32>
    %663 = arith.mulf %646, %662 : vector<8x16xf32>
    %664 = arith.addf %661, %663 : vector<8x16xf32>
    %665 = vector.broadcast %76 : f32 to vector<8x16xf32>
    %666 = arith.mulf %650, %665 : vector<8x16xf32>
    %667 = arith.addf %664, %666 : vector<8x16xf32>
    %668 = arith.addf %637, %667 : vector<8x16xf32>
    %669 = vector.broadcast %110 : f32 to vector<8x16xf32>
    %670 = arith.mulf %642, %669 : vector<8x16xf32>
    %671 = vector.broadcast %111 : f32 to vector<8x16xf32>
    %672 = arith.mulf %646, %671 : vector<8x16xf32>
    %673 = arith.addf %670, %672 : vector<8x16xf32>
    %674 = vector.broadcast %112 : f32 to vector<8x16xf32>
    %675 = arith.mulf %650, %674 : vector<8x16xf32>
    %676 = arith.addf %673, %675 : vector<8x16xf32>
    %677 = arith.addf %638, %676 : vector<8x16xf32>
    %c1_i32_211 = arith.constant 1 : i32
    %678 = arith.addi %635, %c1_i32_211 : i32
    %c0_212 = arith.constant 0 : index
    %c0_213 = arith.constant 0 : index
    %679 = arith.index_cast %678 : i32 to index
    %c0_214 = arith.constant 0 : index
    %680 = vector.load %arg6[%c0_212, %c0_213, %679, %c0_214] : memref<3x4x18x16xf32, #tpu.memory_space<vmem>>, vector<1x1x8x16xf32>
    %681 = vector.shape_cast %680 : vector<1x1x8x16xf32> to vector<8x16xf32>
    %c1_i32_215 = arith.constant 1 : i32
    %682 = arith.addi %635, %c1_i32_215 : i32
    %c1_216 = arith.constant 1 : index
    %c0_217 = arith.constant 0 : index
    %683 = arith.index_cast %682 : i32 to index
    %c0_218 = arith.constant 0 : index
    %684 = vector.load %arg6[%c1_216, %c0_217, %683, %c0_218] : memref<3x4x18x16xf32, #tpu.memory_space<vmem>>, vector<1x1x8x16xf32>
    %685 = vector.shape_cast %684 : vector<1x1x8x16xf32> to vector<8x16xf32>
    %c1_i32_219 = arith.constant 1 : i32
    %686 = arith.addi %635, %c1_i32_219 : i32
    %c2_220 = arith.constant 2 : index
    %c0_221 = arith.constant 0 : index
    %687 = arith.index_cast %686 : i32 to index
    %c0_222 = arith.constant 0 : index
    %688 = vector.load %arg6[%c2_220, %c0_221, %687, %c0_222] : memref<3x4x18x16xf32, #tpu.memory_space<vmem>>, vector<1x1x8x16xf32>
    %689 = vector.shape_cast %688 : vector<1x1x8x16xf32> to vector<8x16xf32>
    %690 = vector.broadcast %41 : f32 to vector<8x16xf32>
    %691 = arith.mulf %681, %690 : vector<8x16xf32>
    %692 = vector.broadcast %42 : f32 to vector<8x16xf32>
    %693 = arith.mulf %685, %692 : vector<8x16xf32>
    %694 = arith.addf %691, %693 : vector<8x16xf32>
    %695 = vector.broadcast %43 : f32 to vector<8x16xf32>
    %696 = arith.mulf %689, %695 : vector<8x16xf32>
    %697 = arith.addf %694, %696 : vector<8x16xf32>
    %698 = arith.addf %659, %697 : vector<8x16xf32>
    %699 = vector.broadcast %77 : f32 to vector<8x16xf32>
    %700 = arith.mulf %681, %699 : vector<8x16xf32>
    %701 = vector.broadcast %78 : f32 to vector<8x16xf32>
    %702 = arith.mulf %685, %701 : vector<8x16xf32>
    %703 = arith.addf %700, %702 : vector<8x16xf32>
    %704 = vector.broadcast %79 : f32 to vector<8x16xf32>
    %705 = arith.mulf %689, %704 : vector<8x16xf32>
    %706 = arith.addf %703, %705 : vector<8x16xf32>
    %707 = arith.addf %668, %706 : vector<8x16xf32>
    %708 = vector.broadcast %113 : f32 to vector<8x16xf32>
    %709 = arith.mulf %681, %708 : vector<8x16xf32>
    %710 = vector.broadcast %114 : f32 to vector<8x16xf32>
    %711 = arith.mulf %685, %710 : vector<8x16xf32>
    %712 = arith.addf %709, %711 : vector<8x16xf32>
    %713 = vector.broadcast %115 : f32 to vector<8x16xf32>
    %714 = arith.mulf %689, %713 : vector<8x16xf32>
    %715 = arith.addf %712, %714 : vector<8x16xf32>
    %716 = arith.addf %677, %715 : vector<8x16xf32>
    %c2_i32_223 = arith.constant 2 : i32
    %717 = arith.addi %635, %c2_i32_223 : i32
    %c0_224 = arith.constant 0 : index
    %c0_225 = arith.constant 0 : index
    %718 = arith.index_cast %717 : i32 to index
    %c0_226 = arith.constant 0 : index
    %719 = vector.load %arg6[%c0_224, %c0_225, %718, %c0_226] : memref<3x4x18x16xf32, #tpu.memory_space<vmem>>, vector<1x1x8x16xf32>
    %720 = vector.shape_cast %719 : vector<1x1x8x16xf32> to vector<8x16xf32>
    %c2_i32_227 = arith.constant 2 : i32
    %721 = arith.addi %635, %c2_i32_227 : i32
    %c1_228 = arith.constant 1 : index
    %c0_229 = arith.constant 0 : index
    %722 = arith.index_cast %721 : i32 to index
    %c0_230 = arith.constant 0 : index
    %723 = vector.load %arg6[%c1_228, %c0_229, %722, %c0_230] : memref<3x4x18x16xf32, #tpu.memory_space<vmem>>, vector<1x1x8x16xf32>
    %724 = vector.shape_cast %723 : vector<1x1x8x16xf32> to vector<8x16xf32>
    %c2_i32_231 = arith.constant 2 : i32
    %725 = arith.addi %635, %c2_i32_231 : i32
    %c2_232 = arith.constant 2 : index
    %c0_233 = arith.constant 0 : index
    %726 = arith.index_cast %725 : i32 to index
    %c0_234 = arith.constant 0 : index
    %727 = vector.load %arg6[%c2_232, %c0_233, %726, %c0_234] : memref<3x4x18x16xf32, #tpu.memory_space<vmem>>, vector<1x1x8x16xf32>
    %728 = vector.shape_cast %727 : vector<1x1x8x16xf32> to vector<8x16xf32>
    %729 = vector.broadcast %44 : f32 to vector<8x16xf32>
    %730 = arith.mulf %720, %729 : vector<8x16xf32>
    %731 = vector.broadcast %45 : f32 to vector<8x16xf32>
    %732 = arith.mulf %724, %731 : vector<8x16xf32>
    %733 = arith.addf %730, %732 : vector<8x16xf32>
    %734 = vector.broadcast %46 : f32 to vector<8x16xf32>
    %735 = arith.mulf %728, %734 : vector<8x16xf32>
    %736 = arith.addf %733, %735 : vector<8x16xf32>
    %737 = arith.addf %698, %736 : vector<8x16xf32>
    %738 = vector.broadcast %80 : f32 to vector<8x16xf32>
    %739 = arith.mulf %720, %738 : vector<8x16xf32>
    %740 = vector.broadcast %81 : f32 to vector<8x16xf32>
    %741 = arith.mulf %724, %740 : vector<8x16xf32>
    %742 = arith.addf %739, %741 : vector<8x16xf32>
    %743 = vector.broadcast %82 : f32 to vector<8x16xf32>
    %744 = arith.mulf %728, %743 : vector<8x16xf32>
    %745 = arith.addf %742, %744 : vector<8x16xf32>
    %746 = arith.addf %707, %745 : vector<8x16xf32>
    %747 = vector.broadcast %116 : f32 to vector<8x16xf32>
    %748 = arith.mulf %720, %747 : vector<8x16xf32>
    %749 = vector.broadcast %117 : f32 to vector<8x16xf32>
    %750 = arith.mulf %724, %749 : vector<8x16xf32>
    %751 = arith.addf %748, %750 : vector<8x16xf32>
    %752 = vector.broadcast %118 : f32 to vector<8x16xf32>
    %753 = arith.mulf %728, %752 : vector<8x16xf32>
    %754 = arith.addf %751, %753 : vector<8x16xf32>
    %755 = arith.addf %716, %754 : vector<8x16xf32>
    %c0_i32_235 = arith.constant 0 : i32
    %756 = arith.addi %635, %c0_i32_235 : i32
    %c0_236 = arith.constant 0 : index
    %c1_237 = arith.constant 1 : index
    %757 = arith.index_cast %756 : i32 to index
    %c0_238 = arith.constant 0 : index
    %758 = vector.load %arg6[%c0_236, %c1_237, %757, %c0_238] : memref<3x4x18x16xf32, #tpu.memory_space<vmem>>, vector<1x1x8x16xf32>
    %759 = vector.shape_cast %758 : vector<1x1x8x16xf32> to vector<8x16xf32>
    %c0_i32_239 = arith.constant 0 : i32
    %760 = arith.addi %635, %c0_i32_239 : i32
    %c1_240 = arith.constant 1 : index
    %c1_241 = arith.constant 1 : index
    %761 = arith.index_cast %760 : i32 to index
    %c0_242 = arith.constant 0 : index
    %762 = vector.load %arg6[%c1_240, %c1_241, %761, %c0_242] : memref<3x4x18x16xf32, #tpu.memory_space<vmem>>, vector<1x1x8x16xf32>
    %763 = vector.shape_cast %762 : vector<1x1x8x16xf32> to vector<8x16xf32>
    %c0_i32_243 = arith.constant 0 : i32
    %764 = arith.addi %635, %c0_i32_243 : i32
    %c2_244 = arith.constant 2 : index
    %c1_245 = arith.constant 1 : index
    %765 = arith.index_cast %764 : i32 to index
    %c0_246 = arith.constant 0 : index
    %766 = vector.load %arg6[%c2_244, %c1_245, %765, %c0_246] : memref<3x4x18x16xf32, #tpu.memory_space<vmem>>, vector<1x1x8x16xf32>
    %767 = vector.shape_cast %766 : vector<1x1x8x16xf32> to vector<8x16xf32>
    %768 = vector.broadcast %47 : f32 to vector<8x16xf32>
    %769 = arith.mulf %759, %768 : vector<8x16xf32>
    %770 = vector.broadcast %48 : f32 to vector<8x16xf32>
    %771 = arith.mulf %763, %770 : vector<8x16xf32>
    %772 = arith.addf %769, %771 : vector<8x16xf32>
    %773 = vector.broadcast %49 : f32 to vector<8x16xf32>
    %774 = arith.mulf %767, %773 : vector<8x16xf32>
    %775 = arith.addf %772, %774 : vector<8x16xf32>
    %776 = arith.addf %737, %775 : vector<8x16xf32>
    %777 = vector.broadcast %83 : f32 to vector<8x16xf32>
    %778 = arith.mulf %759, %777 : vector<8x16xf32>
    %779 = vector.broadcast %84 : f32 to vector<8x16xf32>
    %780 = arith.mulf %763, %779 : vector<8x16xf32>
    %781 = arith.addf %778, %780 : vector<8x16xf32>
    %782 = vector.broadcast %85 : f32 to vector<8x16xf32>
    %783 = arith.mulf %767, %782 : vector<8x16xf32>
    %784 = arith.addf %781, %783 : vector<8x16xf32>
    %785 = arith.addf %746, %784 : vector<8x16xf32>
    %786 = vector.broadcast %119 : f32 to vector<8x16xf32>
    %787 = arith.mulf %759, %786 : vector<8x16xf32>
    %788 = vector.broadcast %120 : f32 to vector<8x16xf32>
    %789 = arith.mulf %763, %788 : vector<8x16xf32>
    %790 = arith.addf %787, %789 : vector<8x16xf32>
    %791 = vector.broadcast %121 : f32 to vector<8x16xf32>
    %792 = arith.mulf %767, %791 : vector<8x16xf32>
    %793 = arith.addf %790, %792 : vector<8x16xf32>
    %794 = arith.addf %755, %793 : vector<8x16xf32>
    %c1_i32_247 = arith.constant 1 : i32
    %795 = arith.addi %635, %c1_i32_247 : i32
    %c0_248 = arith.constant 0 : index
    %c1_249 = arith.constant 1 : index
    %796 = arith.index_cast %795 : i32 to index
    %c0_250 = arith.constant 0 : index
    %797 = vector.load %arg6[%c0_248, %c1_249, %796, %c0_250] : memref<3x4x18x16xf32, #tpu.memory_space<vmem>>, vector<1x1x8x16xf32>
    %798 = vector.shape_cast %797 : vector<1x1x8x16xf32> to vector<8x16xf32>
    %c1_i32_251 = arith.constant 1 : i32
    %799 = arith.addi %635, %c1_i32_251 : i32
    %c1_252 = arith.constant 1 : index
    %c1_253 = arith.constant 1 : index
    %800 = arith.index_cast %799 : i32 to index
    %c0_254 = arith.constant 0 : index
    %801 = vector.load %arg6[%c1_252, %c1_253, %800, %c0_254] : memref<3x4x18x16xf32, #tpu.memory_space<vmem>>, vector<1x1x8x16xf32>
    %802 = vector.shape_cast %801 : vector<1x1x8x16xf32> to vector<8x16xf32>
    %c1_i32_255 = arith.constant 1 : i32
    %803 = arith.addi %635, %c1_i32_255 : i32
    %c2_256 = arith.constant 2 : index
    %c1_257 = arith.constant 1 : index
    %804 = arith.index_cast %803 : i32 to index
    %c0_258 = arith.constant 0 : index
    %805 = vector.load %arg6[%c2_256, %c1_257, %804, %c0_258] : memref<3x4x18x16xf32, #tpu.memory_space<vmem>>, vector<1x1x8x16xf32>
    %806 = vector.shape_cast %805 : vector<1x1x8x16xf32> to vector<8x16xf32>
    %807 = vector.broadcast %50 : f32 to vector<8x16xf32>
    %808 = arith.mulf %798, %807 : vector<8x16xf32>
    %809 = vector.broadcast %51 : f32 to vector<8x16xf32>
    %810 = arith.mulf %802, %809 : vector<8x16xf32>
    %811 = arith.addf %808, %810 : vector<8x16xf32>
    %812 = vector.broadcast %52 : f32 to vector<8x16xf32>
    %813 = arith.mulf %806, %812 : vector<8x16xf32>
    %814 = arith.addf %811, %813 : vector<8x16xf32>
    %815 = arith.addf %776, %814 : vector<8x16xf32>
    %816 = vector.broadcast %86 : f32 to vector<8x16xf32>
    %817 = arith.mulf %798, %816 : vector<8x16xf32>
    %818 = vector.broadcast %87 : f32 to vector<8x16xf32>
    %819 = arith.mulf %802, %818 : vector<8x16xf32>
    %820 = arith.addf %817, %819 : vector<8x16xf32>
    %821 = vector.broadcast %88 : f32 to vector<8x16xf32>
    %822 = arith.mulf %806, %821 : vector<8x16xf32>
    %823 = arith.addf %820, %822 : vector<8x16xf32>
    %824 = arith.addf %785, %823 : vector<8x16xf32>
    %825 = vector.broadcast %122 : f32 to vector<8x16xf32>
    %826 = arith.mulf %798, %825 : vector<8x16xf32>
    %827 = vector.broadcast %123 : f32 to vector<8x16xf32>
    %828 = arith.mulf %802, %827 : vector<8x16xf32>
    %829 = arith.addf %826, %828 : vector<8x16xf32>
    %830 = vector.broadcast %124 : f32 to vector<8x16xf32>
    %831 = arith.mulf %806, %830 : vector<8x16xf32>
    %832 = arith.addf %829, %831 : vector<8x16xf32>
    %833 = arith.addf %794, %832 : vector<8x16xf32>
    %c2_i32_259 = arith.constant 2 : i32
    %834 = arith.addi %635, %c2_i32_259 : i32
    %c0_260 = arith.constant 0 : index
    %c1_261 = arith.constant 1 : index
    %835 = arith.index_cast %834 : i32 to index
    %c0_262 = arith.constant 0 : index
    %836 = vector.load %arg6[%c0_260, %c1_261, %835, %c0_262] : memref<3x4x18x16xf32, #tpu.memory_space<vmem>>, vector<1x1x8x16xf32>
    %837 = vector.shape_cast %836 : vector<1x1x8x16xf32> to vector<8x16xf32>
    %c2_i32_263 = arith.constant 2 : i32
    %838 = arith.addi %635, %c2_i32_263 : i32
    %c1_264 = arith.constant 1 : index
    %c1_265 = arith.constant 1 : index
    %839 = arith.index_cast %838 : i32 to index
    %c0_266 = arith.constant 0 : index
    %840 = vector.load %arg6[%c1_264, %c1_265, %839, %c0_266] : memref<3x4x18x16xf32, #tpu.memory_space<vmem>>, vector<1x1x8x16xf32>
    %841 = vector.shape_cast %840 : vector<1x1x8x16xf32> to vector<8x16xf32>
    %c2_i32_267 = arith.constant 2 : i32
    %842 = arith.addi %635, %c2_i32_267 : i32
    %c2_268 = arith.constant 2 : index
    %c1_269 = arith.constant 1 : index
    %843 = arith.index_cast %842 : i32 to index
    %c0_270 = arith.constant 0 : index
    %844 = vector.load %arg6[%c2_268, %c1_269, %843, %c0_270] : memref<3x4x18x16xf32, #tpu.memory_space<vmem>>, vector<1x1x8x16xf32>
    %845 = vector.shape_cast %844 : vector<1x1x8x16xf32> to vector<8x16xf32>
    %846 = vector.broadcast %53 : f32 to vector<8x16xf32>
    %847 = arith.mulf %837, %846 : vector<8x16xf32>
    %848 = vector.broadcast %54 : f32 to vector<8x16xf32>
    %849 = arith.mulf %841, %848 : vector<8x16xf32>
    %850 = arith.addf %847, %849 : vector<8x16xf32>
    %851 = vector.broadcast %55 : f32 to vector<8x16xf32>
    %852 = arith.mulf %845, %851 : vector<8x16xf32>
    %853 = arith.addf %850, %852 : vector<8x16xf32>
    %854 = arith.addf %815, %853 : vector<8x16xf32>
    %855 = vector.broadcast %89 : f32 to vector<8x16xf32>
    %856 = arith.mulf %837, %855 : vector<8x16xf32>
    %857 = vector.broadcast %90 : f32 to vector<8x16xf32>
    %858 = arith.mulf %841, %857 : vector<8x16xf32>
    %859 = arith.addf %856, %858 : vector<8x16xf32>
    %860 = vector.broadcast %91 : f32 to vector<8x16xf32>
    %861 = arith.mulf %845, %860 : vector<8x16xf32>
    %862 = arith.addf %859, %861 : vector<8x16xf32>
    %863 = arith.addf %824, %862 : vector<8x16xf32>
    %864 = vector.broadcast %125 : f32 to vector<8x16xf32>
    %865 = arith.mulf %837, %864 : vector<8x16xf32>
    %866 = vector.broadcast %126 : f32 to vector<8x16xf32>
    %867 = arith.mulf %841, %866 : vector<8x16xf32>
    %868 = arith.addf %865, %867 : vector<8x16xf32>
    %869 = vector.broadcast %127 : f32 to vector<8x16xf32>
    %870 = arith.mulf %845, %869 : vector<8x16xf32>
    %871 = arith.addf %868, %870 : vector<8x16xf32>
    %872 = arith.addf %833, %871 : vector<8x16xf32>
    %c0_i32_271 = arith.constant 0 : i32
    %873 = arith.addi %635, %c0_i32_271 : i32
    %c0_272 = arith.constant 0 : index
    %c2_273 = arith.constant 2 : index
    %874 = arith.index_cast %873 : i32 to index
    %c0_274 = arith.constant 0 : index
    %875 = vector.load %arg6[%c0_272, %c2_273, %874, %c0_274] : memref<3x4x18x16xf32, #tpu.memory_space<vmem>>, vector<1x1x8x16xf32>
    %876 = vector.shape_cast %875 : vector<1x1x8x16xf32> to vector<8x16xf32>
    %c0_i32_275 = arith.constant 0 : i32
    %877 = arith.addi %635, %c0_i32_275 : i32
    %c1_276 = arith.constant 1 : index
    %c2_277 = arith.constant 2 : index
    %878 = arith.index_cast %877 : i32 to index
    %c0_278 = arith.constant 0 : index
    %879 = vector.load %arg6[%c1_276, %c2_277, %878, %c0_278] : memref<3x4x18x16xf32, #tpu.memory_space<vmem>>, vector<1x1x8x16xf32>
    %880 = vector.shape_cast %879 : vector<1x1x8x16xf32> to vector<8x16xf32>
    %c0_i32_279 = arith.constant 0 : i32
    %881 = arith.addi %635, %c0_i32_279 : i32
    %c2_280 = arith.constant 2 : index
    %c2_281 = arith.constant 2 : index
    %882 = arith.index_cast %881 : i32 to index
    %c0_282 = arith.constant 0 : index
    %883 = vector.load %arg6[%c2_280, %c2_281, %882, %c0_282] : memref<3x4x18x16xf32, #tpu.memory_space<vmem>>, vector<1x1x8x16xf32>
    %884 = vector.shape_cast %883 : vector<1x1x8x16xf32> to vector<8x16xf32>
    %885 = vector.broadcast %56 : f32 to vector<8x16xf32>
    %886 = arith.mulf %876, %885 : vector<8x16xf32>
    %887 = vector.broadcast %57 : f32 to vector<8x16xf32>
    %888 = arith.mulf %880, %887 : vector<8x16xf32>
    %889 = arith.addf %886, %888 : vector<8x16xf32>
    %890 = vector.broadcast %58 : f32 to vector<8x16xf32>
    %891 = arith.mulf %884, %890 : vector<8x16xf32>
    %892 = arith.addf %889, %891 : vector<8x16xf32>
    %893 = arith.addf %854, %892 : vector<8x16xf32>
    %894 = vector.broadcast %92 : f32 to vector<8x16xf32>
    %895 = arith.mulf %876, %894 : vector<8x16xf32>
    %896 = vector.broadcast %93 : f32 to vector<8x16xf32>
    %897 = arith.mulf %880, %896 : vector<8x16xf32>
    %898 = arith.addf %895, %897 : vector<8x16xf32>
    %899 = vector.broadcast %94 : f32 to vector<8x16xf32>
    %900 = arith.mulf %884, %899 : vector<8x16xf32>
    %901 = arith.addf %898, %900 : vector<8x16xf32>
    %902 = arith.addf %863, %901 : vector<8x16xf32>
    %903 = vector.broadcast %128 : f32 to vector<8x16xf32>
    %904 = arith.mulf %876, %903 : vector<8x16xf32>
    %905 = vector.broadcast %129 : f32 to vector<8x16xf32>
    %906 = arith.mulf %880, %905 : vector<8x16xf32>
    %907 = arith.addf %904, %906 : vector<8x16xf32>
    %908 = vector.broadcast %130 : f32 to vector<8x16xf32>
    %909 = arith.mulf %884, %908 : vector<8x16xf32>
    %910 = arith.addf %907, %909 : vector<8x16xf32>
    %911 = arith.addf %872, %910 : vector<8x16xf32>
    %c1_i32_283 = arith.constant 1 : i32
    %912 = arith.addi %635, %c1_i32_283 : i32
    %c0_284 = arith.constant 0 : index
    %c2_285 = arith.constant 2 : index
    %913 = arith.index_cast %912 : i32 to index
    %c0_286 = arith.constant 0 : index
    %914 = vector.load %arg6[%c0_284, %c2_285, %913, %c0_286] : memref<3x4x18x16xf32, #tpu.memory_space<vmem>>, vector<1x1x8x16xf32>
    %915 = vector.shape_cast %914 : vector<1x1x8x16xf32> to vector<8x16xf32>
    %c1_i32_287 = arith.constant 1 : i32
    %916 = arith.addi %635, %c1_i32_287 : i32
    %c1_288 = arith.constant 1 : index
    %c2_289 = arith.constant 2 : index
    %917 = arith.index_cast %916 : i32 to index
    %c0_290 = arith.constant 0 : index
    %918 = vector.load %arg6[%c1_288, %c2_289, %917, %c0_290] : memref<3x4x18x16xf32, #tpu.memory_space<vmem>>, vector<1x1x8x16xf32>
    %919 = vector.shape_cast %918 : vector<1x1x8x16xf32> to vector<8x16xf32>
    %c1_i32_291 = arith.constant 1 : i32
    %920 = arith.addi %635, %c1_i32_291 : i32
    %c2_292 = arith.constant 2 : index
    %c2_293 = arith.constant 2 : index
    %921 = arith.index_cast %920 : i32 to index
    %c0_294 = arith.constant 0 : index
    %922 = vector.load %arg6[%c2_292, %c2_293, %921, %c0_294] : memref<3x4x18x16xf32, #tpu.memory_space<vmem>>, vector<1x1x8x16xf32>
    %923 = vector.shape_cast %922 : vector<1x1x8x16xf32> to vector<8x16xf32>
    %924 = vector.broadcast %59 : f32 to vector<8x16xf32>
    %925 = arith.mulf %915, %924 : vector<8x16xf32>
    %926 = vector.broadcast %60 : f32 to vector<8x16xf32>
    %927 = arith.mulf %919, %926 : vector<8x16xf32>
    %928 = arith.addf %925, %927 : vector<8x16xf32>
    %929 = vector.broadcast %61 : f32 to vector<8x16xf32>
    %930 = arith.mulf %923, %929 : vector<8x16xf32>
    %931 = arith.addf %928, %930 : vector<8x16xf32>
    %932 = arith.addf %893, %931 : vector<8x16xf32>
    %933 = vector.broadcast %95 : f32 to vector<8x16xf32>
    %934 = arith.mulf %915, %933 : vector<8x16xf32>
    %935 = vector.broadcast %96 : f32 to vector<8x16xf32>
    %936 = arith.mulf %919, %935 : vector<8x16xf32>
    %937 = arith.addf %934, %936 : vector<8x16xf32>
    %938 = vector.broadcast %97 : f32 to vector<8x16xf32>
    %939 = arith.mulf %923, %938 : vector<8x16xf32>
    %940 = arith.addf %937, %939 : vector<8x16xf32>
    %941 = arith.addf %902, %940 : vector<8x16xf32>
    %942 = vector.broadcast %131 : f32 to vector<8x16xf32>
    %943 = arith.mulf %915, %942 : vector<8x16xf32>
    %944 = vector.broadcast %132 : f32 to vector<8x16xf32>
    %945 = arith.mulf %919, %944 : vector<8x16xf32>
    %946 = arith.addf %943, %945 : vector<8x16xf32>
    %947 = vector.broadcast %133 : f32 to vector<8x16xf32>
    %948 = arith.mulf %923, %947 : vector<8x16xf32>
    %949 = arith.addf %946, %948 : vector<8x16xf32>
    %950 = arith.addf %911, %949 : vector<8x16xf32>
    %c2_i32_295 = arith.constant 2 : i32
    %951 = arith.addi %635, %c2_i32_295 : i32
    %c0_296 = arith.constant 0 : index
    %c2_297 = arith.constant 2 : index
    %952 = arith.index_cast %951 : i32 to index
    %c0_298 = arith.constant 0 : index
    %953 = vector.load %arg6[%c0_296, %c2_297, %952, %c0_298] : memref<3x4x18x16xf32, #tpu.memory_space<vmem>>, vector<1x1x8x16xf32>
    %954 = vector.shape_cast %953 : vector<1x1x8x16xf32> to vector<8x16xf32>
    %c2_i32_299 = arith.constant 2 : i32
    %955 = arith.addi %635, %c2_i32_299 : i32
    %c1_300 = arith.constant 1 : index
    %c2_301 = arith.constant 2 : index
    %956 = arith.index_cast %955 : i32 to index
    %c0_302 = arith.constant 0 : index
    %957 = vector.load %arg6[%c1_300, %c2_301, %956, %c0_302] : memref<3x4x18x16xf32, #tpu.memory_space<vmem>>, vector<1x1x8x16xf32>
    %958 = vector.shape_cast %957 : vector<1x1x8x16xf32> to vector<8x16xf32>
    %c2_i32_303 = arith.constant 2 : i32
    %959 = arith.addi %635, %c2_i32_303 : i32
    %c2_304 = arith.constant 2 : index
    %c2_305 = arith.constant 2 : index
    %960 = arith.index_cast %959 : i32 to index
    %c0_306 = arith.constant 0 : index
    %961 = vector.load %arg6[%c2_304, %c2_305, %960, %c0_306] : memref<3x4x18x16xf32, #tpu.memory_space<vmem>>, vector<1x1x8x16xf32>
    %962 = vector.shape_cast %961 : vector<1x1x8x16xf32> to vector<8x16xf32>
    %963 = vector.broadcast %62 : f32 to vector<8x16xf32>
    %964 = arith.mulf %954, %963 : vector<8x16xf32>
    %965 = vector.broadcast %63 : f32 to vector<8x16xf32>
    %966 = arith.mulf %958, %965 : vector<8x16xf32>
    %967 = arith.addf %964, %966 : vector<8x16xf32>
    %968 = vector.broadcast %64 : f32 to vector<8x16xf32>
    %969 = arith.mulf %962, %968 : vector<8x16xf32>
    %970 = arith.addf %967, %969 : vector<8x16xf32>
    %971 = arith.addf %932, %970 : vector<8x16xf32>
    %972 = vector.broadcast %98 : f32 to vector<8x16xf32>
    %973 = arith.mulf %954, %972 : vector<8x16xf32>
    %974 = vector.broadcast %99 : f32 to vector<8x16xf32>
    %975 = arith.mulf %958, %974 : vector<8x16xf32>
    %976 = arith.addf %973, %975 : vector<8x16xf32>
    %977 = vector.broadcast %100 : f32 to vector<8x16xf32>
    %978 = arith.mulf %962, %977 : vector<8x16xf32>
    %979 = arith.addf %976, %978 : vector<8x16xf32>
    %980 = arith.addf %941, %979 : vector<8x16xf32>
    %981 = vector.broadcast %134 : f32 to vector<8x16xf32>
    %982 = arith.mulf %954, %981 : vector<8x16xf32>
    %983 = vector.broadcast %135 : f32 to vector<8x16xf32>
    %984 = arith.mulf %958, %983 : vector<8x16xf32>
    %985 = arith.addf %982, %984 : vector<8x16xf32>
    %986 = vector.broadcast %136 : f32 to vector<8x16xf32>
    %987 = arith.mulf %962, %986 : vector<8x16xf32>
    %988 = arith.addf %985, %987 : vector<8x16xf32>
    %989 = arith.addf %950, %988 : vector<8x16xf32>
    %c0_i32_307 = arith.constant 0 : i32
    %990 = arith.addi %635, %c0_i32_307 : i32
    %c0_308 = arith.constant 0 : index
    %c3_309 = arith.constant 3 : index
    %991 = arith.index_cast %990 : i32 to index
    %c0_310 = arith.constant 0 : index
    %992 = vector.load %arg6[%c0_308, %c3_309, %991, %c0_310] : memref<3x4x18x16xf32, #tpu.memory_space<vmem>>, vector<1x1x8x16xf32>
    %993 = vector.shape_cast %992 : vector<1x1x8x16xf32> to vector<8x16xf32>
    %c0_i32_311 = arith.constant 0 : i32
    %994 = arith.addi %635, %c0_i32_311 : i32
    %c1_312 = arith.constant 1 : index
    %c3_313 = arith.constant 3 : index
    %995 = arith.index_cast %994 : i32 to index
    %c0_314 = arith.constant 0 : index
    %996 = vector.load %arg6[%c1_312, %c3_313, %995, %c0_314] : memref<3x4x18x16xf32, #tpu.memory_space<vmem>>, vector<1x1x8x16xf32>
    %997 = vector.shape_cast %996 : vector<1x1x8x16xf32> to vector<8x16xf32>
    %c0_i32_315 = arith.constant 0 : i32
    %998 = arith.addi %635, %c0_i32_315 : i32
    %c2_316 = arith.constant 2 : index
    %c3_317 = arith.constant 3 : index
    %999 = arith.index_cast %998 : i32 to index
    %c0_318 = arith.constant 0 : index
    %1000 = vector.load %arg6[%c2_316, %c3_317, %999, %c0_318] : memref<3x4x18x16xf32, #tpu.memory_space<vmem>>, vector<1x1x8x16xf32>
    %1001 = vector.shape_cast %1000 : vector<1x1x8x16xf32> to vector<8x16xf32>
    %1002 = vector.broadcast %65 : f32 to vector<8x16xf32>
    %1003 = arith.mulf %993, %1002 : vector<8x16xf32>
    %1004 = vector.broadcast %66 : f32 to vector<8x16xf32>
    %1005 = arith.mulf %997, %1004 : vector<8x16xf32>
    %1006 = arith.addf %1003, %1005 : vector<8x16xf32>
    %1007 = vector.broadcast %67 : f32 to vector<8x16xf32>
    %1008 = arith.mulf %1001, %1007 : vector<8x16xf32>
    %1009 = arith.addf %1006, %1008 : vector<8x16xf32>
    %1010 = arith.addf %971, %1009 : vector<8x16xf32>
    %1011 = vector.broadcast %101 : f32 to vector<8x16xf32>
    %1012 = arith.mulf %993, %1011 : vector<8x16xf32>
    %1013 = vector.broadcast %102 : f32 to vector<8x16xf32>
    %1014 = arith.mulf %997, %1013 : vector<8x16xf32>
    %1015 = arith.addf %1012, %1014 : vector<8x16xf32>
    %1016 = vector.broadcast %103 : f32 to vector<8x16xf32>
    %1017 = arith.mulf %1001, %1016 : vector<8x16xf32>
    %1018 = arith.addf %1015, %1017 : vector<8x16xf32>
    %1019 = arith.addf %980, %1018 : vector<8x16xf32>
    %1020 = vector.broadcast %137 : f32 to vector<8x16xf32>
    %1021 = arith.mulf %993, %1020 : vector<8x16xf32>
    %1022 = vector.broadcast %138 : f32 to vector<8x16xf32>
    %1023 = arith.mulf %997, %1022 : vector<8x16xf32>
    %1024 = arith.addf %1021, %1023 : vector<8x16xf32>
    %1025 = vector.broadcast %139 : f32 to vector<8x16xf32>
    %1026 = arith.mulf %1001, %1025 : vector<8x16xf32>
    %1027 = arith.addf %1024, %1026 : vector<8x16xf32>
    %1028 = arith.addf %989, %1027 : vector<8x16xf32>
    %c1_i32_319 = arith.constant 1 : i32
    %1029 = arith.addi %635, %c1_i32_319 : i32
    %c0_320 = arith.constant 0 : index
    %c3_321 = arith.constant 3 : index
    %1030 = arith.index_cast %1029 : i32 to index
    %c0_322 = arith.constant 0 : index
    %1031 = vector.load %arg6[%c0_320, %c3_321, %1030, %c0_322] : memref<3x4x18x16xf32, #tpu.memory_space<vmem>>, vector<1x1x8x16xf32>
    %1032 = vector.shape_cast %1031 : vector<1x1x8x16xf32> to vector<8x16xf32>
    %c1_i32_323 = arith.constant 1 : i32
    %1033 = arith.addi %635, %c1_i32_323 : i32
    %c1_324 = arith.constant 1 : index
    %c3_325 = arith.constant 3 : index
    %1034 = arith.index_cast %1033 : i32 to index
    %c0_326 = arith.constant 0 : index
    %1035 = vector.load %arg6[%c1_324, %c3_325, %1034, %c0_326] : memref<3x4x18x16xf32, #tpu.memory_space<vmem>>, vector<1x1x8x16xf32>
    %1036 = vector.shape_cast %1035 : vector<1x1x8x16xf32> to vector<8x16xf32>
    %c1_i32_327 = arith.constant 1 : i32
    %1037 = arith.addi %635, %c1_i32_327 : i32
    %c2_328 = arith.constant 2 : index
    %c3_329 = arith.constant 3 : index
    %1038 = arith.index_cast %1037 : i32 to index
    %c0_330 = arith.constant 0 : index
    %1039 = vector.load %arg6[%c2_328, %c3_329, %1038, %c0_330] : memref<3x4x18x16xf32, #tpu.memory_space<vmem>>, vector<1x1x8x16xf32>
    %1040 = vector.shape_cast %1039 : vector<1x1x8x16xf32> to vector<8x16xf32>
    %1041 = vector.broadcast %68 : f32 to vector<8x16xf32>
    %1042 = arith.mulf %1032, %1041 : vector<8x16xf32>
    %1043 = vector.broadcast %69 : f32 to vector<8x16xf32>
    %1044 = arith.mulf %1036, %1043 : vector<8x16xf32>
    %1045 = arith.addf %1042, %1044 : vector<8x16xf32>
    %1046 = vector.broadcast %70 : f32 to vector<8x16xf32>
    %1047 = arith.mulf %1040, %1046 : vector<8x16xf32>
    %1048 = arith.addf %1045, %1047 : vector<8x16xf32>
    %1049 = arith.addf %1010, %1048 : vector<8x16xf32>
    %1050 = vector.broadcast %104 : f32 to vector<8x16xf32>
    %1051 = arith.mulf %1032, %1050 : vector<8x16xf32>
    %1052 = vector.broadcast %105 : f32 to vector<8x16xf32>
    %1053 = arith.mulf %1036, %1052 : vector<8x16xf32>
    %1054 = arith.addf %1051, %1053 : vector<8x16xf32>
    %1055 = vector.broadcast %106 : f32 to vector<8x16xf32>
    %1056 = arith.mulf %1040, %1055 : vector<8x16xf32>
    %1057 = arith.addf %1054, %1056 : vector<8x16xf32>
    %1058 = arith.addf %1019, %1057 : vector<8x16xf32>
    %1059 = vector.broadcast %140 : f32 to vector<8x16xf32>
    %1060 = arith.mulf %1032, %1059 : vector<8x16xf32>
    %1061 = vector.broadcast %141 : f32 to vector<8x16xf32>
    %1062 = arith.mulf %1036, %1061 : vector<8x16xf32>
    %1063 = arith.addf %1060, %1062 : vector<8x16xf32>
    %1064 = vector.broadcast %142 : f32 to vector<8x16xf32>
    %1065 = arith.mulf %1040, %1064 : vector<8x16xf32>
    %1066 = arith.addf %1063, %1065 : vector<8x16xf32>
    %1067 = arith.addf %1028, %1066 : vector<8x16xf32>
    %c2_i32_331 = arith.constant 2 : i32
    %1068 = arith.addi %635, %c2_i32_331 : i32
    %c0_332 = arith.constant 0 : index
    %c3_333 = arith.constant 3 : index
    %1069 = arith.index_cast %1068 : i32 to index
    %c0_334 = arith.constant 0 : index
    %1070 = vector.load %arg6[%c0_332, %c3_333, %1069, %c0_334] : memref<3x4x18x16xf32, #tpu.memory_space<vmem>>, vector<1x1x8x16xf32>
    %1071 = vector.shape_cast %1070 : vector<1x1x8x16xf32> to vector<8x16xf32>
    %c2_i32_335 = arith.constant 2 : i32
    %1072 = arith.addi %635, %c2_i32_335 : i32
    %c1_336 = arith.constant 1 : index
    %c3_337 = arith.constant 3 : index
    %1073 = arith.index_cast %1072 : i32 to index
    %c0_338 = arith.constant 0 : index
    %1074 = vector.load %arg6[%c1_336, %c3_337, %1073, %c0_338] : memref<3x4x18x16xf32, #tpu.memory_space<vmem>>, vector<1x1x8x16xf32>
    %1075 = vector.shape_cast %1074 : vector<1x1x8x16xf32> to vector<8x16xf32>
    %c2_i32_339 = arith.constant 2 : i32
    %1076 = arith.addi %635, %c2_i32_339 : i32
    %c2_340 = arith.constant 2 : index
    %c3_341 = arith.constant 3 : index
    %1077 = arith.index_cast %1076 : i32 to index
    %c0_342 = arith.constant 0 : index
    %1078 = vector.load %arg6[%c2_340, %c3_341, %1077, %c0_342] : memref<3x4x18x16xf32, #tpu.memory_space<vmem>>, vector<1x1x8x16xf32>
    %1079 = vector.shape_cast %1078 : vector<1x1x8x16xf32> to vector<8x16xf32>
    %1080 = vector.broadcast %71 : f32 to vector<8x16xf32>
    %1081 = arith.mulf %1071, %1080 : vector<8x16xf32>
    %1082 = vector.broadcast %72 : f32 to vector<8x16xf32>
    %1083 = arith.mulf %1075, %1082 : vector<8x16xf32>
    %1084 = arith.addf %1081, %1083 : vector<8x16xf32>
    %1085 = vector.broadcast %73 : f32 to vector<8x16xf32>
    %1086 = arith.mulf %1079, %1085 : vector<8x16xf32>
    %1087 = arith.addf %1084, %1086 : vector<8x16xf32>
    %1088 = arith.addf %1049, %1087 : vector<8x16xf32>
    %1089 = vector.broadcast %107 : f32 to vector<8x16xf32>
    %1090 = arith.mulf %1071, %1089 : vector<8x16xf32>
    %1091 = vector.broadcast %108 : f32 to vector<8x16xf32>
    %1092 = arith.mulf %1075, %1091 : vector<8x16xf32>
    %1093 = arith.addf %1090, %1092 : vector<8x16xf32>
    %1094 = vector.broadcast %109 : f32 to vector<8x16xf32>
    %1095 = arith.mulf %1079, %1094 : vector<8x16xf32>
    %1096 = arith.addf %1093, %1095 : vector<8x16xf32>
    %1097 = arith.addf %1058, %1096 : vector<8x16xf32>
    %1098 = vector.broadcast %143 : f32 to vector<8x16xf32>
    %1099 = arith.mulf %1071, %1098 : vector<8x16xf32>
    %1100 = vector.broadcast %144 : f32 to vector<8x16xf32>
    %1101 = arith.mulf %1075, %1100 : vector<8x16xf32>
    %1102 = arith.addf %1099, %1101 : vector<8x16xf32>
    %1103 = vector.broadcast %145 : f32 to vector<8x16xf32>
    %1104 = arith.mulf %1079, %1103 : vector<8x16xf32>
    %1105 = arith.addf %1102, %1104 : vector<8x16xf32>
    %1106 = arith.addf %1067, %1105 : vector<8x16xf32>
    %1107 = math.tanh %1088 : vector<8x16xf32>
    %c0_343 = arith.constant 0 : index
    %c0_344 = arith.constant 0 : index
    %1108 = arith.index_cast %635 : i32 to index
    %c0_345 = arith.constant 0 : index
    %1109 = vector.load %arg5[%c0_343, %c0_344, %1108, %c0_345] : memref<1x3x16x16xf32, #tpu.memory_space<vmem>>, vector<1x1x8x16xf32>
    %1110 = vector.shape_cast %1109 : vector<1x1x8x16xf32> to vector<8x16xf32>
    %1111 = vector.shape_cast %1107 : vector<8x16xf32> to vector<1x1x8x16xf32>
    tpu.vector_store %arg5[%c0_343, %c0_344, %1108, %c0_345], %1111 {strides = array<i32>} : memref<1x3x16x16xf32, #tpu.memory_space<vmem>>, vector<1x1x8x16xf32>,
    %1112 = math.tanh %1097 : vector<8x16xf32>
    %c0_346 = arith.constant 0 : index
    %c1_347 = arith.constant 1 : index
    %1113 = arith.index_cast %635 : i32 to index
    %c0_348 = arith.constant 0 : index
    %1114 = vector.load %arg5[%c0_346, %c1_347, %1113, %c0_348] : memref<1x3x16x16xf32, #tpu.memory_space<vmem>>, vector<1x1x8x16xf32>
    %1115 = vector.shape_cast %1114 : vector<1x1x8x16xf32> to vector<8x16xf32>
    %1116 = vector.shape_cast %1112 : vector<8x16xf32> to vector<1x1x8x16xf32>
    tpu.vector_store %arg5[%c0_346, %c1_347, %1113, %c0_348], %1116 {strides = array<i32>} : memref<1x3x16x16xf32, #tpu.memory_space<vmem>>, vector<1x1x8x16xf32>,
    %1117 = math.tanh %1106 : vector<8x16xf32>
    %c0_349 = arith.constant 0 : index
    %c2_350 = arith.constant 2 : index
    %1118 = arith.index_cast %635 : i32 to index
    %c0_351 = arith.constant 0 : index
    %1119 = vector.load %arg5[%c0_349, %c2_350, %1118, %c0_351] : memref<1x3x16x16xf32, #tpu.memory_space<vmem>>, vector<1x1x8x16xf32>
    %1120 = vector.shape_cast %1119 : vector<1x1x8x16xf32> to vector<8x16xf32>
    %1121 = vector.shape_cast %1117 : vector<8x16xf32> to vector<1x1x8x16xf32>
    tpu.vector_store %arg5[%c0_349, %c2_350, %1118, %c0_351], %1121 {strides = array<i32>} : memref<1x3x16x16xf32, #tpu.memory_space<vmem>>, vector<1x1x8x16xf32>,
    %c2_i32_352 = arith.constant 2 : i32
    return
  }
  func.func @transform_0(%arg0: i32, %arg1: i32) -> (i32, i32, i32, i32) {
    %c0_i32 = arith.constant 0 : i32
    %c0_i32_0 = arith.constant 0 : i32
    %c0_i32_1 = arith.constant 0 : i32
    return %arg0, %c0_i32, %arg1, %c0_i32_0 : i32, i32, i32, i32
  }
  func.func @transform_1(%arg0: i32, %arg1: i32) -> (i32, i32, i32, i32, i32) {
    %c0_i32 = arith.constant 0 : i32
    %c0_i32_0 = arith.constant 0 : i32
    %c0_i32_1 = arith.constant 0 : i32
    %c0_i32_2 = arith.constant 0 : i32
    return %arg0, %c0_i32, %arg1, %c0_i32_0, %c0_i32_1 : i32, i32, i32, i32, i32
  }
  func.func @transform_2(%arg0: i32, %arg1: i32) -> i32 {
    %c0_i32 = arith.constant 0 : i32
    %c0_i32_0 = arith.constant 0 : i32
    return %c0_i32 : i32
  }
  func.func @transform_3(%arg0: i32, %arg1: i32) -> (i32, i32, i32, i32) {
    %c0_i32 = arith.constant 0 : i32
    %c0_i32_0 = arith.constant 0 : i32
    %c0_i32_1 = arith.constant 0 : i32
    return %arg0, %c0_i32, %arg1, %c0_i32_0 : i32, i32, i32, i32
  }
}

</mosaic_0001>

<bundles_post_ra>
// kernel: tpu_custom_call.1
= control target key start
LH: loop header
LB: loop body
LE: loop exit
PB: predicated region body
PF: predicated region fallthrough
CT: control target
= control target key end

     0   :  { %s3698_s0 = inlined_call_operand.hbm [shape: f32[2,4,16,16], index: 0, kind: input, shape index: {}]   ;;  %s3699_s1 = inlined_call_operand.hbm [shape: f32[2,4,1,2,16], index: 1, kind: input, shape index: {}]   ;;  %s3700_s2 = inlined_call_operand.vmem [shape: f32[108], index: 2, kind: input, shape index: {}]   ;;  %s3701_s3 = inlined_call_operand.hbm [shape: f32[2,3,16,16], index: 3, kind: output, shape index: {}]  }
   0x1   :  { %3822 = sst [smem:[#allocation137_spill]] %s3698_s0 }
   0x2   :  { %3823 = sst [smem:[#allocation138_spill]] %s3699_s1 }
   0x3   :  { %3824 = sst [smem:[#allocation139_spill]] %s3700_s2 }
   0x4   :  { %3825 = sst [smem:[#allocation140_spill]] %s3701_s3 }
   0x5   :  { %8 = vsyncpa [#allocation4], 0 }
   0x6   :  { %10 = vsyncpa [#allocation4 + $0x1], 0 }
   0x7   :  { %11 = vsyncpa [#allocation8], 0 }
   0x8   :  { %13 = vsyncpa [#allocation8 + $0x1], 0 }
   0x9   :  { %14 = vsyncpa [#allocation6], 0 }
   0xa   :  { %15 = vsyncpa [#allocation5], 0 }
   0xb   :  { %17 = vsyncpa [#allocation5 + $0x1], 0  ;;  %s2171_s12 = smov 0   ;;  %s2173_s13 = smov 0  }
   0xc   :  { %s2175_s14 = smov 0   ;;  %s2177_s15 = smov 0  }
   0xd   :  { %s2179_s16 = smov 0   ;;  %s2181_s17 = smov 0  }
   0xe LB: > { %3826 = sst [smem:[#allocation15_spill]] %s2114_s12  ;;  %s1728_s18 = sadd.s32 4294967295, %s2134_s17   ;;  %s2134_s17 = sphi %s2181_s17, %s23_s17   ;;  %s2130_s16 = sphi %s2179_s16, %s4234_s16   ;;  %s2126_s15 = sphi %s2177_s15, %s4233_s15   ;;  %s2122_s14 = sphi %s2175_s14, %s4232_s14   ;;  %s2118_s13 = sphi %s2173_s13, %s4231_s13   ;;  %s2114_s12 = sphi %s2171_s12, %s4230_s12  }
   0xf   : > { %3827 = sst [smem:[#allocation16_spill]] %s2118_s13  ;;  %s1729_s19 = sadd.s32 4294967294, %s2134_s17  }
  0x10   : > { %3828 = sst [smem:[#allocation17_spill]] %s2122_s14  ;;  %s44_s20 = sadd.s32 1, %s2122_s14 }
  0x11   : > { %3829 = sst [smem:[#allocation18_spill]] %s2126_s15  ;;  %p51_p0 = scmp.ne.s32.totalorder %s2122_s14, %s2118_s13 }
  0x12   : > { %3830 = sst [smem:[#allocation19_spill]] %s2130_s16  ;;  %p52_p1 = scmp.eq.s32.totalorder %s2134_s17, 0 }
  0x13   : > { %3831 = sst [smem:[#allocation20_spill]] %s2134_s17  ;;  %p57_p2 = scmp.ne.s32.totalorder %s2118_s13, %s2114_s12 }
  0x14   : > { %p2209_p3 = scmp.eq.s32.totalorder %s1728_s18, 0  ;;  %p132_p4 = scmp.eq.s32.totalorder %s1728_s18, 1 }
  0x15   : > { %p2213_p5 = por %p52_p1, %p51_p0  ;;  %p138_p6 = scmp.eq.s32.totalorder %s1729_s19, 1 }
  0x16   : > { %s3832_s21 = scalar_select %p2209_p3, 1, 0 }
  0x17   : > { %p2219_p7 = por %p2209_p3, %p57_p2  ;;  %p2223_p8 = por %p132_p4, %p51_p0 }
  0x18   : > { %p2227_p9 = por %p138_p6, %p57_p2  ;;  %p1730_p10 = scmp.ge.s32.totalorder %s2134_s17, 1 }
  0x19   : > { %s3834_s23 = scalar_select %p2219_p7, 1, 0 }
  0x1a   : > { %s3835_s24 = scalar_select %p2223_p8, 1, 0 }
  0x1b   : > { %s3837_s25 = scalar_select %p2227_p9, 1, 0 }
  0x1c   : > { %3836 = sst [smem:[#allocation21_spill]] %s3835_s24  ;;  %p145_p11 = scmp.lt.s32.totalorder %s2134_s17, 3 }
  0x1d   : > { %3838 = sst [smem:[#allocation22_spill]] %s3837_s25  ;;  %s3839_s2 = sld [smem:[#allocation139_spill]] }
  0x1e   : > { %p2236_p12 = pnand %p1730_p10, %p145_p11  ;;  %p1888_p0 = scmp.lt.s32.totalorder %s2134_s17, 2 }
  0x1f   : > { %s35_s5 = sadd.s32 1, %s2130_s16  ;;  %s2262_s7 = sand.u32 1, %s2122_s14  }
  0x20   : > { %p1872_p1 = pneg %p2236_p12  ;;  %p2246_p2 = pnand %p1888_p0, %p2213_p5 }
  0x21   : > { %p2257_p6 = scmp.ge.s32.totalorder %s35_s5, 2 }
  0x22   : > { %p2252_p4 = pnand %p1872_p1, %p2209_p3 }
  0x23   : > { %s158_s28 = sshll.u32 %s3839_s2, 4  ;;  %s159_s28 = int_to_ptr.vmem [resolvable:$true] %s158_s28 }
  0x24   : > { %s1969_s8 = scalar_lea.vmem %s159_s28, 16  ;;  %p1971_p5 = pneg %p2252_p4 }
  0x25   : > { %p1970_p10 = scmp.ne.s32.totalorder %s159_s28, %s1969_s8  ;;  %p1977_p13 = scmp.lt.s32.totalorder %s159_s28, %s159_s28 }
  0x26   : > { %p1978_p9 = scmp.lt.s32.totalorder %s1969_s8, %s1969_s8 }
  0x27   : > { %p1972_p11 = pnand %p1971_p5, %p1970_p10 }
  0x28   : > { %p1979_p1 = por %p1978_p9, %p1977_p13 }
  0x29   : > { %p1973_p0 = pneg %p1972_p11 }
  0x2b   : > { %p1980_p8 = pnand %p1979_p1, %p1973_p0 }
  0x2d   : > { %1983 = shalt.err (!%p1980_p8)
}
  0x2e   : > { %s2136_s9 = smov [#allocation9]   ;;  %s4236_s5 = smov (%p2257_p6, %s35_s5), 0 }
  0x2f   : > { %1875 = dma.vmem_to_smem (!%p2252_p4), %s159_s28, 16, %s2136_s9, [#allocation6]  }
  0x30   : > { %3844 = sst [smem:[#allocation23_spill]] %s4236_s5  ;;  %s1733_s10 = sshll.u32 %s2262_s7, 6 }
  0x31   : > { %s39_s11 = ssub.s32 %s2130_s16, %s4236_s5  ;;  %s1858_s18 = sshll.u32 %s2130_s16, 10 }
  0x32   : > { %p42_p8 = scmp.eq.s32.totalorder %s39_s11, 0  ;;  %s3845_s0 = sld [smem:[#allocation137_spill]] }
  0x33   : > { %s173_s27 = scalar_lea.vmem [#allocation3], %s1733_s10  ;;  %s170_s6 = scalar_lea.sflag [#allocation4], %s2262_s7 }
  0x34   : > { %s182_s4 = sshll.u32 %s173_s27, 4  ;;  %p1986_p13 = pneg %p2246_p2  ;;  %s2286_s4 = int_to_ptr.vmem [resolvable:$true] %s182_s4 }
  0x35   : > { %s2284_s28 = scalar_select %p42_p8, %s2122_s14, %s44_s20  }
  0x37   : > { %3846 = sst [smem:[#allocation24_spill]] %s2284_s28 }
  0x38   : > { %s2279_s26 = scalar_lea.hbm %s3845_s0, %s1858_s18  ;;  %s1989_s18 = scalar_lea.hbm %s3845_s0, 2048 }
  0x39   : > { %s1984_s8 = scalar_lea.hbm %s2279_s26, 1024  ;;  %p1990_p10 = scmp.lt.u32.totalorder %s2279_s26, %s3845_s0 }
  0x3a   : > { %p1985_p9 = scmp.ne.s32.totalorder %s2279_s26, %s1984_s8  ;;  %p1991_p5 = scmp.lt.u32.totalorder %s1989_s18, %s1984_s8 }
  0x3b   : > { %p1993_p0 = scmp.lt.u32.totalorder %s1984_s8, %s2279_s26 }
  0x3c   : > { %p1987_p4 = pnand %p1986_p13, %p1985_p9  ;;  %p1992_p11 = por %p1991_p5, %p1990_p10 }
  0x3e   : > { %p1988_p6 = pneg %p1987_p4  ;;  %p1994_p1 = por %p1993_p0, %p1992_p11 }
  0x40   : > { %p1995_p8 = pnand %p1994_p1, %p1988_p6 }
  0x42   : > { %1998 = shalt.err (!%p1995_p8)
}
  0x43   : > { %s1999_s20 = scalar_lea.vmem %s2286_s4, 1024  ;;  %s2137_s22 = smov [#allocation3]  }
  0x44   : > { %p2000_p9 = scmp.ne.s32.totalorder %s2286_s4, %s1999_s20  ;;  %s2004_s27 = sshll.u32 %s2137_s22, 4  ;;  %s2005_s27 = int_to_ptr.vmem [resolvable:$false] %s2004_s27 }
  0x45   : > { %s2006_s9 = scalar_lea.vmem %s2005_s27, 2048  ;;  %p2007_p7 = scmp.lt.s32.totalorder %s2286_s4, %s2005_s27 }
  0x46   : > { %p2002_p4 = pnand %p2000_p9, %p1986_p13  ;;  %p2008_p10 = scmp.lt.s32.totalorder %s2006_s9, %s1999_s20 }
  0x48   : > { %p2003_p3 = pneg %p2002_p4  ;;  %p2009_p5 = por %p2008_p10, %p2007_p7 }
  0x4a   : > { %p2010_p11 = pnand %p2009_p5, %p2003_p3 }
  0x4c   : > { %2013 = shalt.err (!%p2010_p11)
}
  0x4d   : > { %s2138_s8 = smov 128   ;;  %s2139_s11 = smov 8  }
  0x4e   : > { %1879 = dma.hbm_to_vmem [thread:$0]  (!%p2246_p2), %s2279_s26, 1024, %s2286_s4, %s170_s6, %s2138_s8, %s2138_s8, %s2139_s11  }
  0x4f   : > { %s1736_s18 = sshll.u32 %s2262_s7, 3  ;;  %s1859_s10 = sshll.u32 %s2130_s16, 7 }
  0x50   : > { %s3847_s1 = sld [smem:[#allocation138_spill]]  ;;  %s196_s27 = scalar_lea.vmem [#allocation7], %s1736_s18 }
  0x51   : > { %s204_s9 = sshll.u32 %s196_s27, 4  ;;  %s193_s0 = scalar_lea.sflag [#allocation8], %s2262_s7  ;;  %s2323_s9 = int_to_ptr.vmem [resolvable:$true] %s204_s9 }
  0x56   : > { %s2321_s22 = scalar_lea.hbm %s3847_s1, %s1859_s10  ;;  %s2019_s6 = scalar_lea.hbm %s3847_s1, 256 }
  0x57   : > { %s2014_s2 = scalar_lea.hbm %s2321_s22, 128  ;;  %p2020_p0 = scmp.lt.u32.totalorder %s2321_s22, %s3847_s1 }
  0x58   : > { %p2015_p3 = scmp.ne.s32.totalorder %s2321_s22, %s2014_s2  ;;  %p2021_p1 = scmp.lt.u32.totalorder %s2019_s6, %s2014_s2 }
  0x59   : > { %p2023_p9 = scmp.lt.u32.totalorder %s2014_s2, %s2321_s22 }
  0x5a   : > { %p2017_p7 = pnand %p2015_p3, %p1986_p13  ;;  %p2022_p8 = por %p2021_p1, %p2020_p0 }
  0x5c   : > { %p2018_p6 = pneg %p2017_p7  ;;  %p2024_p4 = por %p2023_p9, %p2022_p8 }
  0x5e   : > { %p2025_p10 = pnand %p2024_p4, %p2018_p6 }
  0x60   : > { %2028 = shalt.err (!%p2025_p10)
}
  0x61   : > { %s2029_s18 = scalar_lea.vmem %s2323_s9, 128  ;;  %s2140_s10 = smov [#allocation7]  }
  0x62   : > { %p2030_p5 = scmp.ne.s32.totalorder %s2323_s9, %s2029_s18  ;;  %s2034_s19 = sshll.u32 %s2140_s10, 4  ;;  %s2035_s19 = int_to_ptr.vmem [resolvable:$false] %s2034_s19 }
  0x63   : > { %s2036_s20 = scalar_lea.vmem %s2035_s19, 256  ;;  %p2037_p7 = scmp.lt.s32.totalorder %s2323_s9, %s2035_s19 }
  0x64   : > { %p2032_p11 = pnand %p2030_p5, %p1986_p13  ;;  %p2038_p0 = scmp.lt.s32.totalorder %s2036_s20, %s2029_s18 }
  0x66   : > { %p2033_p3 = pneg %p2032_p11  ;;  %p2039_p1 = por %p2038_p0, %p2037_p7 }
  0x68   : > { %p2040_p8 = pnand %p2039_p1, %p2033_p3 }
  0x6a   : > { %2043 = shalt.err (!%p2040_p8)
}
  0x6b   : > { %s2141_s2 = smov 32   ;;  %s2142_s27 = smov 2  }
  0x6c   : > { %1882 = dma.hbm_to_vmem [thread:$0]  (!%p2246_p2), %s2321_s22, 128, %s2323_s9, %s193_s0, %s2141_s2, %s2141_s2, %s2142_s27  }
  0x6d   : > { %216 = sbr.rel (%p2236_p12) target bundleno = 660 (0x294), region = 32 }
  0x74   : > { %s2354_s26 = sand.u32 1, %s2118_s13   ;;  %p3849_p13 = scmp.ne.s32.totalorder %s3834_s23, 0 }
  0x75   : > { %3848 = sst [smem:[#allocation25_spill]] %s2354_s26  ;;  %s1740_s4 = sshll.u32 %s2354_s26, 6 }
  0x76   : > { %s219_s6 = scalar_lea.sflag [#allocation4], %s2354_s26  ;;  %s2358_s8 = scalar_lea.vmem [#allocation3], %s1740_s4 }
  0x77   : > { %2097 = dma.done.wait (%p3849_p13), %s219_s6, 1024  }
  0x78   : > { %2099 = vsyncadd (%p3849_p13), %s219_s6, 4294966272  ;;  %s1741_s0 = sshll.u32 %s2354_s26, 3  ;;  %s228_s29 = scalar_lea.sflag [#allocation8], %s2354_s26 }
  0x79   : > { %s2366_s30 = scalar_lea.vmem [#allocation7], %s1741_s0 }
  0x7a   : > { %2101 = dma.done.wait (%p3849_p13), %s228_s29, 128  }
  0x7b   : > { %2103 = vsyncadd (%p3849_p13), %s228_s29, 4294967168  ;;  %p3850_p12 = scmp.ne.s32.totalorder %s3832_s21, 0 }
  0x7d   : > { %2105 = dma.done.wait (%p3850_p12), [#allocation6], 16  }
  0x7e   : > { %2107 = vsyncadd (%p3850_p12), [#allocation6], 4294967280 }
  0x7f   : > { %240 = sfence }
  0x80   : > { %v266_v0 = vld [vmem:[%s2358_s8] sm:$0xff]  ;;  %vm275_vm0 = vcmask 130048   ;;  %vm288_vm1 = vcmask 122880   ;;  %v267_v2 = vld [vmem:[%s2358_s8 + $0x8] sm:$0xff]  ;;  %v268_v4 = vld [vmem:[%s2358_s8 + $0x10] sm:$0xff]  ;;  %v2143_v8 = vmov 1  }
  0x81   : > { %v284_v1 = vld [vmem:[%s2366_s30] sm:$0x1]  ;;  %276 = vst.msk [vmem:[#allocation2 + $0x61] sm:$0xff] %vm275_vm0, %v266_v0  ;;  %v293_v3 = vld [vmem:[%s2366_s30 + $0x1] sm:$0x1]  ;;  %277 = vst.msk [vmem:[#allocation2 + $0x69] sm:$0xff] %vm275_vm0, %v267_v2  ;;  %1952 = vset.pattern.permute.xlu1 %v2143_v8  ;;  %1951 = vset.pattern.permute.xlu0 %v2143_v8 }
  0x82   : > { %289 = vst.msk [vmem:[#allocation2 + $0x60] sm:$0x1] %vm288_vm1, %v284_v1  ;;  %297 = vst.msk [vmem:[#allocation2 + $0x71] sm:$0x1] %vm288_vm1, %v293_v3  ;;  %v269_v5 = vld [vmem:[%s2358_s8 + $0x18] sm:$0xff]  ;;  %v270_v7 = vld [vmem:[%s2358_s8 + $0x20] sm:$0xff] }
  0x83   : > { %278 = vst.msk [vmem:[#allocation2 + $0x79] sm:$0xff] %vm275_vm0, %v268_v4  ;;  %v285_v6 = vld [vmem:[%s2366_s30 + $0x2] sm:$0x1]  ;;  %279 = vst.msk [vmem:[#allocation2 + $0x81] sm:$0xff] %vm275_vm0, %v269_v5  ;;  %v286_v9 = vld [vmem:[%s2366_s30 + $0x4] sm:$0x1] }
  0x84   : > { %290 = vst.msk [vmem:[#allocation2 + $0x78] sm:$0x1] %vm288_vm1, %v285_v6  ;;  %v294_v10 = vld [vmem:[%s2366_s30 + $0x3] sm:$0x1]  ;;  %291 = vst.msk [vmem:[#allocation2 + $0x90] sm:$0x1] %vm288_vm1, %v286_v9 }
  0x85   : > { %280 = vst.msk [vmem:[#allocation2 + $0x91] sm:$0xff] %vm275_vm0, %v270_v7  ;;  %v271_v11 = vld [vmem:[%s2358_s8 + $0x28] sm:$0xff]  ;;  %v272_v13 = vld [vmem:[%s2358_s8 + $0x30] sm:$0xff]  ;;  %v273_v14 = vld [vmem:[%s2358_s8 + $0x38] sm:$0xff]  ;;  %s2144_s21 = smov 16   ;;  %v2145_v29 = vmov 14  }
  0x86   : > { %298 = vst.msk [vmem:[#allocation2 + $0x89] sm:$0x1] %vm288_vm1, %v294_v10  ;;  %v295_v12 = vld [vmem:[%s2366_s30 + $0x5] sm:$0x1]  ;;  %v287_v15 = vld [vmem:[%s2366_s30 + $0x6] sm:$0x1] }
  0x87   : > { %281 = vst.msk [vmem:[#allocation2 + $0x99] sm:$0xff] %vm275_vm0, %v271_v11  ;;  %282 = vst.msk [vmem:[#allocation2 + $0xa9] sm:$0xff] %vm275_vm0, %v272_v13  ;;  %v296_v16 = vld [vmem:[%s2366_s30 + $0x7] sm:$0x1]  ;;  %vm315_vm2 = vcmask 1047680   ;;  %s2146_s23 = smov 113  }
  0x88   : > { %299 = vst.msk [vmem:[#allocation2 + $0xa1] sm:$0x1] %vm288_vm1, %v295_v12  ;;  %292 = vst.msk [vmem:[#allocation2 + $0xa8] sm:$0x1] %vm288_vm1, %v287_v15  ;;  %v2418_v19 = vld [vmem:[#allocation2 + $0x68] sm:$0xff]  ;;  %s2147_s7 = smov 127  }
  0x89   : > { %283 = vst.msk [vmem:[#allocation2 + $0xb1] sm:$0xff] %vm275_vm0, %v273_v14  ;;  %v2410_v17 = vld [vmem:[#allocation2 + $0x60] sm:$0xff]  ;;  %v2414_v18 = vld [vmem:[#allocation2 + $0x70] sm:$0x3]  ;;  %s2597_s22 = sld [smem:[#allocation9]]  ;;  %s2599_s9 = sld [smem:[#allocation9 + $0x1]] }
  0x8a   : > { %300 = vst.msk [vmem:[#allocation2 + $0xb9] sm:$0x1] %vm288_vm1, %v296_v16  ;;  %316 = vrot.lane.b32.xlu0 %v2410_v17, %s2144_s21  ;;  %322 = vrot.lane.b32.xlu1 %v2414_v18, %s2144_s21  ;;  %v2424_v21 = vld [vmem:[#allocation2 + $0x80] sm:$0xff]  ;;  %s2601_s11 = sld [smem:[#allocation9 + $0x24]]  ;;  %s2603_s18 = sld [smem:[#allocation9 + $0x25]]  ;;  %vm511_vm4 = vcmask 123904  }
  0x8b   : > { %v2420_v20 = vld [vmem:[#allocation2 + $0x78] sm:$0xff]  ;;  %s2605_s10 = sld [smem:[#allocation9 + $0x48]]  ;;  %s2607_s19 = sld [smem:[#allocation9 + $0x49]] }
  0x8c   : > { %v2432_v23 = vld [vmem:[#allocation2 + $0x90] sm:$0xff]  ;;  %s2609_s20 = sld [smem:[#allocation9 + $0x3]]  ;;  %s2611_s2 = sld [smem:[#allocation9 + $0x4]] }
  0x8d   : > { %v2428_v22 = vld [vmem:[#allocation2 + $0x88] sm:$0x3]  ;;  %s2613_s27 = sld [smem:[#allocation9 + $0x6]]  ;;  %s2615_s4 = sld [smem:[#allocation9 + $0x7]] }
  0x8e   : > { %319 = vrot.lane.b32.xlu0 %v2418_v19, %s2144_s21  ;;  %325 = vrot.lane.b32.xlu1 %v2420_v20, %s2144_s21  ;;  %v2436_v24 = vld [vmem:[#allocation2 + $0x98] sm:$0xff]  ;;  %s2617_s6 = sld [smem:[#allocation9 + $0x27]]  ;;  %s2619_s8 = sld [smem:[#allocation9 + $0x28]] }
  0x8f   : > { %v2440_v25 = vld [vmem:[#allocation2 + $0xa0] sm:$0x3]  ;;  %v2444_v26 = vld [vmem:[#allocation2 + $0xa8] sm:$0xff]  ;;  %3851 = sst [smem:[#allocation26_spill]] %s2597_s22  ;;  %s2621_s0 = sld [smem:[#allocation9 + $0x2a]] }
  0x90   : > { %v2448_v27 = vld [vmem:[#allocation2 + $0xb0] sm:$0xff]  ;;  %3852 = sst [smem:[#allocation27_spill]] %s2601_s11  ;;  %s2623_s29 = sld [smem:[#allocation9 + $0x2b]] }
  0x91   : > { %v2452_v28 = vld [vmem:[#allocation2 + $0xb8] sm:$0x3]  ;;  %3853 = sst [smem:[#allocation28_spill]] %s2605_s10  ;;  %s2625_s30 = sld [smem:[#allocation9 + $0x4b]] }
  0x92   : > { %328 = vrot.lane.b32.xlu0 %v2424_v21, %s2144_s21  ;;  %331 = vrot.lane.b32.xlu1 %v2428_v22, %s2144_s21  ;;  %3854 = sst [smem:[#allocation29_spill]] %s2609_s20  ;;  %s2633_s1 = sld [smem:[#allocation9 + $0x2]] }
  0x93   : > { %3855 = sst [smem:[#allocation30_spill]] %s2613_s27  ;;  %s2635_s5 = sld [smem:[#allocation9 + $0x26]] }
  0x94   : > { %3856 = sst [smem:[#allocation31_spill]] %s2617_s6  ;;  %s2637_s16 = sld [smem:[#allocation9 + $0x4a]] }
  0x95   : > { %3857 = sst [smem:[#allocation32_spill]] %s2621_s0  ;;  %s2639_s28 = sld [smem:[#allocation9 + $0x5]] }
  0x96   : > { %334 = vrot.lane.b32.xlu0 %v2432_v23, %s2144_s21  ;;  %337 = vrot.lane.b32.xlu1 %v2436_v24, %s2144_s21  ;;  %s2643_s14 = sld [smem:[#allocation9 + $0x8]]  ;;  %s2645_s13 = sld [smem:[#allocation9 + $0x29]] }
  0x97   : > { %3858 = sst [smem:[#allocation33_spill]] %s2625_s30  ;;  %s2647_s17 = sld [smem:[#allocation9 + $0x2c]] }
  0x98   : > { %s2649_s25 = sld [smem:[#allocation9 + $0x4d]]  ;;  %s2653_s12 = sld [smem:[#allocation9 + $0x50]] }
  0x99   : > { %s2655_s3 = sld [smem:[#allocation9 + $0x9]]  ;;  %s2658_s24 = sld [smem:[#allocation9 + $0xa]] }
  0x9a   : > { %340 = vrot.lane.b32.xlu0 %v2440_v25, %s2144_s21  ;;  %343 = vrot.lane.b32.xlu1 %v2444_v26, %s2144_s21  ;;  %3860 = sst [smem:[#allocation35_spill]] %s2637_s16  ;;  %s2660_s15 = sld [smem:[#allocation9 + $0x2d]] }
  0x9b   : > { %3861 = sst [smem:[#allocation36_spill]] %s2639_s28  ;;  %s2667_s26 = sld [smem:[#allocation9 + $0x2e]] }
  0x9c   : > { %3862 = sst [smem:[#allocation37_spill]] %s2643_s14  ;;  %s2691_s11 = sld [smem:[#allocation9 + $0xd]] }
  0x9d   : > { %3863 = sst [smem:[#allocation38_spill]] %s2645_s13  ;;  %s2705_s10 = sld [smem:[#allocation9 + $0x30]] }
  0x9e   : > { %346 = vrot.lane.b32.xlu0 %v2448_v27, %s2144_s21  ;;  %349 = vrot.lane.b32.xlu1 %v2452_v28, %s2144_s21  ;;  %3864 = sst [smem:[#allocation39_spill]] %s2647_s17  ;;  %s2712_s20 = sld [smem:[#allocation9 + $0x31]] }
  0x9f   : > { %3865 = sst [smem:[#allocation40_spill]] %s2649_s25  ;;  %s2722_s22 = sld [smem:[#allocation9 + $0x34]] }
  0xa0   : > { %3866 = sst [smem:[#allocation41_spill]] %s2653_s12  ;;  %s2747_s0 = sld [smem:[#allocation9 + $0xb]] }
  0xa1   : > { %3867 = sst [smem:[#allocation42_spill]] %s2655_s3  ;;  %s2767_s30 = sld [smem:[#allocation9 + $0xe]] }
  0xa2   : > { %391 = vperm.xlu0 %1951, %v2410_v17   ;;  %396 = vperm.xlu1 %1952, %v2418_v19   ;;  %3868 = sst [smem:[#allocation43_spill]] %s2660_s15  ;;  %s2761_s27 = sld [smem:[#allocation9 + $0x53]] }
  0xa3   : > { %3872 = sst [smem:[#allocation47_spill]] %s2705_s10  ;;  %s2769_s6 = sld [smem:[#allocation9 + $0x11]] }
  0xa4   : > { %s2785_s16 = sld [smem:[#allocation9 + $0x59]]  ;;  %s2807_s3 = sld [smem:[#allocation9 + $0x36]] }
  0xa5   : > { %s2809_s15 = sld [smem:[#allocation9 + $0x37]]  ;;  %s2822_s12 = sld [smem:[#allocation9 + $0x5b]] }
  0xa6   : > { %406 = vperm.xlu0 %1951, %v2420_v20   ;;  %401 = vperm.xlu1 %1952, %v2414_v18   ;;  %3876 = sst [smem:[#allocation51_spill]] %s2747_s0  ;;  %s2777_s0 = sld [smem:[#allocation9 + $0x35]] }
  0xa7   : > { %s2854_s10 = sld [smem:[#allocation9 + $0x3a]]  ;;  %s2881_s17 = sld [smem:[#allocation9 + $0x5e]] }
  0xa8   : > { %3878 = sst [smem:[#allocation53_spill]] %s2761_s27  ;;  %s2888_s14 = sld [smem:[#allocation9 + $0x60]] }
  0xa9   : > { %3879 = sst [smem:[#allocation54_spill]] %s2769_s6  ;;  %s2890_s25 = sld [smem:[#allocation9 + $0x61]] }
  0xaa   : > { %416 = vperm.xlu0 %1951, %v2428_v22   ;;  %411 = vperm.xlu1 %1952, %v2424_v21   ;;  %3881 = sst [smem:[#allocation56_spill]] %s2785_s16  ;;  %s2896_s13 = sld [smem:[#allocation9 + $0x14]] }
  0xab   : > { %3886 = sst [smem:[#allocation61_spill]] %s2807_s3  ;;  %s2898_s28 = sld [smem:[#allocation9 + $0x38]] }
  0xac   : > { %3880 = sst [smem:[#allocation55_spill]] %s2777_s0  ;;  %s2907_s27 = sld [smem:[#allocation9 + $0x17]] }
  0xad   : > { %s2916_s6 = sld [smem:[#allocation9 + $0x3b]]  ;;  %s2936_s3 = sld [smem:[#allocation9 + $0x1c]] }
  0xae   : > { %426 = vperm.xlu0 %1951, %v2436_v24   ;;  %421 = vperm.xlu1 %1952, %v2432_v23   ;;  %3914 = sst [smem:[#allocation84_spill]] %s2888_s14  ;;  %s3005_s14 = sld [smem:[#allocation9 + $0x46]] }
  0xaf   : > { %s3014_s16 = sld [smem:[#allocation9 + $0x42]] }
  0xb0   : > { %3915 = sst [smem:[#allocation85_spill]] %s2896_s13  ;;  %s3016_s0 = sld [smem:[#allocation9 + $0x6a]] }
  0xb1   : > { %3916 = sst [smem:[#allocation86_spill]] %s2898_s28  ;;  %s3028_s28 = sld [smem:[#allocation9 + $0x66]] }
  0xb2   : > { %431 = vperm.xlu0 %1951, %v2440_v25   ;;  %1953 = vset.pattern.permute.xlu1 %v2145_v29  ;;  %s3036_s13 = sld [smem:[#allocation9 + $0x69]] }
  0xb3   : > { %524 = vperm.xlu1 %1953, %v2410_v17  }
  0xb5   : > { %3941 = sst [smem:[#allocation111_spill]] %s3014_s16  ;;  %s3962_s16 = sld [smem:[#allocation29_spill]] }
  0xb7   : > { %532 = vperm.xlu1 %1953, %v2414_v18   ;;  %3943 = sst [smem:[#allocation113_spill]] %s3028_s28  ;;  %s3967_s28 = sld [smem:[#allocation30_spill]] }
  0xb8   : > { %3944 = sst [smem:[#allocation114_spill]] %s3036_s13  ;;  %s3971_s13 = sld [smem:[#allocation32_spill]] }
  0xbb   : > { %536 = vperm.xlu1 %1953, %v2420_v20  }
  0xbf   : > { %548 = vperm.xlu1 %1953, %v2432_v23  }
  0xc3   : > { %552 = vperm.xlu1 %1953, %v2436_v24  }
  0xc7   : > { %556 = vperm.xlu1 %1953, %v2440_v25  }
  0xcb   : > { %1954 = vset.pattern.permute.xlu1 %v2143_v8 }
  0xfc   : > { %v317_v30 = vpop.permute.xlu0 %316  ;;  %v323_v32 = vpop.permute.xlu1 %322 }
  0xfd   : > { %v318_v31 = vsel %vm315_vm2, %v317_v30, %v2410_v17  ;;  %v324_v33 = vsel %vm315_vm2, %v323_v32, %v2414_v18 }
  0xfe   : > { %352 = vrot.lane.b32.xlu0 %v318_v31, %s2144_s21 }
 0x100   : > { %v320_v34 = vpop.permute.xlu0 %319  ;;  %v326_v36 = vpop.permute.xlu1 %325 }
 0x101   : > { %v321_v35 = vsel %vm315_vm2, %v320_v34, %v2418_v19  ;;  %v327_v37 = vsel %vm315_vm2, %v326_v36, %v2420_v20  ;;  %v758_v36 = vstv %s2603_s18  ;;  %s2679_s18 = sld [smem:[#allocation9 + $0x52]] }
 0x102   : > { %356 = vrot.lane.b32.xlu0 %v324_v33, %s2144_s21  ;;  %354 = vrot.lane.b32.xlu1 %v321_v35, %s2144_s21 }
 0x104   : > { %v329_v38 = vpop.permute.xlu0 %328  ;;  %v332_v40 = vpop.permute.xlu1 %331 }
 0x105   : > { %v330_v39 = vsel %vm315_vm2, %v329_v38, %v2424_v21  ;;  %v333_v41 = vsel %vm315_vm2, %v332_v40, %v2428_v22 }
 0x106   : > { %360 = vrot.lane.b32.xlu0 %v330_v39, %s2144_s21  ;;  %358 = vrot.lane.b32.xlu1 %v327_v37, %s2144_s21  ;;  %v767_v37 = vstv %s2607_s19  ;;  %s2681_s19 = sld [smem:[#allocation9 + $0xc]] }
 0x108   : > { %v335_v42 = vpop.permute.xlu0 %334  ;;  %v338_v44 = vpop.permute.xlu1 %337 }
 0x109   : > { %v336_v43 = vsel %vm315_vm2, %v335_v42, %v2432_v23  ;;  %v339_v45 = vsel %vm315_vm2, %v338_v44, %v2436_v24  ;;  %v779_v44 = vld [vmem:[#allocation2 + $0x61] sm:$0xff] }
 0x10a   : > { %364 = vrot.lane.b32.xlu0 %v336_v43, %s2144_s21  ;;  %362 = vrot.lane.b32.xlu1 %v333_v41, %s2144_s21  ;;  %v2676_v43 = vmul.f32 %v758_v36, %v2410_v17  ;;  %v1319_v42 = vld [vmem:[#allocation2 + $0x82] sm:$0xff] }
 0x10c   : > { %v341_v46 = vpop.permute.xlu0 %340  ;;  %v344_v48 = vpop.permute.xlu1 %343  ;;  %3870 = sst [smem:[#allocation45_spill]] %s2681_s19 }
 0x10d   : > { %v342_v47 = vsel %vm315_vm2, %v341_v46, %v2440_v25  ;;  %v345_v49 = vsel %vm315_vm2, %v344_v48, %v2444_v26  ;;  %v815_v48 = vld [vmem:[#allocation2 + $0x62] sm:$0xff] }
 0x10e   : > { %368 = vrot.lane.b32.xlu0 %v342_v47, %s2144_s21  ;;  %366 = vrot.lane.b32.xlu1 %v339_v45, %s2144_s21  ;;  %v785_v45 = vstv %s2611_s2  ;;  %v2685_v47 = vmul.f32 %v767_v37, %v2410_v17  ;;  %s2693_s2 = sld [smem:[#allocation9 + $0xf]] }
 0x110   : > { %v347_v50 = vpop.permute.xlu0 %346  ;;  %v350_v52 = vpop.permute.xlu1 %349 }
 0x111   : > { %v348_v51 = vsel %vm315_vm2, %v347_v50, %v2448_v27  ;;  %v351_v53 = vsel %vm315_vm2, %v350_v52, %v2452_v28 }
 0x112   : > { %372 = vrot.lane.b32.xlu0 %v348_v51, %s2144_s21  ;;  %370 = vrot.lane.b32.xlu1 %v345_v49, %s2144_s21  ;;  %v821_v49 = vstv %s2615_s4  ;;  %v1211_v51 = vld [vmem:[#allocation2 + $0x69] sm:$0xff]  ;;  %s2703_s4 = sld [smem:[#allocation9 + $0x10]] }
 0x114   : > { %3871 = sst [smem:[#allocation46_spill]] %s2693_s2  ;;  %s2724_s2 = sld [smem:[#allocation9 + $0x54]] }
 0x116   : > { %441 = vperm.xlu0 %1951, %v2448_v27   ;;  %374 = vrot.lane.b32.xlu1 %v351_v53, %s2144_s21  ;;  %s2627_s21 = sld [smem:[#allocation9 + $0x4c]]  ;;  %v794_v53 = vstv %s2619_s8  ;;  %s2714_s8 = sld [smem:[#allocation9 + $0x33]] }
 0x11a   : > { %1955 = vset.pattern.permute.xlu0 %v2145_v29  ;;  %436 = vperm.xlu1 %1954, %v2444_v26   ;;  %3874 = sst [smem:[#allocation49_spill]] %s2724_s2  ;;  %s2869_s2 = sld [smem:[#allocation9 + $0x3d]] }
 0x11b   : > { %528 = vperm.xlu0 %1955, %v2418_v19  }
 0x11c   : > { %3873 = sst [smem:[#allocation48_spill]] %s2714_s8  ;;  %s2867_s8 = sld [smem:[#allocation9 + $0x3c]] }
 0x11e   : > { %446 = vperm.xlu1 %1954, %v2452_v28  }
 0x11f   : > { %540 = vperm.xlu0 %1955, %v2424_v21  }
 0x121   : > { %v2519_v54 = vpop.permute.xlu1 %396  ;;  %v2529_v59 = vpop.permute.xlu0 %391 }
 0x122   : > { %1956 = vset.pattern.permute.xlu1 %v2145_v29 }
 0x123   : > { %544 = vperm.xlu0 %1955, %v2428_v22   ;;  %564 = vperm.xlu1 %1956, %v2448_v27  }
 0x125   : > { %v2521_v55 = vpop.permute.xlu1 %401  ;;  %v2533_v61 = vpop.permute.xlu0 %406 }
 0x127   : > { %560 = vperm.xlu0 %1955, %v2444_v26  }
 0x129   : > { %v2523_v56 = vpop.permute.xlu1 %411  ;;  %v2537_v63 = vpop.permute.xlu0 %416 }
 0x12b   : > { %568 = vperm.xlu0 %1955, %v2452_v28  }
 0x12d   : > { %v2525_v57 = vpop.permute.xlu1 %421  ;;  %v2541_v1 = vpop.permute.xlu0 %426 }
 0x131   : > { %v2545_v3 = vpop.permute.xlu0 %431 }
 0x132   : > { %v2527_v58 = vpop.permute.xlu1 %524 }
 0x136   : > { %v2531_v60 = vpop.permute.xlu1 %532 }
 0x13a   : > { %v2535_v62 = vpop.permute.xlu1 %536 }
 0x13e   : > { %v2539_v0 = vpop.permute.xlu1 %548 }
 0x142   : > { %v2543_v2 = vpop.permute.xlu1 %552 }
 0x146   : > { %v2547_v4 = vpop.permute.xlu1 %556 }
 0x170   : > { %v353_v5 = vpop.permute.xlu0 %352 }
 0x171   : > { %v376_v6 = vsel %vm315_vm2, %v353_v5, %v2410_v17  ;;  %v2698_v5 = vmul.f32 %v758_v36, %v2418_v19  ;;  %v857_v36 = vstv %s2658_s24  ;;  %s2783_s24 = sld [smem:[#allocation9 + $0x56]] }
 0x172   : > { %461 = vrot.lane.b32.xlu1 %v376_v6, %s2146_s23 }
 0x174   : > { %v355_v7 = vpop.permute.xlu1 %354  ;;  %v357_v8 = vpop.permute.xlu0 %356 }
 0x175   : > { %v377_v9 = vsel %vm315_vm2, %v355_v7, %v2418_v19  ;;  %v378_v10 = vsel %vm315_vm2, %v357_v8, %v2414_v18  ;;  %v2707_v7 = vmul.f32 %v785_v45, %v779_v44  ;;  %v803_v8 = vstv %s2627_s21  ;;  %s2737_s21 = sld [smem:[#allocation9 + $0x57]] }
 0x176   : > { %463 = vrot.lane.b32.xlu0 %v377_v9, %s2146_s23  ;;  %465 = vrot.lane.b32.xlu1 %v378_v10, %s2146_s23 }
 0x178   : > { %v359_v11 = vpop.permute.xlu1 %358  ;;  %v361_v14 = vpop.permute.xlu0 %360 }
 0x179   : > { %v379_v12 = vsel %vm315_vm2, %v359_v11, %v2420_v20  ;;  %v380_v16 = vsel %vm315_vm2, %v361_v14, %v2424_v21  ;;  %v1292_v11 = vld [vmem:[#allocation2 + $0x81] sm:$0xff] }
 0x17a   : > { %573 = vrot.lane.b32.xlu0 %v377_v9, %s2147_s7  ;;  %571 = vrot.lane.b32.xlu1 %v376_v6, %s2147_s7  ;;  %v1238_v6 = vld [vmem:[#allocation2 + $0x6a] sm:$0xff] }
 0x17b   : > { %3875 = sst [smem:[#allocation50_spill]] %s2737_s21  ;;  %s2879_s21 = sld [smem:[#allocation9 + $0x5d]] }
 0x17c   : > { %v363_v13 = vpop.permute.xlu1 %362  ;;  %v365_v18 = vpop.permute.xlu0 %364 }
 0x17d   : > { %v381_v15 = vsel %vm315_vm2, %v363_v13, %v2428_v22  ;;  %v382_v29 = vsel %vm315_vm2, %v365_v18, %v2432_v23  ;;  %v2720_v13 = vmul.f32 %v1211_v51, %v785_v45  ;;  %v2731_v18 = vmul.f32 %v1211_v51, %v794_v53 }
 0x17e   : > { %467 = vrot.lane.b32.xlu0 %v379_v12, %s2146_s23  ;;  %575 = vrot.lane.b32.xlu1 %v378_v10, %s2147_s7  ;;  %v830_v10 = vstv %s2623_s29  ;;  %s2735_s29 = sld [smem:[#allocation9 + $0x55]]  ;;  %v866_v45 = vstv %s2667_s26  ;;  %s2795_s26 = sld [smem:[#allocation9 + $0x12]] }
 0x180   : > { %v367_v30 = vpop.permute.xlu1 %366  ;;  %v369_v31 = vpop.permute.xlu0 %368 }
 0x181   : > { %v383_v22 = vsel %vm315_vm2, %v367_v30, %v2436_v24  ;;  %v384_v32 = vsel %vm315_vm2, %v369_v31, %v2440_v25  ;;  %v2740_v31 = vmul.f32 %v803_v8, %v779_v44  ;;  %v2829_v30 = vmul.f32 %v866_v45, %v2424_v21 }
 0x182   : > { %471 = vrot.lane.b32.xlu0 %v381_v15, %s2146_s23  ;;  %469 = vrot.lane.b32.xlu1 %v380_v16, %s2146_s23 }
 0x183   : > { %3892 = vst [vmem:[#allocation66_spill] sm:$0xff] %v2829_v30 }
 0x184   : > { %v371_v33 = vpop.permute.xlu1 %370  ;;  %v373_v35 = vpop.permute.xlu0 %372  ;;  %3883 = sst [smem:[#allocation58_spill]] %s2795_s26  ;;  %s2938_s26 = sld [smem:[#allocation9 + $0x40]] }
 0x185   : > { %v385_v23 = vsel %vm315_vm2, %v371_v33, %v2444_v26  ;;  %v386_v25 = vsel %vm315_vm2, %v373_v35, %v2448_v27  ;;  %v313_v27 = vlaneseq  ;;  %v2755_v35 = vmul.f32 %v1238_v6, %v830_v10 }
 0x186   : > { %579 = vrot.lane.b32.xlu0 %v380_v16, %s2147_s7  ;;  %577 = vrot.lane.b32.xlu1 %v379_v12, %s2147_s7  ;;  %v911_v16 = vstv %s2735_s29  ;;  %s2844_s29 = sld [smem:[#allocation9 + $0x19]] }
 0x187   : > { %v2664_v39 = vand.u32 127, %v313_v27 }
 0x188   : > { %v375_v34 = vpop.permute.xlu1 %374 }
 0x189   : > { %v387_v24 = vsel %vm315_vm2, %v375_v34, %v2452_v28  ;;  %v749_v28 = vstv %s2599_s9  ;;  %s2669_s9 = sld [smem:[#allocation9 + $0x51]]  ;;  %v2753_v34 = vmul.f32 %v1211_v51, %v803_v8  ;;  %v923_v51 = vld [vmem:[#allocation2 + $0x7a] sm:$0xff]  ;;  %vm388_vm3 = vcmp.eq.s32.totalorder %v2664_v39, 0 }
 0x18a   : > { %581 = vrot.lane.b32.xlu0 %v381_v15, %s2147_s7  ;;  %473 = vrot.lane.b32.xlu1 %v382_v29, %s2146_s23  ;;  %v2672_v41 = vmul.f32 %v749_v28, %v2410_v17  ;;  %v2689_v50 = vmul.f32 %v749_v28, %v2418_v19  ;;  %v2701_v17 = vmul.f32 %v767_v37, %v2418_v19  ;;  %v887_v37 = vld [vmem:[#allocation2 + $0x79] sm:$0xff]  ;;  %v929_v28 = vstv %s2703_s4  ;;  %s2831_s4 = sld [smem:[#allocation9 + $0x15]] }
 0x18b   : > { %v2717_v19 = vmul.f32 %v821_v49, %v815_v48  ;;  %v2728_v15 = vmul.f32 %v794_v53, %v779_v44  ;;  %v2818_v53 = vmul.f32 %v857_v36, %v2424_v21  ;;  %v2837_v52 = vmul.f32 %v929_v28, %v923_v51 }
 0x18c   : > { %vm522_vm5 = vcmp.eq.s32.totalorder %v2664_v39, 15 }
 0x18d   : > { %3889 = vst [vmem:[#allocation63_spill] sm:$0xff] %v2818_v53  ;;  %3894 = vst [vmem:[#allocation68_spill] sm:$0xff] %v2837_v52 }
 0x18e   : > { %475 = vrot.lane.b32.xlu0 %v383_v22, %s2146_s23  ;;  %477 = vrot.lane.b32.xlu1 %v384_v32, %s2146_s23 }
 0x18f   : > { %3869 = sst [smem:[#allocation44_spill]] %s2669_s9  ;;  %s2820_s9 = sld [smem:[#allocation9 + $0x5a]] }
 0x190   : > { %3893 = sst [smem:[#allocation67_spill]] %s2831_s4  ;;  %s2959_s4 = sld [smem:[#allocation9 + $0x1f]] }
 0x192   : > { %583 = vrot.lane.b32.xlu0 %v382_v29, %s2147_s7  ;;  %585 = vrot.lane.b32.xlu1 %v383_v22, %s2147_s7  ;;  %v2733_v29 = vmul.f32 %v1238_v6, %v821_v49  ;;  %v2742_v22 = vmul.f32 %v830_v10, %v815_v48  ;;  %v893_v49 = vstv %s2691_s11  ;;  %s3901_s11 = sld [smem:[#allocation51_spill]] }
 0x193   : > { %v2865_v40 = vmul.f32 %v1292_v11, %v893_v49  ;;  %3907 = sst [smem:[#allocation51_spill]] %s2867_s8  ;;  %s2980_s8 = sld [smem:[#allocation9 + $0x1e]] }
 0x195   : > { %v2641_v26 = vpop.permute.xlu0 %441  ;;  %3890 = sst [smem:[#allocation64_spill]] %s2820_s9  ;;  %3906 = vst [vmem:[#allocation78_spill] sm:$0xff] %v2865_v40  ;;  %s2949_s9 = sld [smem:[#allocation9 + $0x1b]] }
 0x196   : > { %479 = vrot.lane.b32.xlu0 %v385_v23, %s2146_s23  ;;  %587 = vrot.lane.b32.xlu1 %v384_v32, %s2147_s7  ;;  %v938_v32 = vstv %s2722_s22  ;;  %s2833_s22 = sld [smem:[#allocation9 + $0x16]] }
 0x197   : > { %v2850_v53 = vmul.f32 %v938_v32, %v923_v51 }
 0x199   : > { %v2749_v33 = vpop.permute.xlu1 %436  ;;  %3898 = vst [vmem:[#allocation72_spill] sm:$0xff] %v2850_v53  ;;  %v1046_v53 = vstv %s2869_s2  ;;  %s2969_s2 = sld [smem:[#allocation9 + $0x63]]  ;;  %3931 = sst [smem:[#allocation101_spill]] %s2980_s8 }
 0x19a   : > { %483 = vrot.lane.b32.xlu0 %v387_v24, %s2146_s23  ;;  %481 = vrot.lane.b32.xlu1 %v386_v25, %s2146_s23  ;;  %s2629_s23 = sld [smem:[#allocation9 + $0x4e]]  ;;  %v2662_v38 = vpop.permute.xlu0 %528  ;;  %s3963_s8 = sld [smem:[#allocation31_spill]] }
 0x19d   : > { %v2811_v44 = vpop.permute.xlu1 %446 }
 0x19e   : > { %591 = vrot.lane.b32.xlu0 %v386_v25, %s2147_s7  ;;  %589 = vrot.lane.b32.xlu1 %v385_v23, %s2147_s7  ;;  %v2726_v14 = vpop.permute.xlu0 %540  ;;  %3887 = vst [vmem:[#allocation62_spill] sm:$0xff] %v2811_v44  ;;  %v902_v25 = vstv %s2712_s20  ;;  %s2842_s20 = sld [smem:[#allocation9 + $0x18]] }
 0x19f   : > { %v2871_v30 = vmul.f32 %v1292_v11, %v902_v25  ;;  %3929 = sst [smem:[#allocation99_spill]] %s2969_s2  ;;  %s3079_s2 = sld [smem:[#allocation9 + $0x44]] }
 0x1a0   : > { %3859 = sst [smem:[#allocation34_spill]] %s2629_s23  ;;  %s2759_s23 = sld [smem:[#allocation9 + $0x2f]] }
 0x1a1   : > { %3908 = vst [vmem:[#allocation79_spill] sm:$0xff] %v2871_v30 }
 0x1a2   : > { %593 = vrot.lane.b32.xlu1 %v387_v24, %s2147_s7  ;;  %s2631_s7 = sld [smem:[#allocation9 + $0x4f]]  ;;  %v2787_v8 = vpop.permute.xlu0 %544 }
 0x1a4   : > { %3896 = sst [smem:[#allocation70_spill]] %s2842_s20  ;;  %s2993_s20 = sld [smem:[#allocation9 + $0x21]] }
 0x1a6   : > { %3877 = sst [smem:[#allocation52_spill]] %s2759_s23  ;;  %s2775_s23 = sld [smem:[#allocation9 + $0x32]]  ;;  %v2856_v27 = vpop.permute.xlu0 %560 }
 0x1a7   : > { %3900 = vst [vmem:[#allocation74_spill] sm:$0xff] %v2856_v27  ;;  %s3903_s19 = sld [smem:[#allocation52_spill]]  ;;  %v959_v27 = vld [vmem:[#allocation2 + $0x90] sm:$0xff] }
 0x1a8   : > { %v839_v12 = vstv %s2631_s7  ;;  %s2745_s7 = sld [smem:[#allocation9 + $0x58]]  ;;  %3912 = sst [smem:[#allocation52_spill]] %s2879_s21 }
 0x1a9   : > { %v2751_v23 = vmul.f32 %v839_v12, %v815_v48  ;;  %v2757_v24 = vmul.f32 %v1238_v6, %v839_v12  ;;  %v875_v48 = vstv %s2679_s18  ;;  %v2791_v12 = vmul.f32 %v857_v36, %v2420_v20  ;;  %s2797_s18 = sld [smem:[#allocation9 + $0x13]] }
 0x1aa   : > { %v2800_v6 = vmul.f32 %v866_v45, %v2420_v20  ;;  %v2804_v10 = vmul.f32 %v875_v48, %v2420_v20  ;;  %v2824_v20 = vmul.f32 %v893_v49, %v887_v37  ;;  %v2840_v46 = vmul.f32 %v875_v48, %v2424_v21  ;;  %v2858_v21 = vpop.permute.xlu1 %564  ;;  %3935 = sst [smem:[#allocation105_spill]] %s2993_s20  ;;  %s2995_s21 = sld [smem:[#allocation9 + $0x43]] }
 0x1ab   : > { %3882 = vst [vmem:[#allocation57_spill] sm:$0xff] %v2791_v12  ;;  %v2846_v45 = vmul.f32 %v902_v25, %v887_v37  ;;  %3902 = vst [vmem:[#allocation75_spill] sm:$0xff] %v2858_v21  ;;  %v2860_v48 = vmul.f32 %v911_v16, %v887_v37  ;;  %v2873_v21 = vmul.f32 %v1292_v11, %v911_v16  ;;  %v2918_v25 = vpop.permute.xlu0 %568  ;;  %v1031_v16 = vld [vmem:[#allocation2 + $0x92] sm:$0xff]  ;;  %s3958_s20 = sld [smem:[#allocation27_spill]] }
 0x1ac   : > { %3884 = vst [vmem:[#allocation59_spill] sm:$0xff] %v2800_v6  ;;  %3885 = vst [vmem:[#allocation60_spill] sm:$0xff] %v2804_v10  ;;  %v2875_v37 = vmul.f32 %v1319_v42, %v929_v28  ;;  %v2877_v36 = vmul.f32 %v1319_v42, %v938_v32  ;;  %v974_v28 = vstv %s2809_s15  ;;  %s2914_s15 = sld [smem:[#allocation9 + $0x1a]] }
 0x1ad   : > { %3891 = vst [vmem:[#allocation65_spill] sm:$0xff] %v2824_v20  ;;  %3895 = vst [vmem:[#allocation69_spill] sm:$0xff] %v2840_v46  ;;  %v3996_v20 = vstv %s2633_s1 }
 0x1ae   : > { %v947_v9 = vstv %s2745_s7  ;;  %3897 = vst [vmem:[#allocation71_spill] sm:$0xff] %v2846_v45  ;;  %s2852_s7 = sld [smem:[#allocation9 + $0x39]]  ;;  %3904 = vst [vmem:[#allocation76_spill] sm:$0xff] %v2860_v48 }
 0x1af   : > { %v2863_v46 = vmul.f32 %v947_v9, %v923_v51  ;;  %3909 = vst [vmem:[#allocation80_spill] sm:$0xff] %v2873_v21  ;;  %3910 = vst [vmem:[#allocation81_spill] sm:$0xff] %v2875_v37  ;;  %v2883_v49 = vmul.f32 %v1319_v42, %v947_v9  ;;  %v965_v30 = vstv %s2797_s18  ;;  %v983_v51 = vstv %s2822_s12  ;;  %s2905_s18 = sld [smem:[#allocation9 + $0x5c]]  ;;  %v1346_v37 = vld [vmem:[#allocation2 + $0x98] sm:$0xff]  ;;  %s2925_s12 = sld [smem:[#allocation9 + $0x3e]] }
 0x1b0   : > { %3911 = vst [vmem:[#allocation82_spill] sm:$0xff] %v2877_v36  ;;  %v2911_v11 = vmul.f32 %v965_v30, %v959_v27  ;;  %v1001_v36 = vstv %s2833_s22  ;;  %3919 = vst [vmem:[#allocation89_spill] sm:$0xff] %v2918_v25  ;;  %v2921_v21 = vmul.f32 %v974_v28, %v959_v27  ;;  %s2927_s22 = sld [smem:[#allocation9 + $0x5f]]  ;;  %v2932_v25 = vmul.f32 %v983_v51, %v959_v27 }
 0x1b1   : > { %3905 = vst [vmem:[#allocation77_spill] sm:$0xff] %v2863_v46  ;;  %3913 = vst [vmem:[#allocation83_spill] sm:$0xff] %v2883_v49  ;;  %v995_v49 = vld [vmem:[#allocation2 + $0x91] sm:$0xff]  ;;  %v1010_v42 = vstv %s2854_s10  ;;  %v2945_v52 = vmul.f32 %v1346_v37, %v965_v30  ;;  %v1019_v27 = vstv %s2881_s17  ;;  %v2955_v46 = vmul.f32 %v1346_v37, %v974_v28  ;;  %s2957_s10 = sld [smem:[#allocation9 + $0x64]]  ;;  %s2967_s17 = sld [smem:[#allocation9 + $0x3f]] }
 0x1b2   : > { %3918 = vst [vmem:[#allocation88_spill] sm:$0xff] %v2911_v11  ;;  %3920 = vst [vmem:[#allocation90_spill] sm:$0xff] %v2921_v21  ;;  %v1037_v11 = vstv %s2844_s29  ;;  %v2941_v32 = vmul.f32 %v1001_v36, %v995_v49  ;;  %s2947_s29 = sld [smem:[#allocation9 + $0x62]]  ;;  %v2961_v30 = vmul.f32 %v1010_v42, %v995_v49  ;;  %v2965_v48 = vmul.f32 %v1346_v37, %v983_v51 }
 0x1b3   : > { %3921 = vst [vmem:[#allocation91_spill] sm:$0xff] %v2932_v25  ;;  %3923 = vst [vmem:[#allocation93_spill] sm:$0xff] %v2945_v52  ;;  %v1055_v25 = vstv %s2890_s25  ;;  %s2982_s25 = sld [smem:[#allocation9 + $0x22]]  ;;  %v2986_v37 = vmul.f32 %v1019_v27, %v995_v49  ;;  %v1103_v52 = vld [vmem:[#allocation2 + $0xa9] sm:$0xff] }
 0x1b4   : > { %3899 = sst [smem:[#allocation73_spill]] %s2852_s7  ;;  %3922 = vst [vmem:[#allocation92_spill] sm:$0xff] %v2941_v32  ;;  %3925 = vst [vmem:[#allocation95_spill] sm:$0xff] %v2955_v46  ;;  %v2997_v51 = vmul.f32 %v1055_v25, %v1031_v16 }
 0x1b5   : > { %3917 = sst [smem:[#allocation87_spill]] %s2905_s18  ;;  %3926 = vst [vmem:[#allocation96_spill] sm:$0xff] %v2961_v30  ;;  %3927 = vst [vmem:[#allocation97_spill] sm:$0xff] %v2965_v48  ;;  %v2978_v30 = vmul.f32 %v1046_v53, %v1031_v16  ;;  %s3007_s7 = sld [smem:[#allocation9 + $0x67]] }
 0x1b6   : > { %3932 = vst [vmem:[#allocation102_spill] sm:$0xff] %v2986_v37  ;;  %3936 = vst [vmem:[#allocation106_spill] sm:$0xff] %v2997_v51  ;;  %s3026_s18 = sld [smem:[#allocation9 + $0x45]] }
 0x1b7   : > { %3928 = sst [smem:[#allocation98_spill]] %s2967_s17  ;;  %3930 = vst [vmem:[#allocation100_spill] sm:$0xff] %v2978_v30  ;;  %s3974_s17 = sld [smem:[#allocation34_spill]] }
 0x1bc   : > { %3942 = sst [smem:[#allocation112_spill]] %s3026_s18  ;;  %s3965_s18 = sld [smem:[#allocation33_spill]] }
 0x1e4   : > { %v462_v9 = vpop.permute.xlu1 %461 }
 0x1e5   : > { %v497_v40 = vsel %vm388_vm3, %v2529_v59, %v462_v9  ;;  %v2953_v9 = vmul.f32 %v1037_v11, %v1031_v16  ;;  %v1400_v59 = vld [vmem:[#allocation2 + $0x9a] sm:$0xff]  ;;  %v1427_v16 = vld [vmem:[#allocation2 + $0xb0] sm:$0xff] }
 0x1e6   : > { %509 = vst.msk [vmem:[#allocation2] sm:$0xff] %vm275_vm0, %v497_v40  ;;  %v1373_v40 = vld [vmem:[#allocation2 + $0x99] sm:$0xff]  ;;  %v3003_v49 = vmul.f32 %v1400_v59, %v1046_v53 }
 0x1e7   : > { %3924 = vst [vmem:[#allocation94_spill] sm:$0xff] %v2953_v9  ;;  %v1109_v9 = vstv %s2959_s4  ;;  %s3060_s4 = sld [smem:[#allocation9 + $0x65]] }
 0x1e8   : > { %v466_v21 = vpop.permute.xlu1 %465  ;;  %v464_v32 = vpop.permute.xlu0 %463  ;;  %3939 = vst [vmem:[#allocation109_spill] sm:$0xff] %v3003_v49 }
 0x1e9   : > { %v499_v28 = vsel %vm388_vm3, %v2521_v55, %v466_v21  ;;  %v498_v46 = vsel %vm388_vm3, %v2519_v54, %v464_v32  ;;  %v2989_v21 = vmul.f32 %v1373_v40, %v1001_v36  ;;  %v2991_v54 = vmul.f32 %v1373_v40, %v1010_v42 }
 0x1ea   : > { %512 = vst.msk [vmem:[#allocation2 + $0x10] sm:$0x3] %vm511_vm4, %v499_v28  ;;  %v2999_v32 = vmul.f32 %v1373_v40, %v1019_v27  ;;  %v3009_v28 = vmul.f32 %v1400_v59, %v1055_v25  ;;  %v1082_v27 = vstv %s2938_s26  ;;  %v1091_v55 = vstv %s2957_s10  ;;  %v1139_v40 = vld [vmem:[#allocation2 + $0xaa] sm:$0xff]  ;;  %s3058_s26 = sld [smem:[#allocation9 + $0x41]]  ;;  %s3070_s10 = sld [smem:[#allocation9 + $0x20]] }
 0x1eb   : > { %510 = vst.msk [vmem:[#allocation2 + $0x8] sm:$0xff] %vm275_vm0, %v498_v46  ;;  %3933 = vst [vmem:[#allocation103_spill] sm:$0xff] %v2989_v21  ;;  %v3001_v46 = vmul.f32 %v1400_v59, %v1037_v11  ;;  %v1067_v11 = vld [vmem:[#allocation2 + $0xa8] sm:$0xff]  ;;  %v1073_v59 = vstv %s2936_s3  ;;  %s3048_s3 = sld [smem:[#allocation9 + $0x1d]]  ;;  %v3099_v48 = vmul.f32 %v1427_v16, %v1091_v55 }
 0x1ec   : > { %3934 = vst [vmem:[#allocation104_spill] sm:$0xff] %v2991_v54  ;;  %3937 = vst [vmem:[#allocation107_spill] sm:$0xff] %v2999_v32  ;;  %v572_v36 = vpop.permute.xlu1 %571  ;;  %v574_v42 = vpop.permute.xlu0 %573  ;;  %v1481_v32 = vld [vmem:[#allocation2 + $0xb2] sm:$0xff] }
 0x1ed   : > { %3938 = vst [vmem:[#allocation108_spill] sm:$0xff] %v3001_v46  ;;  %3940 = vst [vmem:[#allocation110_spill] sm:$0xff] %v3009_v28  ;;  %v607_v53 = vsel %vm522_vm5, %v2527_v58, %v572_v36  ;;  %v608_v25 = vsel %vm522_vm5, %v2662_v38, %v574_v42  ;;  %v3046_v36 = vmul.f32 %v1082_v27, %v1067_v11  ;;  %v1154_v38 = vstv %s3005_s14  ;;  %s3091_s14 = sld [smem:[#allocation9 + $0x47]] }
 0x1ee   : > { %620 = vst.msk [vmem:[#allocation2 + $0xc0] sm:$0xff] %vm275_vm0, %v607_v53  ;;  %621 = vst.msk [vmem:[#allocation2 + $0xc8] sm:$0xff] %vm275_vm0, %v608_v25  ;;  %v3043_v53 = vmul.f32 %v1073_v59, %v1067_v11  ;;  %v1145_v25 = vstv %s2982_s25  ;;  %v3064_v58 = vmul.f32 %v1091_v55, %v1067_v11  ;;  %s3077_s25 = sld [smem:[#allocation9 + $0x23]] }
 0x1ef   : > { %3946 = vst [vmem:[#allocation116_spill] sm:$0xff] %v3046_v36  ;;  %v1118_v36 = vstv %s2995_s21  ;;  %s3093_s21 = sld [smem:[#allocation9 + $0x68]]  ;;  %3956 = vst [vmem:[#allocation125_spill] sm:$0xff] %v3099_v48 }
 0x1f0   : > { %v576_v28 = vpop.permute.xlu1 %575  ;;  %v468_v49 = vpop.permute.xlu0 %467  ;;  %3945 = vst [vmem:[#allocation115_spill] sm:$0xff] %v3043_v53  ;;  %3947 = vst [vmem:[#allocation117_spill] sm:$0xff] %v3064_v58  ;;  %v3075_v53 = vmul.f32 %v1427_v16, %v1073_v59  ;;  %v1163_v58 = vstv %s3016_s0  ;;  %v740_v59 = vld [vmem:[#allocation2] sm:$0xff]  ;;  %s3960_s0 = sld [smem:[#allocation28_spill]] }
 0x1f1   : > { %v609_v42 = vsel %vm522_vm5, %v2531_v60, %v576_v28  ;;  %v500_v46 = vsel %vm388_vm3, %v2533_v61, %v468_v49  ;;  %v3067_v28 = vmul.f32 %v1109_v9, %v1103_v52  ;;  %v1127_v61 = vstv %s3007_s7  ;;  %s3954_s7 = sld [smem:[#allocation26_spill]] }
 0x1f2   : > { %622 = vst.msk [vmem:[#allocation2 + $0xd0] sm:$0x3] %vm511_vm4, %v609_v42  ;;  %3949 = vst [vmem:[#allocation119_spill] sm:$0xff] %v3075_v53  ;;  %v1454_v42 = vld [vmem:[#allocation2 + $0xb1] sm:$0xff]  ;;  %v3089_v49 = vmul.f32 %v1427_v16, %v1082_v27  ;;  %v3095_v53 = vmul.f32 %v1118_v36, %v1103_v52  ;;  %v3101_v60 = vmul.f32 %v1127_v61, %v1103_v52  ;;  %v776_v51 = vld [vmem:[#allocation2 + $0x1] sm:$0xff] }
 0x1f3   : > { %513 = vst.msk [vmem:[#allocation2 + $0x18] sm:$0xff] %vm275_vm0, %v500_v46  ;;  %3948 = vst [vmem:[#allocation118_spill] sm:$0xff] %v3067_v28  ;;  %v3086_v28 = vmul.f32 %v1145_v25, %v1139_v40  ;;  %3953 = sst [smem:[#allocation123_spill]] %s3091_s14  ;;  %v812_v30 = vld [vmem:[#allocation2 + $0x2] sm:$0xff]  ;;  %v3108_v54 = vmul.f32 %v1163_v58, %v1139_v40  ;;  %v3110_v55 = vmul.f32 %v1454_v42, %v1118_v36  ;;  %v3981_v36 = vstv %s3971_s13  ;;  %s3985_s14 = sld [smem:[#allocation35_spill]] }
 0x1f4   : > { %3950 = sst [smem:[#allocation120_spill]] %s3077_s25  ;;  %v3081_v46 = vpop.permute.xlu1 %469  ;;  %v3083_v11 = vpop.permute.xlu0 %471  ;;  %3952 = vst [vmem:[#allocation122_spill] sm:$0xff] %v3089_v49  ;;  %3955 = vst [vmem:[#allocation124_spill] sm:$0xff] %v3095_v53  ;;  %v3106_v49 = vmul.f32 %v1454_v42, %v1109_v9  ;;  %v3112_v52 = vmul.f32 %v1454_v42, %v1127_v61  ;;  %v3114_v16 = vmul.f32 %v1481_v32, %v1145_v25  ;;  %v3975_v61 = vstv %s3958_s20  ;;  %v1208_v45 = vld [vmem:[#allocation2 + $0x9] sm:$0xff]  ;;  %s3986_s25 = sld [smem:[#allocation36_spill]] }
 0x1f5   : > { %3951 = vst [vmem:[#allocation121_spill] sm:$0xff] %v3086_v28  ;;  %3957 = vst [vmem:[#allocation126_spill] sm:$0xff] %v3101_v60  ;;  %v3103_v28 = vmul.f32 %v1154_v38, %v1139_v40  ;;  %v3122_v40 = vmul.f32 %v1481_v32, %v1154_v38  ;;  %v3124_v48 = vmul.f32 %v1481_v32, %v1163_v58  ;;  %v3979_v53 = vstv %s3965_s18  ;;  %v1181_v58 = vld [vmem:[#allocation2 + $0x8] sm:$0xff]  ;;  %s3990_s20 = sld [smem:[#allocation38_spill]] }
 0x1f6   : > { %3961 = vst [vmem:[#allocation128_spill] sm:$0xff] %v3106_v49  ;;  %3964 = vst [vmem:[#allocation129_spill] sm:$0xff] %v3108_v54  ;;  %v757_v42 = vmul.f32 %v3975_v61, %v740_v59  ;;  %v3976_v25 = vstv %s3960_s0  ;;  %v802_v37 = vmul.f32 %v3979_v53, %v776_v51  ;;  %v3980_v38 = vstv %s3967_s28 }
 0x1f7   : > { %3959 = vst [vmem:[#allocation127_spill] sm:$0xff] %v3103_v28  ;;  %3966 = vst [vmem:[#allocation130_spill] sm:$0xff] %v3110_v55  ;;  %v3970_v21 = vstv %s3954_s7  ;;  %v3977_v55 = vstv %s3962_s16  ;;  %v3978_v28 = vstv %s3963_s8  ;;  %v820_v32 = vmul.f32 %v3980_v38, %v812_v30 }
 0x1f8   : > { %3968 = vst [vmem:[#allocation131_spill] sm:$0xff] %v3112_v52  ;;  %3969 = vst [vmem:[#allocation132_spill] sm:$0xff] %v3114_v16  ;;  %v748_v27 = vmul.f32 %v3970_v21, %v740_v59  ;;  %v3118_v9 = vpop.permute.xlu1 %577  ;;  %v3120_v49 = vpop.permute.xlu0 %579  ;;  %v766_v16 = vmul.f32 %v3976_v25, %v740_v59  ;;  %v784_v54 = vmul.f32 %v3977_v55, %v776_v51  ;;  %v3982_v21 = vstv %s3974_s17 }
 0x1f9   : > { %3972 = vst [vmem:[#allocation133_spill] sm:$0xff] %v3122_v40  ;;  %3973 = vst [vmem:[#allocation134_spill] sm:$0xff] %v3124_v48  ;;  %v793_v60 = vmul.f32 %v3978_v28, %v776_v51  ;;  %v829_v48 = vmul.f32 %v3981_v36, %v812_v30  ;;  %v838_v52 = vmul.f32 %v3982_v21, %v812_v30  ;;  %v3983_v40 = vstv %s3954_s7  ;;  %v746_v21 = vld [vmem:[#allocation2 + $0xc0] sm:$0xff]  ;;  %s3992_s7 = sld [smem:[#allocation40_spill]] }
 0x1fa   : > { %v751_v25 = vadd.f32 %v2672_v41, %v748_v27  ;;  %v760_v38 = vadd.f32 %v2676_v43, %v757_v42  ;;  %v769_v36 = vadd.f32 %v2685_v47, %v766_v16  ;;  %v1188_v59 = vmul.f32 %v1181_v58, %v3983_v40  ;;  %v1235_v27 = vld [vmem:[#allocation2 + $0xa] sm:$0xff]  ;;  %v782_v47 = vld [vmem:[#allocation2 + $0xc1] sm:$0xff] }
 0x1fb   : > { %v3984_v41 = vmov %v3975_v61  ;;  %v787_v61 = vadd.f32 %v2707_v7, %v784_v54  ;;  %v796_v51 = vadd.f32 %v2728_v15, %v793_v60  ;;  %v805_v53 = vadd.f32 %v2740_v31, %v802_v37 }
 0x1fc   : > { %v474_v55 = vpop.permute.xlu1 %473  ;;  %v3149_v28 = vpop.permute.xlu0 %581  ;;  %v1194_v30 = vmul.f32 %v1181_v58, %v3984_v41  ;;  %v3163_v43 = vadd.f32 %v2717_v19, %v820_v32  ;;  %v3166_v16 = vadd.f32 %v2742_v22, %v829_v48  ;;  %v3988_v40 = vstv %s3960_s0  ;;  %s4033_s0 = sld [smem:[#allocation48_spill]] }
 0x1fd   : > { %v1200_v42 = vmul.f32 %v1181_v58, %v3988_v40  ;;  %v3989_v41 = vstv %s3962_s16  ;;  %v3991_v54 = vstv %s3963_s8  ;;  %v3175_v60 = vadd.f32 %v2751_v23, %v838_v52  ;;  %s3999_s16 = sld [smem:[#allocation37_spill]]  ;;  %v818_v52 = vld [vmem:[#allocation2 + $0xc2] sm:$0xff]  ;;  %s4021_s8 = sld [smem:[#allocation44_spill]] }
 0x1fe   : > { %3987 = vst [vmem:[#allocation135_spill] sm:$0xff] %v3166_v16  ;;  %v1215_v7 = vmul.f32 %v1208_v45, %v3989_v41  ;;  %v1221_v15 = vmul.f32 %v1208_v45, %v3991_v54  ;;  %v3994_v31 = vstv %s3965_s18  ;;  %v3995_v19 = vstv %s3967_s28  ;;  %s4010_s28 = sld [smem:[#allocation41_spill]]  ;;  %s4024_s18 = sld [smem:[#allocation45_spill]] }
 0x1ff   : > { %3993 = vst [vmem:[#allocation136_spill] sm:$0xff] %v3175_v60  ;;  %v1227_v37 = vmul.f32 %v1208_v45, %v3994_v31  ;;  %v1242_v32 = vmul.f32 %v1235_v27, %v3995_v19  ;;  %v753_v22 = vmul.f32 %v3996_v20, %v746_v21  ;;  %v3184_v58 = vadd.f32 %v2689_v50, %v1188_v59 }
 0x200   : > { %v478_v48 = vpop.permute.xlu1 %477  ;;  %v476_v10 = vpop.permute.xlu0 %475  ;;  %v3997_v40 = vstv %s2635_s5  ;;  %v3998_v6 = vstv %s3985_s14  ;;  %v4000_v12 = vstv %s3986_s25  ;;  %v3193_v45 = vadd.f32 %v2698_v5, %v1194_v30 }
 0x201   : > { %v762_v41 = vmul.f32 %v3997_v40, %v746_v21  ;;  %v771_v54 = vmul.f32 %v3998_v6, %v746_v21  ;;  %v789_v23 = vmul.f32 %v4000_v12, %v782_v47  ;;  %v4001_v31 = vstv %s3971_s13  ;;  %v1214_v40 = vld [vmem:[#allocation2 + $0xc9] sm:$0xff]  ;;  %s4009_s13 = sld [smem:[#allocation39_spill]] }
 0x202   : > { %v1248_v19 = vmul.f32 %v1235_v27, %v4001_v31  ;;  %v4002_v60 = vstv %s3990_s20  ;;  %v4003_v16 = vstv %s3992_s7  ;;  %v3202_v50 = vadd.f32 %v2701_v17, %v1200_v42 }
 0x203   : > { %v798_v20 = vmul.f32 %v4002_v60, %v782_v47  ;;  %v807_v44 = vmul.f32 %v4003_v16, %v782_v47  ;;  %v1217_v59 = vadd.f32 %v2720_v13, %v1215_v7  ;;  %v1223_v6 = vadd.f32 %v2731_v18, %v1221_v15 }
 0x204   : > { %v4004_v21 = vstv %s3974_s17  ;;  %v1229_v5 = vadd.f32 %v2753_v34, %v1227_v37  ;;  %v3210_v30 = vadd.f32 %v2733_v29, %v1242_v32  ;;  %v754_v60 = vadd.f32 %v753_v22, %v751_v25  ;;  %v586_v16 = vpop.permute.xlu1 %585  ;;  %v584_v17 = vpop.permute.xlu0 %583  ;;  %v1187_v25 = vld [vmem:[#allocation2 + $0xc8] sm:$0xff]  ;;  %s4027_s17 = sld [smem:[#allocation47_spill]] }
 0x205   : > { %v1254_v12 = vmul.f32 %v1235_v27, %v4004_v21  ;;  %v4005_v31 = vstv %s3999_s16  ;;  %v763_v42 = vadd.f32 %v762_v41, %v760_v38  ;;  %v772_v13 = vadd.f32 %v771_v54, %v769_v36 }
 0x206   : > { %v825_v47 = vmul.f32 %v4005_v31, %v818_v52  ;;  %v790_v7 = vadd.f32 %v789_v23, %v787_v61  ;;  %v501_v18 = vsel %vm388_vm3, %v2523_v56, %v3081_v46  ;;  %v799_v27 = vadd.f32 %v798_v20, %v796_v51  ;;  %v848_v20 = vld [vmem:[#allocation2 + $0x18] sm:$0xff]  ;;  %v4017_v31 = vld [vmem:[#allocation62_spill] sm:$0xff] }
 0x207   : > { %v808_v34 = vadd.f32 %v807_v44, %v805_v53  ;;  %v4006_v15 = vstv %s3986_s25  ;;  %514 = vst.msk [vmem:[#allocation2 + $0x20] sm:$0xff] %vm275_vm0, %v501_v18  ;;  %v502_v29 = vsel %vm388_vm3, %v2537_v63, %v3083_v11  ;;  %v4007_v38 = vstv %s3990_s20  ;;  %s4028_s25 = sld [smem:[#allocation49_spill]]  ;;  %s4034_s20 = sld [smem:[#allocation50_spill]] }
 0x208   : > { %v1218_v37 = vmul.f32 %v1214_v40, %v4006_v15  ;;  %v1224_v36 = vmul.f32 %v1214_v40, %v4007_v38  ;;  %515 = vst.msk [vmem:[#allocation2 + $0x28] sm:$0x3] %vm511_vm4, %v502_v29  ;;  %v610_v56 = vsel %vm522_vm5, %v2535_v62, %v3118_v9  ;;  %v611_v44 = vsel %vm522_vm5, %v2726_v14, %v3120_v49  ;;  %v588_v49 = vpop.permute.xlu1 %587  ;;  %v480_v9 = vpop.permute.xlu0 %479 }
 0x209   : > { %v503_v46 = vsel %vm388_vm3, %v2525_v57, %v474_v55  ;;  %v4008_v63 = vstv %s3992_s7  ;;  %623 = vst.msk [vmem:[#allocation2 + $0xd8] sm:$0xff] %vm275_vm0, %v610_v56  ;;  %624 = vst.msk [vmem:[#allocation2 + $0xe0] sm:$0xff] %vm275_vm0, %v611_v44  ;;  %v612_v62 = vsel %vm522_vm5, %v2787_v8, %v3149_v28  ;;  %v505_v14 = vsel %vm388_vm3, %v2545_v3, %v478_v48  ;;  %v1241_v48 = vld [vmem:[#allocation2 + $0xca] sm:$0xff]  ;;  %s4042_s7 = sld [smem:[#allocation53_spill]] }
 0x20a   : > { %v1230_v11 = vmul.f32 %v1214_v40, %v4008_v63  ;;  %516 = vst.msk [vmem:[#allocation2 + $0x30] sm:$0xff] %vm275_vm0, %v503_v46  ;;  %v504_v57 = vsel %vm388_vm3, %v2541_v1, %v476_v10  ;;  %v614_v8 = vsel %vm522_vm5, %v2543_v2, %v586_v16  ;;  %v613_v3 = vsel %vm522_vm5, %v2539_v0, %v584_v17 }
 0x20b   : > { %625 = vst.msk [vmem:[#allocation2 + $0xe8] sm:$0x3] %vm511_vm4, %v612_v62  ;;  %518 = vst.msk [vmem:[#allocation2 + $0x40] sm:$0x3] %vm511_vm4, %v505_v14  ;;  %v615_v1 = vsel %vm522_vm5, %v2547_v4, %v588_v49  ;;  %v506_v10 = vsel %vm388_vm3, %v2749_v33, %v480_v9  ;;  %v1250_v61 = vadd.f32 %v2755_v35, %v1248_v19  ;;  %v4011_v28 = vstv %s2633_s1  ;;  %s4016_s1 = sld [smem:[#allocation42_spill]] }
 0x20c   : > { %517 = vst.msk [vmem:[#allocation2 + $0x38] sm:$0xff] %vm275_vm0, %v504_v57  ;;  %v1256_v55 = vadd.f32 %v2757_v24, %v1254_v12  ;;  %v1191_v51 = vmul.f32 %v1187_v25, %v4011_v28  ;;  %v4012_v53 = vstv %s2635_s5  ;;  %627 = vst.msk [vmem:[#allocation2 + $0xf8] sm:$0xff] %vm275_vm0, %v614_v8  ;;  %v826_v0 = vadd.f32 %v825_v47, %v3163_v43  ;;  %v482_v21 = vpop.permute.xlu1 %481  ;;  %v484_v12 = vpop.permute.xlu0 %483  ;;  %s4018_s5 = sld [smem:[#allocation43_spill]] }
 0x20d   : > { %v1197_v2 = vmul.f32 %v1187_v25, %v4012_v53  ;;  %626 = vst.msk [vmem:[#allocation2 + $0xf0] sm:$0xff] %vm275_vm0, %v613_v3  ;;  %519 = vst.msk [vmem:[#allocation2 + $0x48] sm:$0xff] %vm275_vm0, %v506_v10  ;;  %v4013_v4 = vstv %s4009_s13  ;;  %v4014_v32 = vstv %s4010_s28  ;;  %v4015_v22 = vstv %s3985_s14  ;;  %s4031_s14 = sld [smem:[#allocation46_spill]]  ;;  %v4035_v3 = vld [vmem:[#allocation57_spill] sm:$0xff]  ;;  %s4068_s13 = sld [smem:[#allocation55_spill]] }
 0x20e   : > { %628 = vst.msk [vmem:[#allocation2 + $0x100] sm:$0x3] %vm511_vm4, %v615_v1  ;;  %v834_v33 = vmul.f32 %v4013_v4, %v818_v52  ;;  %v843_v35 = vmul.f32 %v4014_v32, %v818_v52  ;;  %v1203_v24 = vmul.f32 %v1187_v25, %v4015_v22  ;;  %v791_v41 = vadd.f32 %v790_v7, %v754_v60  ;;  %v920_v9 = vld [vmem:[#allocation2 + $0x1a] sm:$0xff]  ;;  %s4070_s28 = sld [smem:[#allocation56_spill]] }
 0x20f   : > { %v800_v54 = vadd.f32 %v799_v27, %v763_v42  ;;  %v1219_v23 = vadd.f32 %v1218_v37, %v1217_v59  ;;  %v1225_v19 = vadd.f32 %v1224_v36, %v1223_v6  ;;  %v809_v40 = vadd.f32 %v808_v34, %v772_v13  ;;  %v884_v34 = vld [vmem:[#allocation2 + $0x19] sm:$0xff] }
 0x210   : > { %v1231_v43 = vadd.f32 %v1230_v11, %v1229_v5  ;;  %v507_v52 = vsel %vm388_vm3, %v2641_v26, %v482_v21  ;;  %v508_v47 = vsel %vm388_vm3, %v4017_v31, %v484_v12  ;;  %v1192_v60 = vadd.f32 %v1191_v51, %v3184_v58  ;;  %v4022_v5 = vld [vmem:[#allocation135_spill] sm:$0xff]  ;;  %v854_v63 = vld [vmem:[#allocation2 + $0xd8] sm:$0xff] }
 0x211   : > { %v1198_v59 = vadd.f32 %v1197_v2, %v3193_v45  ;;  %v4019_v6 = vstv %s3999_s16  ;;  %v4020_v17 = vmov %v4013_v4  ;;  %520 = vst.msk [vmem:[#allocation2 + $0x50] sm:$0xff] %vm275_vm0, %v507_v52  ;;  %v835_v26 = vadd.f32 %v834_v33, %v4022_v5  ;;  %v4026_v45 = vld [vmem:[#allocation136_spill] sm:$0xff]  ;;  %v1262_v2 = vld [vmem:[#allocation2 + $0x20] sm:$0xff]  ;;  %s4065_s16 = sld [smem:[#allocation54_spill]] }
 0x212   : > { %v1245_v16 = vmul.f32 %v1241_v48, %v4019_v6  ;;  %v1251_v42 = vmul.f32 %v1241_v48, %v4020_v17  ;;  %521 = vst.msk [vmem:[#allocation2 + $0x58] sm:$0x3] %vm511_vm4, %v508_v47  ;;  %v1204_v13 = vadd.f32 %v1203_v24, %v3202_v50  ;;  %v4023_v7 = vmov %v4014_v32  ;;  %v1289_v33 = vld [vmem:[#allocation2 + $0x21] sm:$0xff]  ;;  %v4049_v6 = vld [vmem:[#allocation76_spill] sm:$0xff] }
 0x213   : > { %v1257_v18 = vmul.f32 %v1241_v48, %v4023_v7  ;;  %v4025_v27 = vstv %s4016_s1  ;;  %v844_v15 = vadd.f32 %v843_v35, %v4026_v45  ;;  %v1220_v37 = vadd.f32 %v1219_v23, %v1192_v60  ;;  %v4040_v22 = vld [vmem:[#allocation60_spill] sm:$0xff]  ;;  %v4048_v60 = vld [vmem:[#allocation71_spill] sm:$0xff]  ;;  %s4082_s1 = sld [smem:[#allocation58_spill]] }
 0x214   : > { %v856_v58 = vmul.f32 %v4025_v27, %v848_v20  ;;  %v1226_v29 = vadd.f32 %v1225_v19, %v1198_v59  ;;  %v4029_v25 = vstv %s4018_s5  ;;  %v827_v36 = vadd.f32 %v826_v0, %v791_v41  ;;  %v4044_v19 = vld [vmem:[#allocation65_spill] sm:$0xff]  ;;  %v1316_v47 = vld [vmem:[#allocation2 + $0x22] sm:$0xff]  ;;  %s4099_s5 = sld [smem:[#allocation70_spill]] }
 0x215   : > { %v865_v38 = vmul.f32 %v4029_v25, %v848_v20  ;;  %v3309_v56 = vadd.f32 %v835_v26, %v800_v54  ;;  %v1232_v44 = vadd.f32 %v1231_v43, %v1204_v13  ;;  %v4030_v46 = vstv %s4021_s8  ;;  %v890_v13 = vld [vmem:[#allocation2 + $0xd9] sm:$0xff]  ;;  %s4102_s8 = sld [smem:[#allocation51_spill]] }
 0x216   : > { %v874_v50 = vmul.f32 %v4030_v46, %v848_v20  ;;  %v3313_v11 = vadd.f32 %v844_v15, %v809_v40  ;;  %v1246_v62 = vadd.f32 %v1245_v16, %v3210_v30  ;;  %v1252_v14 = vadd.f32 %v1251_v42, %v1250_v61  ;;  %v4038_v61 = vld [vmem:[#allocation59_spill] sm:$0xff] }
 0x217   : > { %v4032_v57 = vstv %s4024_s18  ;;  %v1258_v8 = vadd.f32 %v1257_v18, %v1256_v55  ;;  %v859_v1 = vadd.f32 %v4035_v3, %v856_v58  ;;  %v4036_v10 = vstv %s4027_s17  ;;  %s4105_s18 = sld [smem:[#allocation84_spill]]  ;;  %s4111_s17 = sld [smem:[#allocation85_spill]] }
 0x218   : > { %v892_v49 = vmul.f32 %v4032_v57, %v884_v34  ;;  %v901_v28 = vmul.f32 %v4036_v10, %v884_v34  ;;  %v4037_v51 = vstv %s4028_s25  ;;  %v3323_v0 = vadd.f32 %v1246_v62, %v1220_v37  ;;  %v4055_v37 = vld [vmem:[#allocation68_spill] sm:$0xff]  ;;  %s4113_s25 = sld [smem:[#allocation86_spill]] }
 0x219   : > { %v910_v53 = vmul.f32 %v4037_v51, %v884_v34  ;;  %v3325_v30 = vadd.f32 %v1252_v14, %v1226_v29  ;;  %v868_v4 = vadd.f32 %v4038_v61, %v865_v38  ;;  %v4039_v32 = vstv %s3901_s11  ;;  %v4059_v14 = vld [vmem:[#allocation77_spill] sm:$0xff] }
 0x21a   : > { %v861_v55 = vmul.f32 %v4039_v32, %v854_v63  ;;  %v3330_v35 = vadd.f32 %v1258_v8, %v1232_v44  ;;  %v877_v24 = vadd.f32 %v4040_v22, %v874_v50  ;;  %v4041_v48 = vstv %s4031_s14  ;;  %v4061_v8 = vld [vmem:[#allocation66_spill] sm:$0xff]  ;;  %s4115_s14 = sld [smem:[#allocation87_spill]] }
 0x21b   : > { %v928_v41 = vmul.f32 %v4041_v48, %v920_v9  ;;  %v4043_v54 = vstv %s4033_s0  ;;  %v895_v20 = vadd.f32 %v4044_v19, %v892_v49  ;;  %v4045_v21 = vstv %s4034_s20  ;;  %v4060_v49 = vld [vmem:[#allocation63_spill] sm:$0xff]  ;;  %v1268_v22 = vld [vmem:[#allocation2 + $0xe0] sm:$0xff]  ;;  %s4164_s0 = sld [smem:[#allocation105_spill]]  ;;  %s4165_s20 = sld [smem:[#allocation112_spill]] }
 0x21c   : > { %v937_v23 = vmul.f32 %v4043_v54, %v920_v9  ;;  %v946_v12 = vmul.f32 %v4045_v21, %v920_v9  ;;  %v4046_v40 = vmov %v4025_v27  ;;  %v4047_v52 = vmov %v4029_v25  ;;  %v4056_v25 = vld [vmem:[#allocation72_spill] sm:$0xff] }
 0x21d   : > { %v1269_v43 = vmul.f32 %v1262_v2, %v4046_v40  ;;  %v1275_v31 = vmul.f32 %v1262_v2, %v4047_v52  ;;  %v904_v59 = vadd.f32 %v4048_v60, %v901_v28  ;;  %v913_v16 = vadd.f32 %v4049_v6, %v910_v53  ;;  %v4063_v28 = vld [vmem:[#allocation69_spill] sm:$0xff]  ;;  %v4072_v40 = vld [vmem:[#allocation81_spill] sm:$0xff] }
 0x21e   : > { %v4050_v17 = vmov %v4030_v46  ;;  %v4051_v5 = vmov %v4032_v57  ;;  %v4052_v7 = vmov %v4036_v10  ;;  %v862_v27 = vadd.f32 %v861_v55, %v859_v1  ;;  %v926_v55 = vld [vmem:[#allocation2 + $0xda] sm:$0xff] }
 0x21f   : > { %v1281_v42 = vmul.f32 %v1262_v2, %v4050_v17  ;;  %v1296_v26 = vmul.f32 %v1289_v33, %v4051_v5  ;;  %v1302_v18 = vmul.f32 %v1289_v33, %v4052_v7  ;;  %v4053_v58 = vstv %s3903_s19  ;;  %s4087_s19 = sld [smem:[#allocation61_spill]] }
 0x220   : > { %v870_v34 = vmul.f32 %v4053_v58, %v854_v63  ;;  %v4054_v45 = vstv %s4042_s7  ;;  %v931_v29 = vadd.f32 %v4055_v37, %v928_v41  ;;  %v940_v38 = vadd.f32 %v4056_v25, %v937_v23 }
 0x221   : > { %v879_v15 = vmul.f32 %v4054_v45, %v854_v63  ;;  %v4057_v44 = vmov %v4037_v51  ;;  %v4058_v50 = vmov %v4041_v48  ;;  %v949_v57 = vadd.f32 %v4059_v14, %v946_v12  ;;  %v4064_v51 = vld [vmem:[#allocation78_spill] sm:$0xff]  ;;  %v4069_v48 = vld [vmem:[#allocation79_spill] sm:$0xff] }
 0x222   : > { %v1308_v46 = vmul.f32 %v1289_v33, %v4057_v44  ;;  %v1323_v62 = vmul.f32 %v1316_v47, %v4058_v50  ;;  %v1271_v9 = vadd.f32 %v4060_v49, %v1269_v43  ;;  %v1277_v3 = vadd.f32 %v4061_v8, %v1275_v31  ;;  %v956_v44 = vld [vmem:[#allocation2 + $0x30] sm:$0xff] }
 0x223   : > { %v4062_v1 = vstv %s2767_s30  ;;  %v1283_v63 = vadd.f32 %v4063_v28, %v1281_v42  ;;  %v1298_v53 = vadd.f32 %v4064_v51, %v1296_v26  ;;  %v4066_v2 = vmov %v4043_v54  ;;  %s4090_s30 = sld [smem:[#allocation67_spill]] }
 0x224   : > { %v897_v10 = vmul.f32 %v4062_v1, %v890_v13  ;;  %v1329_v61 = vmul.f32 %v1316_v47, %v4066_v2  ;;  %v4067_v33 = vmov %v4045_v21  ;;  %v1304_v41 = vadd.f32 %v4069_v48, %v1302_v18  ;;  %v4071_v21 = vld [vmem:[#allocation80_spill] sm:$0xff] }
 0x225   : > { %v1335_v32 = vmul.f32 %v1316_v47, %v4067_v33  ;;  %v863_v54 = vadd.f32 %v862_v27, %v827_v36  ;;  %v871_v23 = vadd.f32 %v870_v34, %v868_v4  ;;  %v880_v19 = vadd.f32 %v879_v15, %v877_v24  ;;  %v1295_v47 = vld [vmem:[#allocation2 + $0xe1] sm:$0xff] }
 0x226   : > { %v1310_v12 = vadd.f32 %v4071_v21, %v1308_v46  ;;  %v1325_v43 = vadd.f32 %v4072_v40, %v1323_v62  ;;  %v4073_v52 = vstv %s2775_s23  ;;  %v4074_v60 = vstv %s2783_s24  ;;  %v4078_v24 = vld [vmem:[#allocation82_spill] sm:$0xff]  ;;  %v4084_v62 = vld [vmem:[#allocation83_spill] sm:$0xff]  ;;  %s4091_s23 = sld [smem:[#allocation73_spill]]  ;;  %s4097_s24 = sld [smem:[#allocation52_spill]] }
 0x227   : > { %v906_v31 = vmul.f32 %v4073_v52, %v890_v13  ;;  %v915_v6 = vmul.f32 %v4074_v60, %v890_v13  ;;  %v898_v17 = vadd.f32 %v897_v10, %v895_v20  ;;  %v4075_v42 = vstv %s4065_s16  ;;  %s4199_s16 = sld [smem:[#allocation123_spill]] }
 0x228   : > { %v933_v5 = vmul.f32 %v4075_v42, %v926_v55  ;;  %v4076_v26 = vstv %s3901_s11  ;;  %v4077_v36 = vmov %v4053_v58  ;;  %v1331_v18 = vadd.f32 %v4078_v24, %v1329_v61  ;;  %s4088_s11 = sld [smem:[#allocation64_spill]]  ;;  %v4103_v24 = vld [vmem:[#allocation90_spill] sm:$0xff] }
 0x229   : > { %v1272_v7 = vmul.f32 %v1268_v22, %v4076_v26  ;;  %v1278_v4 = vmul.f32 %v1268_v22, %v4077_v36  ;;  %v4079_v27 = vstv %s4068_s13  ;;  %v4080_v34 = vstv %s4070_s28 }
 0x22a   : > { %v942_v58 = vmul.f32 %v4079_v27, %v926_v55  ;;  %v951_v45 = vmul.f32 %v4080_v34, %v926_v55  ;;  %v4081_v15 = vstv %s4042_s7  ;;  %v872_v13 = vadd.f32 %v871_v23, %v3309_v56  ;;  %s4166_s7 = sld [smem:[#allocation114_spill]] }
 0x22b   : > { %v1284_v37 = vmul.f32 %v1268_v22, %v4081_v15  ;;  %v881_v20 = vadd.f32 %v880_v19, %v3313_v11  ;;  %v899_v25 = vadd.f32 %v898_v17, %v863_v54  ;;  %v4083_v46 = vmov %v4062_v1  ;;  %v1343_v15 = vld [vmem:[#allocation2 + $0x38] sm:$0xff] }
 0x22c   : > { %v1299_v50 = vmul.f32 %v1295_v47, %v4083_v46  ;;  %v1337_v14 = vadd.f32 %v4084_v62, %v1335_v32  ;;  %v907_v49 = vadd.f32 %v906_v31, %v904_v59  ;;  %v4085_v8 = vmov %v4073_v52  ;;  %v1322_v32 = vld [vmem:[#allocation2 + $0xe2] sm:$0xff] }
 0x22d   : > { %v1305_v1 = vmul.f32 %v1295_v47, %v4085_v8  ;;  %v4086_v10 = vmov %v4074_v60  ;;  %v916_v51 = vadd.f32 %v915_v6, %v913_v16  ;;  %v934_v2 = vadd.f32 %v933_v5, %v931_v29  ;;  %v992_v16 = vld [vmem:[#allocation2 + $0x31] sm:$0xff] }
 0x22e   : > { %v1311_v28 = vmul.f32 %v1295_v47, %v4086_v10  ;;  %v1273_v61 = vadd.f32 %v1272_v7, %v1271_v9  ;;  %v1279_v56 = vadd.f32 %v1278_v4, %v1277_v3  ;;  %v943_v33 = vadd.f32 %v942_v58, %v940_v38 }
 0x22f   : > { %v952_v11 = vadd.f32 %v951_v45, %v949_v57  ;;  %v1285_v55 = vadd.f32 %v1284_v37, %v1283_v63  ;;  %v4089_v22 = vstv %s4082_s1  ;;  %v908_v59 = vadd.f32 %v907_v49, %v872_v13  ;;  %v4108_v49 = vld [vmem:[#allocation92_spill] sm:$0xff] }
 0x230   : > { %v964_v48 = vmul.f32 %v4089_v22, %v956_v44  ;;  %v917_v54 = vadd.f32 %v916_v51, %v881_v20  ;;  %v3404_v23 = vadd.f32 %v934_v2, %v899_v25  ;;  %v1300_v19 = vadd.f32 %v1299_v50, %v1298_v53  ;;  %v1370_v50 = vld [vmem:[#allocation2 + $0x39] sm:$0xff] }
 0x231   : > { %v4092_v29 = vstv %s4087_s19  ;;  %v4093_v3 = vstv %s4088_s11  ;;  %v1306_v21 = vadd.f32 %v1305_v1, %v1304_v41  ;;  %v1312_v57 = vadd.f32 %v1311_v28, %v1310_v12  ;;  %v1028_v41 = vld [vmem:[#allocation2 + $0x32] sm:$0xff]  ;;  %s4223_s19 = sld [smem:[#allocation140_spill]] }
 0x232   : > { %v973_v9 = vmul.f32 %v4092_v29, %v956_v44  ;;  %v982_v38 = vmul.f32 %v4093_v3, %v956_v44  ;;  %v1274_v63 = vadd.f32 %v1273_v61, %v3323_v0  ;;  %v1280_v40 = vadd.f32 %v1279_v56, %v3325_v30  ;;  %v4101_v30 = vld [vmem:[#allocation88_spill] sm:$0xff] }
 0x233   : > { %v4094_v52 = vmov %v4075_v42  ;;  %v4095_v60 = vmov %v4079_v27  ;;  %v1286_v47 = vadd.f32 %v1285_v55, %v3330_v35  ;;  %v4096_v17 = vmov %v4080_v34  ;;  %v4104_v35 = vld [vmem:[#allocation91_spill] sm:$0xff]  ;;  %v4109_v1 = vld [vmem:[#allocation96_spill] sm:$0xff] }
 0x234   : > { %v1326_v31 = vmul.f32 %v1322_v32, %v4094_v52  ;;  %v1332_v6 = vmul.f32 %v1322_v32, %v4095_v60  ;;  %v1338_v53 = vmul.f32 %v1322_v32, %v4096_v17  ;;  %v4098_v42 = vstv %s4090_s30  ;;  %v1349_v2 = vld [vmem:[#allocation2 + $0xf8] sm:$0xff]  ;;  %v4123_v52 = vld [vmem:[#allocation100_spill] sm:$0xff] }
 0x235   : > { %v1000_v5 = vmul.f32 %v4098_v42, %v992_v16  ;;  %v4100_v26 = vstv %s4091_s23  ;;  %v3423_v12 = vadd.f32 %v943_v33, %v908_v59  ;;  %v3425_v0 = vadd.f32 %v952_v11, %v917_v54 }
 0x236   : > { %v1009_v7 = vmul.f32 %v4100_v26, %v992_v16  ;;  %v967_v36 = vadd.f32 %v4101_v30, %v964_v48  ;;  %v1301_v4 = vadd.f32 %v1300_v19, %v1274_v63  ;;  %v976_v27 = vadd.f32 %v4103_v24, %v973_v9  ;;  %v4120_v9 = vld [vmem:[#allocation94_spill] sm:$0xff]  ;;  %v4129_v30 = vld [vmem:[#allocation95_spill] sm:$0xff] }
 0x237   : > { %v985_v58 = vadd.f32 %v4104_v35, %v982_v38  ;;  %v1307_v34 = vadd.f32 %v1306_v21, %v1280_v40  ;;  %v1313_v45 = vadd.f32 %v1312_v57, %v1286_v47  ;;  %v1327_v37 = vadd.f32 %v1326_v31, %v1325_v43  ;;  %v1397_v57 = vld [vmem:[#allocation2 + $0x3a] sm:$0xff] }
 0x238   : > { %v1333_v13 = vadd.f32 %v1332_v6, %v1331_v18  ;;  %v4106_v20 = vstv %s4097_s24  ;;  %v4107_v44 = vstv %s4099_s5  ;;  %v1339_v62 = vadd.f32 %v1338_v53, %v1337_v14  ;;  %v962_v14 = vld [vmem:[#allocation2 + $0xf0] sm:$0xff]  ;;  %s2148_s24 = smov [#allocation10]  }
 0x239   : > { %v1018_v25 = vmul.f32 %v4106_v20, %v992_v16  ;;  %v1036_v46 = vmul.f32 %v4107_v44, %v1028_v41  ;;  %v1003_v8 = vadd.f32 %v4108_v49, %v1000_v5  ;;  %v1012_v10 = vadd.f32 %v4109_v1, %v1009_v7  ;;  %v4119_v16 = vld [vmem:[#allocation102_spill] sm:$0xff]  ;;  %v4127_v5 = vld [vmem:[#allocation106_spill] sm:$0xff]  ;;  %v4128_v7 = vld [vmem:[#allocation93_spill] sm:$0xff]  ;;  %s2048_s5 = sshll.u32 %s2148_s24, 4  ;;  %s2049_s5 = int_to_ptr.vmem [resolvable:$false] %s2048_s5 }
 0x23a   : > { %v4110_v28 = vstv %s4102_s8  ;;  %v1328_v43 = vadd.f32 %v1327_v37, %v1301_v4  ;;  %v4112_v18 = vstv %s4105_s18  ;;  %v4114_v56 = vmov %v4089_v22  ;;  %v4132_v37 = vld [vmem:[#allocation103_spill] sm:$0xff]  ;;  %v4135_v49 = vld [vmem:[#allocation104_spill] sm:$0xff]  ;;  %s2050_s8 = scalar_lea.vmem %s2049_s5, 1536 }
 0x23b   : > { %v1045_v51 = vmul.f32 %v4110_v28, %v1028_v41  ;;  %v1054_v61 = vmul.f32 %v4112_v18, %v1028_v41  ;;  %v1350_v33 = vmul.f32 %v1343_v15, %v4114_v56  ;;  %v4116_v11 = vmov %v4092_v29 }
 0x23c   : > { %v1356_v55 = vmul.f32 %v1343_v15, %v4116_v11  ;;  %v1334_v22 = vadd.f32 %v1333_v13, %v1307_v34  ;;  %v1340_v48 = vadd.f32 %v1339_v62, %v1313_v45  ;;  %v4117_v32 = vmov %v4093_v3  ;;  %v1376_v34 = vld [vmem:[#allocation2 + $0xf9] sm:$0xff]  ;;  %v998_v62 = vld [vmem:[#allocation2 + $0xf1] sm:$0xff] }
 0x23d   : > { %v1362_v59 = vmul.f32 %v1343_v15, %v4117_v32  ;;  %v4118_v54 = vmov %v4098_v42  ;;  %v1021_v29 = vadd.f32 %v4119_v16, %v1018_v25  ;;  %v3450_v3 = vadd.f32 %v4120_v9, %v1036_v46  ;;  %v4131_v45 = vld [vmem:[#allocation97_spill] sm:$0xff]  ;;  %v4139_v32 = vld [vmem:[#allocation107_spill] sm:$0xff] }
 0x23e   : > { %v1377_v19 = vmul.f32 %v1370_v50, %v4118_v54  ;;  %v4121_v38 = vmov %v4100_v26  ;;  %v4122_v63 = vstv %s4111_s17  ;;  %v1048_v31 = vadd.f32 %v4123_v52, %v1045_v51  ;;  %v4144_v52 = vld [vmem:[#allocation109_spill] sm:$0xff] }
 0x23f   : > { %v1383_v21 = vmul.f32 %v1370_v50, %v4121_v38  ;;  %v1353_v40 = vmul.f32 %v1349_v2, %v4122_v63  ;;  %v4124_v60 = vmov %v4122_v63  ;;  %v4125_v47 = vstv %s4113_s25 }
 0x240   : > { %v969_v6 = vmul.f32 %v4124_v60, %v962_v14  ;;  %v978_v17 = vmul.f32 %v4125_v47, %v962_v14  ;;  %v4126_v53 = vstv %s4115_s14  ;;  %v1057_v26 = vadd.f32 %v4127_v5, %v1054_v61  ;;  %v1403_v5 = vld [vmem:[#allocation2 + $0xfa] sm:$0xff] }
 0x241   : > { %v987_v42 = vmul.f32 %v4126_v53, %v962_v14  ;;  %v1352_v41 = vadd.f32 %v4128_v7, %v1350_v33  ;;  %v1358_v4 = vadd.f32 %v4129_v30, %v1356_v55  ;;  %v4130_v24 = vmov %v4106_v20 }
 0x242   : > { %v1389_v35 = vmul.f32 %v1370_v50, %v4130_v24  ;;  %v1364_v15 = vadd.f32 %v4131_v45, %v1362_v59  ;;  %v1379_v13 = vadd.f32 %v4132_v37, %v1377_v19  ;;  %v4133_v20 = vmov %v4107_v44 }
 0x243   : > { %v1404_v25 = vmul.f32 %v1397_v57, %v4133_v20  ;;  %v4134_v44 = vmov %v4110_v28  ;;  %v1385_v1 = vadd.f32 %v4135_v49, %v1383_v21  ;;  %v1354_v28 = vadd.f32 %v1353_v40, %v1352_v41  ;;  %v4143_v21 = vld [vmem:[#allocation108_spill] sm:$0xff] }
 0x244   : > { %v1410_v46 = vmul.f32 %v1397_v57, %v4134_v44  ;;  %v4136_v51 = vmov %v4125_v47  ;;  %v4137_v18 = vmov %v4126_v53  ;;  %v970_v56 = vadd.f32 %v969_v6, %v967_v36  ;;  %v1034_v6 = vld [vmem:[#allocation2 + $0xf2] sm:$0xff] }
 0x245   : > { %v1359_v50 = vmul.f32 %v1349_v2, %v4136_v51  ;;  %v1365_v61 = vmul.f32 %v1349_v2, %v4137_v18  ;;  %v979_v33 = vadd.f32 %v978_v17, %v976_v27  ;;  %v988_v11 = vadd.f32 %v987_v42, %v985_v58 }
 0x246   : > { %v4138_v55 = vstv %s2907_s27  ;;  %v1391_v59 = vadd.f32 %v4139_v32, %v1389_v35  ;;  %v4140_v54 = vstv %s4105_s18  ;;  %v4142_v38 = vstv %s2916_s6  ;;  %s3496_s27 = sld [smem:[#allocation9 + $0x6b]]  ;;  %s4152_s6 = sld [smem:[#allocation98_spill]] }
 0x247   : > { %v1380_v14 = vmul.f32 %v1376_v34, %v4138_v55  ;;  %v1416_v19 = vmul.f32 %v1397_v57, %v4140_v54  ;;  %v4141_v16 = vmov %v4138_v55  ;;  %v1386_v63 = vmul.f32 %v1376_v34, %v4142_v38  ;;  %v4159_v54 = vld [vmem:[#allocation110_spill] sm:$0xff] }
 0x248   : > { %v1005_v9 = vmul.f32 %v4141_v16, %v998_v62  ;;  %v1406_v40 = vadd.f32 %v4143_v21, %v1404_v25  ;;  %v1412_v60 = vadd.f32 %v4144_v52, %v1410_v46  ;;  %v4145_v2 = vmov %v4142_v38  ;;  %v592_v21 = vpop.permute.xlu0 %591 }
 0x249   : > { %v1014_v36 = vmul.f32 %v4145_v2, %v998_v62  ;;  %v4146_v27 = vstv %s2927_s22  ;;  %v1355_v47 = vadd.f32 %v1354_v28, %v1328_v43  ;;  %v1360_v17 = vadd.f32 %v1359_v50, %v1358_v4  ;;  %v1064_v28 = vld [vmem:[#allocation2 + $0x48] sm:$0xff]  ;;  %s4160_s22 = sld [smem:[#allocation111_spill]] }
 0x24a   : > { %v1023_v58 = vmul.f32 %v4146_v27, %v998_v62  ;;  %v1366_v57 = vadd.f32 %v1365_v61, %v1364_v15  ;;  %v4147_v53 = vmov %v4146_v27  ;;  %v971_v7 = vadd.f32 %v970_v56, %v3404_v23  ;;  %v590_v23 = vpop.permute.xlu1 %589 }
 0x24b   : > { %v1392_v42 = vmul.f32 %v1376_v34, %v4147_v53  ;;  %v980_v41 = vadd.f32 %v979_v33, %v3423_v12  ;;  %v989_v30 = vadd.f32 %v988_v11, %v3425_v0  ;;  %v1381_v24 = vadd.f32 %v1380_v14, %v1379_v13  ;;  %v4168_v53 = vld [vmem:[#allocation116_spill] sm:$0xff] }
 0x24c   : > { %v1006_v35 = vadd.f32 %v1005_v9, %v1003_v8  ;;  %v4148_v45 = vstv %s2914_s15  ;;  %v4149_v37 = vstv %s2925_s12  ;;  %v1387_v20 = vadd.f32 %v1386_v63, %v1385_v1  ;;  %s4156_s15 = sld [smem:[#allocation99_spill]]  ;;  %s4158_s12 = sld [smem:[#allocation101_spill]] }
 0x24d   : > { %v1041_v43 = vmul.f32 %v4148_v45, %v1034_v6  ;;  %v1050_v4 = vmul.f32 %v4149_v37, %v1034_v6  ;;  %v1015_v15 = vadd.f32 %v1014_v36, %v1012_v10  ;;  %v1024_v25 = vadd.f32 %v1023_v58, %v1021_v29 }
 0x24e   : > { %v4150_v34 = vstv %s2947_s29  ;;  %v4151_v46 = vmov %v4148_v45  ;;  %v1361_v49 = vadd.f32 %v1360_v17, %v1334_v22  ;;  %v1367_v12 = vadd.f32 %v1366_v57, %v1340_v48  ;;  %s4161_s29 = sld [smem:[#allocation113_spill]]  ;;  %v594_v52 = vpop.permute.xlu1 %593  ;;  %v4167_v17 = vld [vmem:[#allocation115_spill] sm:$0xff] }
 0x24f   : > { %v1059_v44 = vmul.f32 %v4150_v34, %v1034_v6  ;;  %v1407_v62 = vmul.f32 %v1403_v5, %v4151_v46  ;;  %v1393_v0 = vadd.f32 %v1392_v42, %v1391_v59  ;;  %v4153_v13 = vmov %v4149_v37  ;;  %v1100_v59 = vld [vmem:[#allocation2 + $0x49] sm:$0xff] }
 0x250   : > { %v1413_v8 = vmul.f32 %v1403_v5, %v4153_v13  ;;  %v1007_v51 = vadd.f32 %v1006_v35, %v971_v7  ;;  %v1016_v50 = vadd.f32 %v1015_v15, %v980_v41  ;;  %v1025_v1 = vadd.f32 %v1024_v25, %v989_v30  ;;  %v1136_v6 = vld [vmem:[#allocation2 + $0x4a] sm:$0xff]  ;;  %v4173_v15 = vld [vmem:[#allocation89_spill] sm:$0xff] }
 0x251   : > { %v1382_v10 = vadd.f32 %v1381_v24, %v1355_v47  ;;  %v1042_v29 = vadd.f32 %v1041_v43, %v3450_v3  ;;  %v1051_v18 = vadd.f32 %v1050_v4, %v1048_v31  ;;  %v1388_v61 = vadd.f32 %v1387_v20, %v1361_v49  ;;  %v1424_v47 = vld [vmem:[#allocation2 + $0x50] sm:$0xff]  ;;  %v4169_v7 = vld [vmem:[#allocation74_spill] sm:$0xff] }
 0x252   : > { %v4154_v56 = vmov %v4150_v34  ;;  %v1060_v11 = vadd.f32 %v1059_v44, %v1057_v26  ;;  %v1408_v55 = vadd.f32 %v1407_v62, %v1406_v40  ;;  %v4155_v22 = vstv %s2949_s9  ;;  %v4170_v30 = vld [vmem:[#allocation75_spill] sm:$0xff]  ;;  %s4197_s9 = sld [smem:[#allocation120_spill]] }
 0x253   : > { %v1419_v33 = vmul.f32 %v1403_v5, %v4154_v56  ;;  %v1072_v48 = vmul.f32 %v4155_v22, %v1064_v28  ;;  %v4157_v14 = vstv %s4152_s6  ;;  %v1418_v16 = vadd.f32 %v4159_v54, %v1416_v19  ;;  %v1451_v5 = vld [vmem:[#allocation2 + $0x51] sm:$0xff]  ;;  %v4188_v54 = vld [vmem:[#allocation124_spill] sm:$0xff] }
 0x254   : > { %v1081_v32 = vmul.f32 %v4157_v14, %v1064_v28  ;;  %v1394_v9 = vadd.f32 %v1393_v0, %v1367_v12  ;;  %v1414_v38 = vadd.f32 %v1413_v8, %v1412_v60  ;;  %v1166_v63 = vstv %s3496_s27  ;;  %v1478_v20 = vld [vmem:[#allocation2 + $0x52] sm:$0xff] }
 0x255   : > { %v3520_v3 = vadd.f32 %v1042_v29, %v1007_v51  ;;  %v3522_v31 = vadd.f32 %v1051_v18, %v1016_v50  ;;  %v3524_v26 = vadd.f32 %v1060_v11, %v1025_v1  ;;  %v3526_v40 = vadd.f32 %v1408_v55, %v1382_v10 }
 0x256   : > { %v3528_v2 = vadd.f32 %v1414_v38, %v1388_v61  ;;  %v1420_v36 = vadd.f32 %v1419_v33, %v1418_v16  ;;  %v4162_v27 = vstv %s4156_s15  ;;  %v4163_v58 = vstv %s4158_s12 }
 0x257   : > { %v1090_v19 = vmul.f32 %v4162_v27, %v1064_v28  ;;  %v1108_v60 = vmul.f32 %v4163_v58, %v1100_v59  ;;  %v1075_v57 = vadd.f32 %v4167_v17, %v1072_v48  ;;  %v1084_v42 = vadd.f32 %v4168_v53, %v1081_v32  ;;  %v4186_v48 = vld [vmem:[#allocation117_spill] sm:$0xff]  ;;  %v4187_v32 = vld [vmem:[#allocation118_spill] sm:$0xff] }
 0x258   : > { %v616_v41 = vsel %vm522_vm5, %v4169_v7, %v590_v23  ;;  %v617_v24 = vsel %vm522_vm5, %v4170_v30, %v592_v21  ;;  %v3542_v35 = vadd.f32 %v1420_v36, %v1394_v9  ;;  %v4171_v45 = vstv %s4160_s22  ;;  %v4189_v9 = vld [vmem:[#allocation126_spill] sm:$0xff]  ;;  %v4191_v36 = vld [vmem:[#allocation127_spill] sm:$0xff]  ;;  %v4196_v7 = vld [vmem:[#allocation128_spill] sm:$0xff] }
 0x259   : > { %v1117_v43 = vmul.f32 %v4171_v45, %v1100_v59  ;;  %v4172_v37 = vstv %s4161_s29  ;;  %629 = vst.msk [vmem:[#allocation2 + $0x108] sm:$0xff] %vm275_vm0, %v616_v41  ;;  %630 = vst.msk [vmem:[#allocation2 + $0x110] sm:$0xff] %vm275_vm0, %v617_v24  ;;  %v618_v25 = vsel %vm522_vm5, %v4173_v15, %v594_v52  ;;  %v4174_v34 = vstv %s4164_s0  ;;  %v4190_v21 = vld [vmem:[#allocation121_spill] sm:$0xff]  ;;  %v4194_v53 = vld [vmem:[#allocation122_spill] sm:$0xff] }
 0x25a   : > { %v1126_v4 = vmul.f32 %v4172_v37, %v1100_v59  ;;  %v1144_v44 = vmul.f32 %v4174_v34, %v1136_v6  ;;  %v4175_v46 = vstv %s4165_s20  ;;  %v4176_v23 = vstv %s4166_s7  ;;  %631 = vst.msk [vmem:[#allocation2 + $0x118] sm:$0x3] %vm511_vm4, %v618_v25  ;;  %v4198_v30 = vld [vmem:[#allocation130_spill] sm:$0xff] }
 0x25b   : > { %v1153_v62 = vmul.f32 %v4175_v46, %v1136_v6  ;;  %v1162_v49 = vmul.f32 %v4176_v23, %v1136_v6  ;;  %v4177_v12 = vmov %v4155_v22  ;;  %v4178_v13 = vmov %v4157_v14  ;;  %v4203_v25 = vld [vmem:[#allocation134_spill] sm:$0xff] }
 0x25c   : > { %v1431_v0 = vmul.f32 %v1424_v47, %v4177_v12  ;;  %v1437_v8 = vmul.f32 %v1424_v47, %v4178_v13  ;;  %v4179_v28 = vmov %v4162_v27  ;;  %v4180_v50 = vmov %v4163_v58  ;;  %v4192_v58 = vld [vmem:[#allocation129_spill] sm:$0xff] }
 0x25d   : > { %v1443_v51 = vmul.f32 %v1424_v47, %v4179_v28  ;;  %v1458_v1 = vmul.f32 %v1451_v5, %v4180_v50  ;;  %v4181_v10 = vmov %v4171_v45  ;;  %v4182_v39 = vmov %v4172_v37  ;;  %v4193_v47 = vld [vmem:[#allocation119_spill] sm:$0xff]  ;;  %v4200_v45 = vld [vmem:[#allocation131_spill] sm:$0xff]  ;;  %v4201_v37 = vld [vmem:[#allocation132_spill] sm:$0xff] }
 0x25e   : > { %v1464_v29 = vmul.f32 %v1451_v5, %v4181_v10  ;;  %v1470_v18 = vmul.f32 %v1451_v5, %v4182_v39  ;;  %v4183_v61 = vmov %v4174_v34  ;;  %v4184_v33 = vmov %v4175_v46 }
 0x25f   : > { %v1485_v56 = vmul.f32 %v1478_v20, %v4183_v61  ;;  %v1491_v11 = vmul.f32 %v1478_v20, %v4184_v33  ;;  %v4185_v55 = vmov %v4176_v23  ;;  %v1093_v14 = vadd.f32 %v4186_v48, %v1090_v19 }
 0x260   : > { %v1497_v22 = vmul.f32 %v1478_v20, %v4185_v55  ;;  %v1111_v59 = vadd.f32 %v4187_v32, %v1108_v60  ;;  %v1120_v16 = vadd.f32 %v4188_v54, %v1117_v43  ;;  %v1129_v38 = vadd.f32 %v4189_v9, %v1126_v4  ;;  %v4195_v60 = vld [vmem:[#allocation125_spill] sm:$0xff] }
 0x261   : > { %v1147_v52 = vadd.f32 %v4190_v21, %v1144_v44  ;;  %v1156_v27 = vadd.f32 %v4191_v36, %v1153_v62  ;;  %v1165_v6 = vadd.f32 %v4192_v58, %v1162_v49  ;;  %v1433_v17 = vadd.f32 %v4193_v47, %v1431_v0  ;;  %v4202_v20 = vld [vmem:[#allocation133_spill] sm:$0xff]  ;;  %v1070_v44 = vld [vmem:[#allocation2 + $0x108] sm:$0xff] }
 0x262   : > { %v1439_v19 = vadd.f32 %v4194_v53, %v1437_v8  ;;  %v1445_v5 = vadd.f32 %v4195_v60, %v1443_v51  ;;  %v1460_v41 = vadd.f32 %v4196_v7, %v1458_v1  ;;  %v1466_v24 = vadd.f32 %v4198_v30, %v1464_v29  ;;  %v1106_v46 = vld [vmem:[#allocation2 + $0x109] sm:$0xff]  ;;  %v1457_v32 = vld [vmem:[#allocation2 + $0x111] sm:$0xff] }
 0x263   : > { %v1472_v43 = vadd.f32 %v4200_v45, %v1470_v18  ;;  %v1487_v4 = vadd.f32 %v4201_v37, %v1485_v56  ;;  %v1493_v15 = vadd.f32 %v4202_v20, %v1491_v11  ;;  %v1499_v34 = vadd.f32 %v4203_v25, %v1497_v22  ;;  %v1142_v62 = vld [vmem:[#allocation2 + $0x10a] sm:$0xff]  ;;  %v1484_v25 = vld [vmem:[#allocation2 + $0x112] sm:$0xff] }
 0x264   : > { %v4204_v23 = vstv %s3048_s3  ;;  %v4205_v12 = vstv %s3058_s26  ;;  %v4206_v13 = vstv %s3060_s4  ;;  %v4207_v28 = vstv %s3070_s10  ;;  %v1430_v48 = vld [vmem:[#allocation2 + $0x110] sm:$0xff]  ;;  %s4218_s3 = sld [smem:[#allocation25_spill]]  ;;  %s4222_s10 = sld [smem:[#allocation21_spill]] }
 0x265   : > { %v1077_v49 = vmul.f32 %v4204_v23, %v1070_v44  ;;  %v1086_v0 = vmul.f32 %v4205_v12, %v1070_v44  ;;  %v1095_v8 = vmul.f32 %v4206_v13, %v1070_v44  ;;  %v1113_v51 = vmul.f32 %v4207_v28, %v1106_v46 }
 0x266   : > { %v4208_v50 = vstv %s3079_s2  ;;  %v4209_v10 = vstv %s3093_s21  ;;  %v4210_v39 = vstv %s4197_s9  ;;  %v4211_v61 = vstv %s4199_s16  ;;  %s4221_s2 = sld [smem:[#allocation18_spill]] }
 0x267   : > { %v1122_v1 = vmul.f32 %v4208_v50, %v1106_v46  ;;  %v1131_v29 = vmul.f32 %v4209_v10, %v1106_v46  ;;  %v1149_v18 = vmul.f32 %v4210_v39, %v1142_v62  ;;  %v1158_v56 = vmul.f32 %v4211_v61, %v1142_v62 }
 0x268   : > { %v1078_v33 = vadd.f32 %v1077_v49, %v1075_v57  ;;  %v1087_v11 = vadd.f32 %v1086_v0, %v1084_v42  ;;  %v1096_v55 = vadd.f32 %v1095_v8, %v1093_v14  ;;  %v1114_v22 = vadd.f32 %v1113_v51, %v1111_v59 }
 0x269   : > { %v1123_v54 = vadd.f32 %v1122_v1, %v1120_v16  ;;  %v1132_v9 = vadd.f32 %v1131_v29, %v1129_v38  ;;  %v1150_v21 = vadd.f32 %v1149_v18, %v1147_v52  ;;  %v1159_v36 = vadd.f32 %v1158_v56, %v1156_v27 }
 0x26a   : > { %v1079_v58 = vadd.f32 %v1078_v33, %v3520_v3  ;;  %v1088_v47 = vadd.f32 %v1087_v11, %v3522_v31  ;;  %v1097_v53 = vadd.f32 %v1096_v55, %v3524_v26  ;;  %v1167_v60 = vmul.f32 %v1166_v63, %v1142_v62  ;;  %s1860_s26 = smul.u32 48, %s4218_s3  ;;  %s1515_s30 = scalar_lea.sflag [#allocation5], %s4218_s3 }
 0x26b   : > { %v4212_v57 = vmov %v4204_v23  ;;  %v4213_v42 = vmov %v4205_v12  ;;  %v4214_v59 = vmov %v4206_v13  ;;  %v4215_v45 = vmov %v4207_v28  ;;  %p4224_p6 = scmp.ne.s32.totalorder %s4222_s10, 0 }
 0x26c   : > { %v1434_v7 = vmul.f32 %v1430_v48, %v4212_v57  ;;  %v1440_v14 = vmul.f32 %v1430_v48, %v4213_v42  ;;  %v1446_v30 = vmul.f32 %v1430_v48, %v4214_v59  ;;  %v1461_v16 = vmul.f32 %v1457_v32, %v4215_v45  ;;  %s263_s4 = scalar_lea.vmem [#allocation10], %s1860_s26  ;;  %s1861_s21 = smul.u32 768, %s4221_s2 }
 0x26d   : > { %v1115_v38 = vadd.f32 %v1114_v22, %v1079_v58  ;;  %v1124_v52 = vadd.f32 %v1123_v54, %v1088_v47  ;;  %v1133_v27 = vadd.f32 %v1132_v9, %v1097_v53  ;;  %v1168_v3 = vadd.f32 %v1167_v60, %v1165_v6  ;;  %s1530_s13 = sshll.u32 %s263_s4, 4  ;;  %s3646_s13 = int_to_ptr.vmem [resolvable:$true] %s1530_s13 }
 0x26e   : > { %v1435_v31 = vadd.f32 %v1434_v7, %v1433_v17  ;;  %v1441_v26 = vadd.f32 %v1440_v14, %v1439_v19  ;;  %v1447_v37 = vadd.f32 %v1446_v30, %v1445_v5  ;;  %v1462_v20 = vadd.f32 %v1461_v16, %v1460_v41  ;;  %s3644_s11 = scalar_lea.hbm %s4223_s19, %s1861_s21  ;;  %s2044_s23 = scalar_lea.vmem %s3646_s13, 768 }
 0x26f   : > { %v1151_v44 = vadd.f32 %v1150_v21, %v1115_v38  ;;  %v1160_v46 = vadd.f32 %v1159_v36, %v1124_v52  ;;  %v1169_v62 = vadd.f32 %v1168_v3, %v1133_v27  ;;  %v4216_v23 = vmov %v4208_v50  ;;  %p2045_p2 = scmp.ne.s32.totalorder %s3646_s13, %s2044_s23  ;;  %p2051_p10 = scmp.lt.s32.totalorder %s3646_s13, %s2049_s5 }
 0x270   : > { %v1467_v49 = vmul.f32 %v1457_v32, %v4216_v23  ;;  %v1436_v12 = vadd.f32 %v1435_v31, %v3526_v40  ;;  %v1442_v0 = vadd.f32 %v1441_v26, %v3528_v2  ;;  %v1448_v13 = vadd.f32 %v1447_v37, %v3542_v35  ;;  %p2052_p5 = scmp.lt.s32.totalorder %s2050_s8, %s2044_s23 }
 0x271   : > { %v4217_v6 = vmov %v4209_v10  ;;  %1957 = vtanh.f32 %v1151_v44  ;;  %v4219_v19 = vmov %v4210_v39  ;;  %v4220_v41 = vmov %v4211_v61  ;;  %p2046_p9 = pnand %p2045_p2, %p4224_p6 }
 0x272   : > { %v1473_v8 = vmul.f32 %v1457_v32, %v4217_v6  ;;  %v1468_v17 = vadd.f32 %v1467_v49, %v1466_v24  ;;  %v1488_v5 = vmul.f32 %v1484_v25, %v4219_v19  ;;  %v1494_v28 = vmul.f32 %v1484_v25, %v4220_v41  ;;  %p2053_p11 = por %p2052_p5, %p2051_p10 }
 0x273   : > { %1959 = vtanh.f32 %v1160_v46  ;;  %v1463_v51 = vadd.f32 %v1462_v20, %v1436_v12  ;;  %v1500_v1 = vmul.f32 %v1484_v25, %v1166_v63  ;;  %p2047_p4 = pneg %p2046_p9 }
 0x274   : > { %v1474_v50 = vadd.f32 %v1473_v8, %v1472_v43  ;;  %1961 = vtanh.f32 %v1169_v62  ;;  %v1469_v40 = vadd.f32 %v1468_v17, %v1442_v0  ;;  %v1489_v10 = vadd.f32 %v1488_v5, %v1487_v4 }
 0x275   : > { %v1495_v2 = vadd.f32 %v1494_v28, %v1493_v15  ;;  %v1501_v29 = vadd.f32 %v1500_v1, %v1499_v34  ;;  %p2054_p3 = pnand %p2053_p11, %p2047_p4 }
 0x276   : > { %v1475_v35 = vadd.f32 %v1474_v50, %v1448_v13  ;;  %v1490_v39 = vadd.f32 %v1489_v10, %v1463_v51 }
 0x277   : > { %v1496_v18 = vadd.f32 %v1495_v2, %v1469_v40 }
 0x278   : > { %v1502_v24 = vadd.f32 %v1501_v29, %v1475_v35  ;;  %1963 = vtanh.f32 %v1490_v39 }
 0x279   : > { %1965 = vtanh.f32 %v1496_v18 }
 0x27a   : > { %1967 = vtanh.f32 %v1502_v24 }
 0x27b   : > { %v1958_v61 = vpop.eup %1957 }
 0x27c   : > { %1171 = vst.msk [vmem:[%s263_s4] sm:$0xff] %vm275_vm0, %v1958_v61 }
 0x27d   : > { %v1960_v56 = vpop.eup %1959 }
 0x27e   : > { %v1962_v63 = vpop.eup %1961  ;;  %1850 = vst.msk [vmem:[%s263_s4 + $0x10] sm:$0xff] %vm275_vm0, %v1960_v56 }
 0x27f   : > { %1851 = vst.msk [vmem:[%s263_s4 + $0x20] sm:$0xff] %vm275_vm0, %v1962_v63 }
 0x282   : > { %v1964_v43 = vpop.eup %1963 }
 0x283   : > { %v1966_v4 = vpop.eup %1965  ;;  %1852 = vst.msk [vmem:[%s263_s4 + $0x8] sm:$0xff] %vm275_vm0, %v1964_v43 }
 0x284   : > { %v1968_v15 = vpop.eup %1967  ;;  %1853 = vst.msk [vmem:[%s263_s4 + $0x18] sm:$0xff] %vm275_vm0, %v1966_v4 }
 0x285   : > { %1854 = vst.msk [vmem:[%s263_s4 + $0x28] sm:$0xff] %vm275_vm0, %v1968_v15 }
 0x286   : > { %2057 = shalt.err (!%p2054_p3)
}
 0x287   : > { %s2058_s18 = scalar_lea.hbm %s3644_s11, 768  ;;  %s2062_s14 = scalar_lea.hbm %s4223_s19, 1536 }
 0x288   : > { %p2059_p7 = scmp.ne.s32.totalorder %s3644_s11, %s2058_s18  ;;  %p2063_p8 = scmp.lt.u32.totalorder %s3644_s11, %s4223_s19 }
 0x289   : > { %p2064_p13 = scmp.lt.u32.totalorder %s2062_s14, %s2058_s18  ;;  %p2066_p2 = scmp.lt.u32.totalorder %s2058_s18, %s3644_s11 }
 0x28a   : > { %p2060_p0 = pnand %p2059_p7, %p4224_p6 }
 0x28b   : > { %p2065_p12 = por %p2064_p13, %p2063_p8 }
 0x28c   : > { %p2061_p1 = pneg %p2060_p0 }
 0x28d   : > { %p2067_p9 = por %p2066_p2, %p2065_p12 }
 0x28f   : > { %p2068_p4 = pnand %p2067_p9, %p2061_p1 }
 0x291   : > { %2071 = shalt.err (!%p2068_p4)
}
 0x292   : > { %s2149_s15 = smov 128   ;;  %s2150_s12 = smov 8  }
 0x293   : > { %1870 = dma.vmem_to_hbm [thread:$0]  (%p4224_p6), %s3646_s13, 768, %s3644_s11, %s1515_s30, %s2149_s15, %s2149_s15, %s2150_s12  }
 0x294 PF: > { %s4225_s22 = sld [smem:[#allocation15_spill]]  ;;  %s4226_s29 = sld [smem:[#allocation22_spill]] }
 0x295   : > { %s4227_s0 = sld [smem:[#allocation20_spill]] }
 0x29a   : > { %s1545_s20 = sand.u32 1, %s4225_s22   ;;  %p4228_p10 = scmp.ne.s32.totalorder %s4226_s29, 0 }
 0x29b   : > { %p4229_p5 = scmp.ge.s32.totalorder %s4227_s0, 2  ;;  %s1546_s7 = scalar_lea.sflag [#allocation5], %s1545_s20 }
 0x29d   : > { %p1884_p11 = pnand %p4229_p5, %p4228_p10 }
 0x29f   : > { %2109 = dma.done.wait (!%p1884_p11), %s1546_s7, 768  }
 0x2a0   : > { %2111 = vsyncadd (!%p1884_p11), %s1546_s7, 4294966528  ;;  %s23_s17 = sadd.s32 1, %s4227_s0   ;;  %s4230_s12 = sld [smem:[#allocation16_spill]] }
 0x2a1   : > { %p20_p3 = scmp.ge.s32.totalorder %s23_s17, 4   ;;  %s4231_s13 = sld [smem:[#allocation17_spill]] }
 0x2a2   : > { %s4232_s14 = sld [smem:[#allocation24_spill]]  ;;  %s4233_s15 = sld [smem:[#allocation19_spill]] }
 0x2a3   : > { %s4234_s16 = sld [smem:[#allocation23_spill]]  ;;  %22 = sbr.rel (!%p20_p3) target bundleno = 14 (0xe), region = 173 }
 0x2aa   :  { %1551 = vsyncpa [#allocation4], 1 }
 0x2ab   :  { %1553 = vsyncpa [#allocation4 + $0x1], 1 }
 0x2ac   :  { %1554 = vsyncpa [#allocation8], 1 }
 0x2ad   :  { %1556 = vsyncpa [#allocation8 + $0x1], 1 }
 0x2ae   :  { %1557 = vsyncpa [#allocation5], 1 }
 0x2af   :  { %1559 = vsyncpa [#allocation5 + $0x1], 1 }
 0x2b0   :  { %1560 = vsyncpa [#allocation6], 1 }
 0x2b1   :  { %1562 = vsyncpa [#allocation6 + $0x1], 1 }

</bundles_post_ra>
